<compile_context>
chip_gen: v5e
topology: v5e:2x2
jax: 0.10.0
libtpu: 0.0.40
codegen_flags: <defaults>
</compile_context>

<pallas_src>
import math
import functools

import jax
import jax.numpy as jnp
from jax.experimental import pallas as pl
from jax.experimental.pallas import tpu as pltpu


def _round_up(v, m):
    return ((v + m - 1) // m) * m


# --------------------------------------------------------------------------
# Pallas kernel 1: fused matmul + bias (+ optional ReLU), lane-dense output.
# Used for the standalone 1x1 head and as the conv fallback path.
# --------------------------------------------------------------------------
def _mm_bias_kernel(x_ref, w_ref, b_ref, o_ref, *, relu):
    y = jnp.dot(x_ref[...], w_ref[...], preferred_element_type=jnp.float32)
    y = y + b_ref[...]
    if relu:
        y = jnp.maximum(y, 0.0)
    o_ref[...] = y.astype(o_ref.dtype)


def matmul_bias_act(x, w, b, relu):
    """(M,K)@(K,N)+b.  Returns (M, Np) with Np = round_up(N,128); real cols are [:N]."""
    M, K = x.shape
    K2, N = w.shape
    assert K == K2
    Np = _round_up(N, 128)
    if Np > N:
        w = jnp.pad(w, ((0, 0), (0, Np - N)))
        b = jnp.pad(b, (0, Np - N))
    b = b.reshape(1, Np)

    # Large M tile (amortize per-grid-step overhead); pad rows so the grid divides.
    tm = 1024 if M > 1024 else _round_up(M, 8)
    Mp = _round_up(M, tm)
    if Mp > M:
        x = jnp.pad(x, ((0, Mp - M), (0, 0)))

    out = pl.pallas_call(
        functools.partial(_mm_bias_kernel, relu=relu),
        out_shape=jax.ShapeDtypeStruct((Mp, Np), jnp.float32),
        grid_spec=pltpu.PrefetchScalarGridSpec(
            num_scalar_prefetch=0,
            grid=(Mp // tm,),
            in_specs=[
                pl.BlockSpec((tm, K), lambda i: (i, 0)),
                pl.BlockSpec((K, Np), lambda i: (0, 0)),
                pl.BlockSpec((1, Np), lambda i: (0, 0)),
            ],
            out_specs=pl.BlockSpec((tm, Np), lambda i: (i, 0)),
        ),
        compiler_params=pltpu.CompilerParams(
            dimension_semantics=("parallel",)),
    )(x, w, b)
    return out[:M]


# --------------------------------------------------------------------------
# Pallas kernel 2: fused 3x3 conv (+bias +ReLU), one batch element per step.
# The 9 taps are accumulated in VMEM (no HBM im2col).  Variant with a fused
# trailing 1x1 head (conv -> ReLU -> head) for the last stage.
# --------------------------------------------------------------------------
def _conv3x3_kernel(xp_ref, w_ref, b_ref, o_ref, *, relu, H, W):
    Cin = xp_ref.shape[-1]
    Cout = o_ref.shape[-1]
    acc = jnp.zeros((H * W, Cout), jnp.float32)
    for dy in range(3):
        for dx in range(3):
            patch = xp_ref[0, pl.ds(dy, H), pl.ds(dx, W), :].reshape(H * W, Cin)
            acc = acc + jnp.dot(patch, w_ref[dy, dx],
                                preferred_element_type=jnp.float32)
    acc = acc + b_ref[...]
    if relu:
        acc = jnp.maximum(acc, 0.0)
    o_ref[0] = acc.reshape(H, W, Cout).astype(o_ref.dtype)


def _conv3x3_head_kernel(xp_ref, w_ref, b_ref, hw_ref, hb_ref, o_ref, *, H, W):
    Cin = xp_ref.shape[-1]
    Cmid = w_ref.shape[-1]
    Kp = o_ref.shape[-1]
    acc = jnp.zeros((H * W, Cmid), jnp.float32)
    for dy in range(3):
        for dx in range(3):
            patch = xp_ref[0, pl.ds(dy, H), pl.ds(dx, W), :].reshape(H * W, Cin)
            acc = acc + jnp.dot(patch, w_ref[dy, dx],
                                preferred_element_type=jnp.float32)
    acc = jnp.maximum(acc + b_ref[...], 0.0)          # conv + ReLU
    heat = jnp.dot(acc, hw_ref[...],
                   preferred_element_type=jnp.float32) + hb_ref[...]
    o_ref[0] = heat.reshape(H, W, Kp).astype(o_ref.dtype)


def _conv3x3_pallas(xp, w, b2d, H, W, relu, head):
    B = xp.shape[0]
    Cin = xp.shape[-1]
    Coutp = w.shape[-1]
    in_specs = [
        pl.BlockSpec((1, H + 2, W + 2, Cin), lambda i: (i, 0, 0, 0)),
        pl.BlockSpec((3, 3, Cin, Coutp), lambda i: (0, 0, 0, 0)),
        pl.BlockSpec((1, Coutp), lambda i: (0, 0)),
    ]
    args = [xp, w, b2d]
    if head is None:
        kern = functools.partial(_conv3x3_kernel, relu=relu, H=H, W=W)
        c_out = Coutp
    else:
        hw, hb2d = head
        Kp = hw.shape[-1]
        kern = functools.partial(_conv3x3_head_kernel, H=H, W=W)
        in_specs += [pl.BlockSpec((Coutp, Kp), lambda i: (0, 0)),
                     pl.BlockSpec((1, Kp), lambda i: (0, 0))]
        args += [hw, hb2d]
        c_out = Kp
    return pl.pallas_call(
        kern,
        out_shape=jax.ShapeDtypeStruct((B, H, W, c_out), jnp.float32),
        grid_spec=pltpu.PrefetchScalarGridSpec(
            num_scalar_prefetch=0,
            grid=(B,),
            in_specs=in_specs,
            out_specs=pl.BlockSpec((1, H, W, c_out), lambda i: (i, 0, 0, 0)),
        ),
        compiler_params=pltpu.CompilerParams(
            dimension_semantics=("parallel",)),
    )(*args)


def conv2d_3x3(x, w, b, relu=True, head_w=None, head_b=None):
    """'same' 3x3 conv (+ReLU) on NHWC x, optionally fused with a trailing 1x1
    head.  Output channels are zero-padded to a multiple of 128 (lane-dense
    stores); real channels come first.  Zero-padded input channels contribute
    nothing (weights are zero-padded on Cin), so semantics are exact."""
    B, H, W, Cin_x = x.shape
    _, _, Cin_w, Cout = w.shape
    if Cin_w < Cin_x:                                   # padded input channels
        w = jnp.pad(w, ((0, 0), (0, 0), (0, Cin_x - Cin_w), (0, 0)))
    Coutp = _round_up(Cout, 128)
    if Coutp > Cout:
        w = jnp.pad(w, ((0, 0), (0, 0), (0, 0), (0, Coutp - Cout)))
    b2d = jnp.pad(b, (0, Coutp - Cout)).reshape(1, Coutp)

    head = None
    if head_w is not None:
        K = head_w.shape[-1]
        Kp = _round_up(K, 128)
        hw = head_w
        if hw.shape[0] < Coutp:
            hw = jnp.pad(hw, ((0, Coutp - hw.shape[0]), (0, 0)))
        if Kp > K:
            hw = jnp.pad(hw, ((0, 0), (0, Kp - K)))
        hb2d = jnp.pad(head_b, (0, Kp - K)).reshape(1, Kp)
        head = (hw, hb2d)

    xp = jnp.pad(x, ((0, 0), (1, 1), (1, 1), (0, 0)))   # spatial zero pad

    if W % 8 == 0:
        return _conv3x3_pallas(xp, w, b2d, H, W, relu, head)

    # Fallback (W not a multiple of 8): im2col in XLA + lane-dense matmul.
    # TODO(synk): fused 9-tap path assumes W % 8 == 0 for clean in-kernel reshapes.
    patches = [xp[:, dy:dy + H, dx:dx + W, :] for dy in range(3) for dx in range(3)]
    cols = jnp.concatenate(patches, axis=-1).reshape(B * H * W, 9 * Cin_x)
    wmat = w.reshape(9 * Cin_x, Coutp)
    y = matmul_bias_act(cols, wmat, b2d.reshape(-1), relu=relu)
    if head is not None:
        hw, hb2d = head
        y = matmul_bias_act(y, hw, hb2d.reshape(-1), relu=False)
    return y.reshape(B, H, W, y.shape[-1])


# --------------------------------------------------------------------------
# Pallas kernel 3: fused transformer block (LN + fused-QKV 1-head attention +
# ReLU MLP), whole batch in a single grid step.
# --------------------------------------------------------------------------
def _transformer_block_kernel(x_ref,
                              ln1g, ln1b, wqkv, bqkv, wo, bo,
                              ln2g, ln2b, w1, b1, w2, b2,
                              o_ref):
    nb, _n_tok, d = x_ref.shape
    scale = 1.0 / math.sqrt(d)

    def layernorm(v, g, bb):
        mu = jnp.mean(v, axis=-1, keepdims=True)
        var = jnp.mean((v - mu) ** 2, axis=-1, keepdims=True)
        return (v - mu) * jax.lax.rsqrt(var + 1e-5) * g + bb

    g1, be1 = ln1g[...], ln1b[...]
    g2, be2 = ln2g[...], ln2b[...]
    wqkv_v, bqkv_v = wqkv[...], bqkv[...]
    wo_v, bo_v = wo[...], bo[...]
    w1_v, b1_v = w1[...], b1[...]
    w2_v, b2_v = w2[...], b2[...]

    for b in range(nb):                                  # static unroll over batch
        x = x_ref[b].astype(jnp.float32)                 # (N, D)

        # --- self attention (num_heads == 1), fused QKV projection ---
        xn = layernorm(x, g1, be1)
        qkv = jnp.dot(xn, wqkv_v, preferred_element_type=jnp.float32) + bqkv_v
        q = qkv[:, :d]
        k = qkv[:, d:2 * d]
        v = qkv[:, 2 * d:]
        s = jax.lax.dot_general(q, k, (((1,), (1,)), ((), ())),
                                preferred_element_type=jnp.float32) * scale
        s = s - jnp.max(s, axis=-1, keepdims=True)
        p = jnp.exp(s)
        p = p * pl.reciprocal(jnp.sum(p, axis=-1, keepdims=True), approx=True)
        a = jnp.dot(p, v, preferred_element_type=jnp.float32)
        a = jnp.dot(a, wo_v, preferred_element_type=jnp.float32) + bo_v
        x = x + a

        # --- MLP ---
        xn2 = layernorm(x, g2, be2)
        h = jnp.maximum(jnp.dot(xn2, w1_v,
                                preferred_element_type=jnp.float32) + b1_v, 0.0)
        y = jnp.dot(h, w2_v, preferred_element_type=jnp.float32) + b2_v
        o_ref[b] = (x + y).astype(o_ref.dtype)


def transformer_block(x, p):
    B, N, D = x.shape
    hidden = p["w1"].shape[1]

    def fixed(shape):
        nd = len(shape)
        return pl.BlockSpec(shape, lambda i, _nd=nd: (0,) * _nd)

    in_specs = [
        pl.BlockSpec((B, N, D), lambda i: (0, 0, 0)),    # x (whole batch)
        fixed((1, D)), fixed((1, D)),                    # ln1
        fixed((D, 3 * D)), fixed((1, 3 * D)),            # fused qkv
        fixed((D, D)), fixed((1, D)),                    # out proj
        fixed((1, D)), fixed((1, D)),                    # ln2
        fixed((D, hidden)), fixed((1, hidden)),          # mlp w1
        fixed((hidden, D)), fixed((1, D)),               # mlp w2
    ]
    args = (x,
            p["ln1_g"], p["ln1_b"], p["wqkv"], p["bqkv"], p["wo"], p["bo"],
            p["ln2_g"], p["ln2_b"], p["w1"], p["b1"], p["w2"], p["b2"])
    return pl.pallas_call(
        _transformer_block_kernel,
        out_shape=jax.ShapeDtypeStruct((B, N, D), jnp.float32),
        grid_spec=pltpu.PrefetchScalarGridSpec(
            num_scalar_prefetch=0,
            grid=(1,),
            in_specs=in_specs,
            out_specs=pl.BlockSpec((B, N, D), lambda i: (0, 0, 0)),
        ),
        compiler_params=pltpu.CompilerParams(
            dimension_semantics=("arbitrary",)),
    )(*args)


# --------------------------------------------------------------------------
# Bilinear 2x upsample (align_corners=False) -- plain-JAX index/weight glue.
# --------------------------------------------------------------------------
def upsample2x_bilinear(x):
    B, H, W, C = x.shape

    def idx_w(size):
        o = jnp.arange(2 * size, dtype=jnp.float32)
        src = jnp.clip((o + 0.5) / 2.0 - 0.5, 0.0, float(size - 1))
        i0 = jnp.floor(src).astype(jnp.int32)
        i1 = jnp.minimum(i0 + 1, size - 1)
        frac = src - i0.astype(jnp.float32)
        return i0, i1, frac

    i0, i1, fh = idx_w(H)
    x = (x[:, i0, :, :] * (1.0 - fh)[None, :, None, None]
         + x[:, i1, :, :] * fh[None, :, None, None])
    j0, j1, fw = idx_w(W)
    x = (x[:, :, j0, :] * (1.0 - fw)[None, None, :, None]
         + x[:, :, j1, :] * fw[None, None, :, None])
    return x


# --------------------------------------------------------------------------
# Parameter init (deterministic, synthetic) -- logical (unpadded) shapes.
# --------------------------------------------------------------------------
def init_params(key, embed_dim, hidden_dim, num_layers, num_keypoints,
                upsample_stages, use_fpn):
    D, Hd = embed_dim, hidden_dim
    keys = iter(jax.random.split(key, 64))

    def w(shape, scale=0.02):
        return scale * jax.random.normal(next(keys), shape, dtype=jnp.float32)

    layers = []
    for _ in range(num_layers):
        layers.append(dict(
            ln1_g=jnp.ones((1, D), jnp.float32), ln1_b=jnp.zeros((1, D), jnp.float32),
            wqkv=w((D, 3 * D)), bqkv=jnp.zeros((1, 3 * D), jnp.float32),
            wo=w((D, D)), bo=jnp.zeros((1, D), jnp.float32),
            ln2_g=jnp.ones((1, D), jnp.float32), ln2_b=jnp.zeros((1, D), jnp.float32),
            w1=w((D, Hd)), b1=jnp.zeros((1, Hd), jnp.float32),
            w2=w((Hd, D)), b2=jnp.zeros((1, D), jnp.float32),
        ))

    params = dict(layers=layers)
    if use_fpn:
        params["fpn_w"] = w((3, 3, D, D))
        params["fpn_b"] = jnp.zeros((D,), jnp.float32)
    params["up"] = [dict(w=w((3, 3, D, D)), b=jnp.zeros((D,), jnp.float32))
                    for _ in range(upsample_stages)]
    params["head_w"] = w((D, num_keypoints))
    params["head_b"] = jnp.zeros((num_keypoints,), jnp.float32)
    return params


# --------------------------------------------------------------------------
# Full Decoder forward
# --------------------------------------------------------------------------
def decoder_forward(x, params, use_fpn=True):
    # x: (B, N, D) tokens, N = 1 + H*W (leading CLS token).
    for lp in params["layers"]:
        x = transformer_block(x, lp)

    x = x[:, 1:, :]                        # drop CLS token
    B, P, D = x.shape
    H = W = int(math.isqrt(P))
    # PyTorch permute(0,2,1).reshape(B,D,H,W)  <=>  NHWC reshape here.
    x = x.reshape(B, H, W, D)

    convs = []
    if use_fpn:
        convs.append((params["fpn_w"], params["fpn_b"], False))
    for up in params["up"]:
        convs.append((up["w"], up["b"], True))

    nK = params["head_b"].shape[-1]

    if not convs:
        # No spatial convs at all: 1x1 head directly on the tokens grid.
        y = matmul_bias_act(x.reshape(B * H * W, D),
                            params["head_w"], params["head_b"], relu=False)
        heat = y[:, :nK].reshape(B, H, W, nK)
        return jnp.transpose(heat, (0, 3, 1, 2))

    for i, (w, b, do_up) in enumerate(convs):
        if do_up:
            x = upsample2x_bilinear(x)
        if i == len(convs) - 1:
            # Fuse the 1x1 head into the last conv kernel (conv -> ReLU -> head).
            x = conv2d_3x3(x, w, b, relu=True,
                           head_w=params["head_w"], head_b=params["head_b"])
        else:
            x = conv2d_3x3(x, w, b, relu=True)

    heat = x[..., :nK]                     # drop lane padding
    return jnp.transpose(heat, (0, 3, 1, 2))   # NCHW to match PyTorch


# --------------------------------------------------------------------------
if __name__ == "__main__":
    embed_dim, hidden_dim = 32, 64
    num_layers, num_heads = 2, 1          # only num_heads == 1 supported here
    num_keypoints, upsample_stages = 17, 2
    B, grid_hw = 2, 8
    N = grid_hw * grid_hw + 1             # 65 tokens (CLS + 8x8 patches)

    key = jax.random.PRNGKey(0)
    kx, kp = jax.random.split(key)
    x = jax.random.normal(kx, (B, N, embed_dim), dtype=jnp.float32)
    params = init_params(kp, embed_dim, hidden_dim, num_layers, num_keypoints,
                         upsample_stages, use_fpn=True)

    out = decoder_forward(x, params, use_fpn=True)
    out = jax.block_until_ready(out)
    assert out.shape == (B, num_keypoints,
                         grid_hw * (2 ** upsample_stages),
                         grid_hw * (2 ** upsample_stages)), out.shape
    assert bool(jnp.all(jnp.isfinite(out)))
    print("KERNEL_OK")
</pallas_src>

<mosaic_0001>
module attributes {stable_mosaic.version = 11 : i64} {
  func.func @_transformer_block_kernel(%arg0: i32, %arg1: memref<2x65x32xf32, #tpu.memory_space<vmem>>, %arg2: memref<1x32xf32, #tpu.memory_space<vmem>>, %arg3: memref<1x32xf32, #tpu.memory_space<vmem>>, %arg4: memref<32x96xf32, #tpu.memory_space<vmem>>, %arg5: memref<1x96xf32, #tpu.memory_space<vmem>>, %arg6: memref<32x32xf32, #tpu.memory_space<vmem>>, %arg7: memref<1x32xf32, #tpu.memory_space<vmem>>, %arg8: memref<1x32xf32, #tpu.memory_space<vmem>>, %arg9: memref<1x32xf32, #tpu.memory_space<vmem>>, %arg10: memref<32x64xf32, #tpu.memory_space<vmem>>, %arg11: memref<1x64xf32, #tpu.memory_space<vmem>>, %arg12: memref<64x32xf32, #tpu.memory_space<vmem>>, %arg13: memref<1x32xf32, #tpu.memory_space<vmem>>, %arg14: memref<2x65x32xf32, #tpu.memory_space<vmem>>) attributes {dimension_semantics = [#tpu.dimension_semantics<arbitrary>], iteration_bounds = array<i64: 1>, scalar_prefetch = 0 : i64, scratch_operands = 0 : i64, tpu.core_type = #tpu.core_type<tc>, window_params = [{pipeline_mode = #tpu.pipeline_mode<synchronous>, transform_indices = @transform_0, window_bounds = array<i64: 2, 65, 32>}, {pipeline_mode = #tpu.pipeline_mode<synchronous>, transform_indices = @transform_1, window_bounds = array<i64: 1, 32>}, {pipeline_mode = #tpu.pipeline_mode<synchronous>, transform_indices = @transform_2, window_bounds = array<i64: 1, 32>}, {pipeline_mode = #tpu.pipeline_mode<synchronous>, transform_indices = @transform_3, window_bounds = array<i64: 32, 96>}, {pipeline_mode = #tpu.pipeline_mode<synchronous>, transform_indices = @transform_4, window_bounds = array<i64: 1, 96>}, {pipeline_mode = #tpu.pipeline_mode<synchronous>, transform_indices = @transform_5, window_bounds = array<i64: 32, 32>}, {pipeline_mode = #tpu.pipeline_mode<synchronous>, transform_indices = @transform_6, window_bounds = array<i64: 1, 32>}, {pipeline_mode = #tpu.pipeline_mode<synchronous>, transform_indices = @transform_7, window_bounds = array<i64: 1, 32>}, {pipeline_mode = #tpu.pipeline_mode<synchronous>, transform_indices = @transform_8, window_bounds = array<i64: 1, 32>}, {pipeline_mode = #tpu.pipeline_mode<synchronous>, transform_indices = @transform_9, window_bounds = array<i64: 32, 64>}, {pipeline_mode = #tpu.pipeline_mode<synchronous>, transform_indices = @transform_10, window_bounds = array<i64: 1, 64>}, {pipeline_mode = #tpu.pipeline_mode<synchronous>, transform_indices = @transform_11, window_bounds = array<i64: 64, 32>}, {pipeline_mode = #tpu.pipeline_mode<synchronous>, transform_indices = @transform_12, window_bounds = array<i64: 1, 32>}, {pipeline_mode = #tpu.pipeline_mode<synchronous>, transform_indices = @transform_13, window_bounds = array<i64: 2, 65, 32>}]} {
    %c0 = arith.constant 0 : index
    %c0_0 = arith.constant 0 : index
    %0 = vector.load %arg2[%c0, %c0_0] : memref<1x32xf32, #tpu.memory_space<vmem>>, vector<1x32xf32>
    %c0_1 = arith.constant 0 : index
    %c0_2 = arith.constant 0 : index
    %1 = vector.load %arg3[%c0_1, %c0_2] : memref<1x32xf32, #tpu.memory_space<vmem>>, vector<1x32xf32>
    %c0_3 = arith.constant 0 : index
    %c0_4 = arith.constant 0 : index
    %2 = vector.load %arg8[%c0_3, %c0_4] : memref<1x32xf32, #tpu.memory_space<vmem>>, vector<1x32xf32>
    %c0_5 = arith.constant 0 : index
    %c0_6 = arith.constant 0 : index
    %3 = vector.load %arg9[%c0_5, %c0_6] : memref<1x32xf32, #tpu.memory_space<vmem>>, vector<1x32xf32>
    %c0_7 = arith.constant 0 : index
    %c0_8 = arith.constant 0 : index
    %4 = vector.load %arg4[%c0_7, %c0_8] : memref<32x96xf32, #tpu.memory_space<vmem>>, vector<32x96xf32>
    %c0_9 = arith.constant 0 : index
    %c0_10 = arith.constant 0 : index
    %5 = vector.load %arg5[%c0_9, %c0_10] : memref<1x96xf32, #tpu.memory_space<vmem>>, vector<1x96xf32>
    %c0_11 = arith.constant 0 : index
    %c0_12 = arith.constant 0 : index
    %6 = vector.load %arg6[%c0_11, %c0_12] : memref<32x32xf32, #tpu.memory_space<vmem>>, vector<32x32xf32>
    %c0_13 = arith.constant 0 : index
    %c0_14 = arith.constant 0 : index
    %7 = vector.load %arg7[%c0_13, %c0_14] : memref<1x32xf32, #tpu.memory_space<vmem>>, vector<1x32xf32>
    %c0_15 = arith.constant 0 : index
    %c0_16 = arith.constant 0 : index
    %8 = vector.load %arg10[%c0_15, %c0_16] : memref<32x64xf32, #tpu.memory_space<vmem>>, vector<32x64xf32>
    %c0_17 = arith.constant 0 : index
    %c0_18 = arith.constant 0 : index
    %9 = vector.load %arg11[%c0_17, %c0_18] : memref<1x64xf32, #tpu.memory_space<vmem>>, vector<1x64xf32>
    %c0_19 = arith.constant 0 : index
    %c0_20 = arith.constant 0 : index
    %10 = vector.load %arg12[%c0_19, %c0_20] : memref<64x32xf32, #tpu.memory_space<vmem>>, vector<64x32xf32>
    %c0_21 = arith.constant 0 : index
    %c0_22 = arith.constant 0 : index
    %11 = vector.load %arg13[%c0_21, %c0_22] : memref<1x32xf32, #tpu.memory_space<vmem>>, vector<1x32xf32>
    %c0_23 = arith.constant 0 : index
    %c0_24 = arith.constant 0 : index
    %c0_25 = arith.constant 0 : index
    %12 = vector.load %arg1[%c0_23, %c0_24, %c0_25] : memref<2x65x32xf32, #tpu.memory_space<vmem>>, vector<1x65x32xf32>
    %13 = vector.shape_cast %12 : vector<1x65x32xf32> to vector<65x32xf32>
    %cst = arith.constant dense<0.000000e+00> : vector<65xf32>
    %14 = vector.multi_reduction <add>, %13, %cst [1] : vector<65x32xf32> to vector<65xf32>
    %15 = vector.shape_cast %14 : vector<65xf32> to vector<65x1xf32>
    %cst_26 = arith.constant 3.200000e+01 : f32
    %16 = vector.broadcast %cst_26 : f32 to vector<65x1xf32>
    %17 = arith.divf %15, %16 : vector<65x1xf32>
    %18 = vector.broadcast %17 : vector<65x1xf32> to vector<65x32xf32>
    %19 = arith.subf %13, %18 : vector<65x32xf32>
    %20 = arith.mulf %19, %19 : vector<65x32xf32>
    %cst_27 = arith.constant dense<0.000000e+00> : vector<65xf32>
    %21 = vector.multi_reduction <add>, %20, %cst_27 [1] : vector<65x32xf32> to vector<65xf32>
    %22 = vector.shape_cast %21 : vector<65xf32> to vector<65x1xf32>
    %cst_28 = arith.constant 3.200000e+01 : f32
    %23 = vector.broadcast %cst_28 : f32 to vector<65x1xf32>
    %24 = arith.divf %22, %23 : vector<65x1xf32>
    %25 = vector.broadcast %17 : vector<65x1xf32> to vector<65x32xf32>
    %26 = arith.subf %13, %25 : vector<65x32xf32>
    %cst_29 = arith.constant 9.99999974E-6 : f32
    %27 = vector.broadcast %cst_29 : f32 to vector<65x1xf32>
    %28 = arith.addf %24, %27 : vector<65x1xf32>
    %29 = math.rsqrt %28 : vector<65x1xf32>
    %30 = vector.broadcast %29 : vector<65x1xf32> to vector<65x32xf32>
    %31 = arith.mulf %26, %30 : vector<65x32xf32>
    %32 = vector.broadcast %0 : vector<1x32xf32> to vector<65x32xf32>
    %33 = arith.mulf %31, %32 : vector<65x32xf32>
    %34 = vector.broadcast %1 : vector<1x32xf32> to vector<65x32xf32>
    %35 = arith.addf %33, %34 : vector<65x32xf32>
    %cst_30 = arith.constant dense<0.000000e+00> : vector<65x96xf32>
    %36 = tpu.matmul %35, %4, %cst_30 {dimension_numbers = #tpu.dot_dimension_numbers<[1], [0], [0], [1], [0, 0, 1, 1], [], []>} : vector<65x32xf32>, vector<32x96xf32>, vector<65x96xf32> -> vector<65x96xf32>
    %37 = vector.broadcast %5 : vector<1x96xf32> to vector<65x96xf32>
    %38 = arith.addf %36, %37 : vector<65x96xf32>
    %39 = vector.extract_strided_slice %38 {offsets = [0, 0], sizes = [65, 32], strides = [1, 1]} : vector<65x96xf32> to vector<65x32xf32>
    %40 = vector.extract_strided_slice %38 {offsets = [0, 32], sizes = [65, 32], strides = [1, 1]} : vector<65x96xf32> to vector<65x32xf32>
    %41 = vector.extract_strided_slice %38 {offsets = [0, 64], sizes = [65, 32], strides = [1, 1]} : vector<65x96xf32> to vector<65x32xf32>
    %cst_31 = arith.constant dense<0.000000e+00> : vector<65x65xf32>
    %42 = tpu.matmul %39, %40, %cst_31 {dimension_numbers = #tpu.dot_dimension_numbers<[1], [1], [0], [0], [0, 0, 1, 0], [], []>} : vector<65x32xf32>, vector<65x32xf32>, vector<65x65xf32> -> vector<65x65xf32>
    %cst_32 = arith.constant 0.176776692 : f32
    %43 = vector.broadcast %cst_32 : f32 to vector<65x65xf32>
    %44 = arith.mulf %42, %43 : vector<65x65xf32>
    %cst_33 = arith.constant dense<0xFF800000> : vector<65xf32>
    %45 = vector.multi_reduction <maximumf>, %44, %cst_33 [1] : vector<65x65xf32> to vector<65xf32>
    %46 = vector.shape_cast %45 : vector<65xf32> to vector<65x1xf32>
    %47 = vector.broadcast %46 : vector<65x1xf32> to vector<65x65xf32>
    %48 = arith.subf %44, %47 : vector<65x65xf32>
    %49 = math.exp %48 : vector<65x65xf32>
    %cst_34 = arith.constant dense<0.000000e+00> : vector<65xf32>
    %50 = vector.multi_reduction <add>, %49, %cst_34 [1] : vector<65x65xf32> to vector<65xf32>
    %51 = vector.shape_cast %50 : vector<65xf32> to vector<65x1xf32>
    %52 = tpu.reciprocal %51 {approx = true} : vector<65x1xf32> -> vector<65x1xf32>
    %53 = vector.broadcast %52 : vector<65x1xf32> to vector<65x65xf32>
    %54 = arith.mulf %49, %53 : vector<65x65xf32>
    %cst_35 = arith.constant dense<0.000000e+00> : vector<65x32xf32>
    %55 = tpu.matmul %54, %41, %cst_35 {dimension_numbers = #tpu.dot_dimension_numbers<[1], [0], [0], [1], [0, 0, 1, 1], [], []>} : vector<65x65xf32>, vector<65x32xf32>, vector<65x32xf32> -> vector<65x32xf32>
    %cst_36 = arith.constant dense<0.000000e+00> : vector<65x32xf32>
    %56 = tpu.matmul %55, %6, %cst_36 {dimension_numbers = #tpu.dot_dimension_numbers<[1], [0], [0], [1], [0, 0, 1, 1], [], []>} : vector<65x32xf32>, vector<32x32xf32>, vector<65x32xf32> -> vector<65x32xf32>
    %57 = vector.broadcast %7 : vector<1x32xf32> to vector<65x32xf32>
    %58 = arith.addf %56, %57 : vector<65x32xf32>
    %59 = arith.addf %13, %58 : vector<65x32xf32>
    %cst_37 = arith.constant dense<0.000000e+00> : vector<65xf32>
    %60 = vector.multi_reduction <add>, %59, %cst_37 [1] : vector<65x32xf32> to vector<65xf32>
    %61 = vector.shape_cast %60 : vector<65xf32> to vector<65x1xf32>
    %cst_38 = arith.constant 3.200000e+01 : f32
    %62 = vector.broadcast %cst_38 : f32 to vector<65x1xf32>
    %63 = arith.divf %61, %62 : vector<65x1xf32>
    %64 = vector.broadcast %63 : vector<65x1xf32> to vector<65x32xf32>
    %65 = arith.subf %59, %64 : vector<65x32xf32>
    %66 = arith.mulf %65, %65 : vector<65x32xf32>
    %cst_39 = arith.constant dense<0.000000e+00> : vector<65xf32>
    %67 = vector.multi_reduction <add>, %66, %cst_39 [1] : vector<65x32xf32> to vector<65xf32>
    %68 = vector.shape_cast %67 : vector<65xf32> to vector<65x1xf32>
    %cst_40 = arith.constant 3.200000e+01 : f32
    %69 = vector.broadcast %cst_40 : f32 to vector<65x1xf32>
    %70 = arith.divf %68, %69 : vector<65x1xf32>
    %71 = vector.broadcast %63 : vector<65x1xf32> to vector<65x32xf32>
    %72 = arith.subf %59, %71 : vector<65x32xf32>
    %cst_41 = arith.constant 9.99999974E-6 : f32
    %73 = vector.broadcast %cst_41 : f32 to vector<65x1xf32>
    %74 = arith.addf %70, %73 : vector<65x1xf32>
    %75 = math.rsqrt %74 : vector<65x1xf32>
    %76 = vector.broadcast %75 : vector<65x1xf32> to vector<65x32xf32>
    %77 = arith.mulf %72, %76 : vector<65x32xf32>
    %78 = vector.broadcast %2 : vector<1x32xf32> to vector<65x32xf32>
    %79 = arith.mulf %77, %78 : vector<65x32xf32>
    %80 = vector.broadcast %3 : vector<1x32xf32> to vector<65x32xf32>
    %81 = arith.addf %79, %80 : vector<65x32xf32>
    %cst_42 = arith.constant dense<0.000000e+00> : vector<65x64xf32>
    %82 = tpu.matmul %81, %8, %cst_42 {dimension_numbers = #tpu.dot_dimension_numbers<[1], [0], [0], [1], [0, 0, 1, 1], [], []>} : vector<65x32xf32>, vector<32x64xf32>, vector<65x64xf32> -> vector<65x64xf32>
    %83 = vector.broadcast %9 : vector<1x64xf32> to vector<65x64xf32>
    %84 = arith.addf %82, %83 : vector<65x64xf32>
    %cst_43 = arith.constant 0.000000e+00 : f32
    %85 = vector.broadcast %cst_43 : f32 to vector<65x64xf32>
    %86 = arith.maximumf %84, %85 : vector<65x64xf32>
    %cst_44 = arith.constant dense<0.000000e+00> : vector<65x32xf32>
    %87 = tpu.matmul %86, %10, %cst_44 {dimension_numbers = #tpu.dot_dimension_numbers<[1], [0], [0], [1], [0, 0, 1, 1], [], []>} : vector<65x64xf32>, vector<64x32xf32>, vector<65x32xf32> -> vector<65x32xf32>
    %88 = vector.broadcast %11 : vector<1x32xf32> to vector<65x32xf32>
    %89 = arith.addf %87, %88 : vector<65x32xf32>
    %90 = arith.addf %59, %89 : vector<65x32xf32>
    %c0_45 = arith.constant 0 : index
    %c0_46 = arith.constant 0 : index
    %c0_47 = arith.constant 0 : index
    %91 = vector.load %arg14[%c0_45, %c0_46, %c0_47] : memref<2x65x32xf32, #tpu.memory_space<vmem>>, vector<1x65x32xf32>
    %92 = vector.shape_cast %91 : vector<1x65x32xf32> to vector<65x32xf32>
    %93 = vector.shape_cast %90 : vector<65x32xf32> to vector<1x65x32xf32>
    tpu.vector_store %arg14[%c0_45, %c0_46, %c0_47], %93 {strides = array<i32>} : memref<2x65x32xf32, #tpu.memory_space<vmem>>, vector<1x65x32xf32>,
    %c1 = arith.constant 1 : index
    %c0_48 = arith.constant 0 : index
    %c0_49 = arith.constant 0 : index
    %94 = vector.load %arg1[%c1, %c0_48, %c0_49] : memref<2x65x32xf32, #tpu.memory_space<vmem>>, vector<1x65x32xf32>
    %95 = vector.shape_cast %94 : vector<1x65x32xf32> to vector<65x32xf32>
    %cst_50 = arith.constant dense<0.000000e+00> : vector<65xf32>
    %96 = vector.multi_reduction <add>, %95, %cst_50 [1] : vector<65x32xf32> to vector<65xf32>
    %97 = vector.shape_cast %96 : vector<65xf32> to vector<65x1xf32>
    %cst_51 = arith.constant 3.200000e+01 : f32
    %98 = vector.broadcast %cst_51 : f32 to vector<65x1xf32>
    %99 = arith.divf %97, %98 : vector<65x1xf32>
    %100 = vector.broadcast %99 : vector<65x1xf32> to vector<65x32xf32>
    %101 = arith.subf %95, %100 : vector<65x32xf32>
    %102 = arith.mulf %101, %101 : vector<65x32xf32>
    %cst_52 = arith.constant dense<0.000000e+00> : vector<65xf32>
    %103 = vector.multi_reduction <add>, %102, %cst_52 [1] : vector<65x32xf32> to vector<65xf32>
    %104 = vector.shape_cast %103 : vector<65xf32> to vector<65x1xf32>
    %cst_53 = arith.constant 3.200000e+01 : f32
    %105 = vector.broadcast %cst_53 : f32 to vector<65x1xf32>
    %106 = arith.divf %104, %105 : vector<65x1xf32>
    %107 = vector.broadcast %99 : vector<65x1xf32> to vector<65x32xf32>
    %108 = arith.subf %95, %107 : vector<65x32xf32>
    %cst_54 = arith.constant 9.99999974E-6 : f32
    %109 = vector.broadcast %cst_54 : f32 to vector<65x1xf32>
    %110 = arith.addf %106, %109 : vector<65x1xf32>
    %111 = math.rsqrt %110 : vector<65x1xf32>
    %112 = vector.broadcast %111 : vector<65x1xf32> to vector<65x32xf32>
    %113 = arith.mulf %108, %112 : vector<65x32xf32>
    %114 = vector.broadcast %0 : vector<1x32xf32> to vector<65x32xf32>
    %115 = arith.mulf %113, %114 : vector<65x32xf32>
    %116 = vector.broadcast %1 : vector<1x32xf32> to vector<65x32xf32>
    %117 = arith.addf %115, %116 : vector<65x32xf32>
    %cst_55 = arith.constant dense<0.000000e+00> : vector<65x96xf32>
    %118 = tpu.matmul %117, %4, %cst_55 {dimension_numbers = #tpu.dot_dimension_numbers<[1], [0], [0], [1], [0, 0, 1, 1], [], []>} : vector<65x32xf32>, vector<32x96xf32>, vector<65x96xf32> -> vector<65x96xf32>
    %119 = vector.broadcast %5 : vector<1x96xf32> to vector<65x96xf32>
    %120 = arith.addf %118, %119 : vector<65x96xf32>
    %121 = vector.extract_strided_slice %120 {offsets = [0, 0], sizes = [65, 32], strides = [1, 1]} : vector<65x96xf32> to vector<65x32xf32>
    %122 = vector.extract_strided_slice %120 {offsets = [0, 32], sizes = [65, 32], strides = [1, 1]} : vector<65x96xf32> to vector<65x32xf32>
    %123 = vector.extract_strided_slice %120 {offsets = [0, 64], sizes = [65, 32], strides = [1, 1]} : vector<65x96xf32> to vector<65x32xf32>
    %cst_56 = arith.constant dense<0.000000e+00> : vector<65x65xf32>
    %124 = tpu.matmul %121, %122, %cst_56 {dimension_numbers = #tpu.dot_dimension_numbers<[1], [1], [0], [0], [0, 0, 1, 0], [], []>} : vector<65x32xf32>, vector<65x32xf32>, vector<65x65xf32> -> vector<65x65xf32>
    %cst_57 = arith.constant 0.176776692 : f32
    %125 = vector.broadcast %cst_57 : f32 to vector<65x65xf32>
    %126 = arith.mulf %124, %125 : vector<65x65xf32>
    %cst_58 = arith.constant dense<0xFF800000> : vector<65xf32>
    %127 = vector.multi_reduction <maximumf>, %126, %cst_58 [1] : vector<65x65xf32> to vector<65xf32>
    %128 = vector.shape_cast %127 : vector<65xf32> to vector<65x1xf32>
    %129 = vector.broadcast %128 : vector<65x1xf32> to vector<65x65xf32>
    %130 = arith.subf %126, %129 : vector<65x65xf32>
    %131 = math.exp %130 : vector<65x65xf32>
    %cst_59 = arith.constant dense<0.000000e+00> : vector<65xf32>
    %132 = vector.multi_reduction <add>, %131, %cst_59 [1] : vector<65x65xf32> to vector<65xf32>
    %133 = vector.shape_cast %132 : vector<65xf32> to vector<65x1xf32>
    %134 = tpu.reciprocal %133 {approx = true} : vector<65x1xf32> -> vector<65x1xf32>
    %135 = vector.broadcast %134 : vector<65x1xf32> to vector<65x65xf32>
    %136 = arith.mulf %131, %135 : vector<65x65xf32>
    %cst_60 = arith.constant dense<0.000000e+00> : vector<65x32xf32>
    %137 = tpu.matmul %136, %123, %cst_60 {dimension_numbers = #tpu.dot_dimension_numbers<[1], [0], [0], [1], [0, 0, 1, 1], [], []>} : vector<65x65xf32>, vector<65x32xf32>, vector<65x32xf32> -> vector<65x32xf32>
    %cst_61 = arith.constant dense<0.000000e+00> : vector<65x32xf32>
    %138 = tpu.matmul %137, %6, %cst_61 {dimension_numbers = #tpu.dot_dimension_numbers<[1], [0], [0], [1], [0, 0, 1, 1], [], []>} : vector<65x32xf32>, vector<32x32xf32>, vector<65x32xf32> -> vector<65x32xf32>
    %139 = vector.broadcast %7 : vector<1x32xf32> to vector<65x32xf32>
    %140 = arith.addf %138, %139 : vector<65x32xf32>
    %141 = arith.addf %95, %140 : vector<65x32xf32>
    %cst_62 = arith.constant dense<0.000000e+00> : vector<65xf32>
    %142 = vector.multi_reduction <add>, %141, %cst_62 [1] : vector<65x32xf32> to vector<65xf32>
    %143 = vector.shape_cast %142 : vector<65xf32> to vector<65x1xf32>
    %cst_63 = arith.constant 3.200000e+01 : f32
    %144 = vector.broadcast %cst_63 : f32 to vector<65x1xf32>
    %145 = arith.divf %143, %144 : vector<65x1xf32>
    %146 = vector.broadcast %145 : vector<65x1xf32> to vector<65x32xf32>
    %147 = arith.subf %141, %146 : vector<65x32xf32>
    %148 = arith.mulf %147, %147 : vector<65x32xf32>
    %cst_64 = arith.constant dense<0.000000e+00> : vector<65xf32>
    %149 = vector.multi_reduction <add>, %148, %cst_64 [1] : vector<65x32xf32> to vector<65xf32>
    %150 = vector.shape_cast %149 : vector<65xf32> to vector<65x1xf32>
    %cst_65 = arith.constant 3.200000e+01 : f32
    %151 = vector.broadcast %cst_65 : f32 to vector<65x1xf32>
    %152 = arith.divf %150, %151 : vector<65x1xf32>
    %153 = vector.broadcast %145 : vector<65x1xf32> to vector<65x32xf32>
    %154 = arith.subf %141, %153 : vector<65x32xf32>
    %cst_66 = arith.constant 9.99999974E-6 : f32
    %155 = vector.broadcast %cst_66 : f32 to vector<65x1xf32>
    %156 = arith.addf %152, %155 : vector<65x1xf32>
    %157 = math.rsqrt %156 : vector<65x1xf32>
    %158 = vector.broadcast %157 : vector<65x1xf32> to vector<65x32xf32>
    %159 = arith.mulf %154, %158 : vector<65x32xf32>
    %160 = vector.broadcast %2 : vector<1x32xf32> to vector<65x32xf32>
    %161 = arith.mulf %159, %160 : vector<65x32xf32>
    %162 = vector.broadcast %3 : vector<1x32xf32> to vector<65x32xf32>
    %163 = arith.addf %161, %162 : vector<65x32xf32>
    %cst_67 = arith.constant dense<0.000000e+00> : vector<65x64xf32>
    %164 = tpu.matmul %163, %8, %cst_67 {dimension_numbers = #tpu.dot_dimension_numbers<[1], [0], [0], [1], [0, 0, 1, 1], [], []>} : vector<65x32xf32>, vector<32x64xf32>, vector<65x64xf32> -> vector<65x64xf32>
    %165 = vector.broadcast %9 : vector<1x64xf32> to vector<65x64xf32>
    %166 = arith.addf %164, %165 : vector<65x64xf32>
    %cst_68 = arith.constant 0.000000e+00 : f32
    %167 = vector.broadcast %cst_68 : f32 to vector<65x64xf32>
    %168 = arith.maximumf %166, %167 : vector<65x64xf32>
    %cst_69 = arith.constant dense<0.000000e+00> : vector<65x32xf32>
    %169 = tpu.matmul %168, %10, %cst_69 {dimension_numbers = #tpu.dot_dimension_numbers<[1], [0], [0], [1], [0, 0, 1, 1], [], []>} : vector<65x64xf32>, vector<64x32xf32>, vector<65x32xf32> -> vector<65x32xf32>
    %170 = vector.broadcast %11 : vector<1x32xf32> to vector<65x32xf32>
    %171 = arith.addf %169, %170 : vector<65x32xf32>
    %172 = arith.addf %141, %171 : vector<65x32xf32>
    %c1_70 = arith.constant 1 : index
    %c0_71 = arith.constant 0 : index
    %c0_72 = arith.constant 0 : index
    %173 = vector.load %arg14[%c1_70, %c0_71, %c0_72] : memref<2x65x32xf32, #tpu.memory_space<vmem>>, vector<1x65x32xf32>
    %174 = vector.shape_cast %173 : vector<1x65x32xf32> to vector<65x32xf32>
    %175 = vector.shape_cast %172 : vector<65x32xf32> to vector<1x65x32xf32>
    tpu.vector_store %arg14[%c1_70, %c0_71, %c0_72], %175 {strides = array<i32>} : memref<2x65x32xf32, #tpu.memory_space<vmem>>, vector<1x65x32xf32>,
    return
  }
  func.func @transform_0(%arg0: i32) -> (i32, i32, i32) {
    %c0_i32 = arith.constant 0 : i32
    %c0_i32_0 = arith.constant 0 : i32
    %c0_i32_1 = arith.constant 0 : i32
    %c0_i32_2 = arith.constant 0 : i32
    return %c0_i32, %c0_i32_0, %c0_i32_1 : i32, i32, i32
  }
  func.func @transform_1(%arg0: i32) -> (i32, i32) {
    %c0_i32 = arith.constant 0 : i32
    %c0_i32_0 = arith.constant 0 : i32
    %c0_i32_1 = arith.constant 0 : i32
    return %c0_i32, %c0_i32_0 : i32, i32
  }
  func.func @transform_2(%arg0: i32) -> (i32, i32) {
    %c0_i32 = arith.constant 0 : i32
    %c0_i32_0 = arith.constant 0 : i32
    %c0_i32_1 = arith.constant 0 : i32
    return %c0_i32, %c0_i32_0 : i32, i32
  }
  func.func @transform_3(%arg0: i32) -> (i32, i32) {
    %c0_i32 = arith.constant 0 : i32
    %c0_i32_0 = arith.constant 0 : i32
    %c0_i32_1 = arith.constant 0 : i32
    return %c0_i32, %c0_i32_0 : i32, i32
  }
  func.func @transform_4(%arg0: i32) -> (i32, i32) {
    %c0_i32 = arith.constant 0 : i32
    %c0_i32_0 = arith.constant 0 : i32
    %c0_i32_1 = arith.constant 0 : i32
    return %c0_i32, %c0_i32_0 : i32, i32
  }
  func.func @transform_5(%arg0: i32) -> (i32, i32) {
    %c0_i32 = arith.constant 0 : i32
    %c0_i32_0 = arith.constant 0 : i32
    %c0_i32_1 = arith.constant 0 : i32
    return %c0_i32, %c0_i32_0 : i32, i32
  }
  func.func @transform_6(%arg0: i32) -> (i32, i32) {
    %c0_i32 = arith.constant 0 : i32
    %c0_i32_0 = arith.constant 0 : i32
    %c0_i32_1 = arith.constant 0 : i32
    return %c0_i32, %c0_i32_0 : i32, i32
  }
  func.func @transform_7(%arg0: i32) -> (i32, i32) {
    %c0_i32 = arith.constant 0 : i32
    %c0_i32_0 = arith.constant 0 : i32
    %c0_i32_1 = arith.constant 0 : i32
    return %c0_i32, %c0_i32_0 : i32, i32
  }
  func.func @transform_8(%arg0: i32) -> (i32, i32) {
    %c0_i32 = arith.constant 0 : i32
    %c0_i32_0 = arith.constant 0 : i32
    %c0_i32_1 = arith.constant 0 : i32
    return %c0_i32, %c0_i32_0 : i32, i32
  }
  func.func @transform_9(%arg0: i32) -> (i32, i32) {
    %c0_i32 = arith.constant 0 : i32
    %c0_i32_0 = arith.constant 0 : i32
    %c0_i32_1 = arith.constant 0 : i32
    return %c0_i32, %c0_i32_0 : i32, i32
  }
  func.func @transform_10(%arg0: i32) -> (i32, i32) {
    %c0_i32 = arith.constant 0 : i32
    %c0_i32_0 = arith.constant 0 : i32
    %c0_i32_1 = arith.constant 0 : i32
    return %c0_i32, %c0_i32_0 : i32, i32
  }
  func.func @transform_11(%arg0: i32) -> (i32, i32) {
    %c0_i32 = arith.constant 0 : i32
    %c0_i32_0 = arith.constant 0 : i32
    %c0_i32_1 = arith.constant 0 : i32
    return %c0_i32, %c0_i32_0 : i32, i32
  }
  func.func @transform_12(%arg0: i32) -> (i32, i32) {
    %c0_i32 = arith.constant 0 : i32
    %c0_i32_0 = arith.constant 0 : i32
    %c0_i32_1 = arith.constant 0 : i32
    return %c0_i32, %c0_i32_0 : i32, i32
  }
  func.func @transform_13(%arg0: i32) -> (i32, i32, i32) {
    %c0_i32 = arith.constant 0 : i32
    %c0_i32_0 = arith.constant 0 : i32
    %c0_i32_1 = arith.constant 0 : i32
    %c0_i32_2 = arith.constant 0 : i32
    return %c0_i32, %c0_i32_0, %c0_i32_1 : i32, i32, i32
  }
}

</mosaic_0001>

<bundles_post_ra>
// kernel: tpu_custom_call.1
= control target key start
LH: loop header
LB: loop body
LE: loop exit
PB: predicated region body
PF: predicated region fallthrough
CT: control target
= control target key end

     0   :  { %vm81_vm0 = vcmask 261120   ;;  %v2645_v14 = vmov 32.0   ;;  %vm106_vm2 = vcmask 253952   ;;  %s2646_s22 = smov 96   ;;  %s2647_s23 = smov 64   ;;  %s4158_s0 = inlined_call_operand.vmem [shape: f32[2,65,32], index: 0, kind: input, shape index: {}]   ;;  %s4159_s1 = inlined_call_operand.vmem [shape: f32[1,32], index: 1, kind: input, shape index: {}]   ;;  %s4160_s2 = inlined_call_operand.vmem [shape: f32[1,32], index: 2, kind: input, shape index: {}]   ;;  %s4161_s3 = inlined_call_operand.vmem [shape: f32[32,96], index: 3, kind: input, shape index: {}]   ;;  %s4162_s4 = inlined_call_operand.vmem [shape: f32[1,96], index: 4, kind: input, shape index: {}]   ;;  %s4163_s5 = inlined_call_operand.vmem [shape: f32[32,32], index: 5, kind: input, shape index: {}]   ;;  %s4164_s6 = inlined_call_operand.vmem [shape: f32[1,32], index: 6, kind: input, shape index: {}]   ;;  %s4165_s7 = inlined_call_operand.vmem [shape: f32[1,32], index: 7, kind: input, shape index: {}]   ;;  %s4166_s8 = inlined_call_operand.vmem [shape: f32[1,32], index: 8, kind: input, shape index: {}]   ;;  %s4167_s9 = inlined_call_operand.vmem [shape: f32[32,64], index: 9, kind: input, shape index: {}]   ;;  %s4168_s10 = inlined_call_operand.vmem [shape: f32[1,64], index: 10, kind: input, shape index: {}]   ;;  %s4169_s11 = inlined_call_operand.vmem [shape: f32[64,32], index: 11, kind: input, shape index: {}]   ;;  %s4170_s12 = inlined_call_operand.vmem [shape: f32[1,32], index: 12, kind: input, shape index: {}]   ;;  %s4171_s13 = inlined_call_operand.vmem [shape: f32[2,65,32], index: 13, kind: output, shape index: {}]  }
   0x1   :  { %v74_v0 = vld [vmem:[%s4158_s0 + $0x10] sm:$0xff]  ;;  %v72_v1 = vld [vmem:[%s4158_s0] sm:$0xff]  ;;  %v73_v6 = vld [vmem:[%s4158_s0 + $0x8] sm:$0xff]  ;;  %2471 = vrcp.f32 %v2645_v14 }
   0x2   :  { %v76_v2 = vld [vmem:[%s4158_s0 + $0x20] sm:$0xff]  ;;  %v88_v3 = vsel %vm81_vm0, %v74_v0, 0.0  ;;  %v82_v4 = vsel %vm81_vm0, %v72_v1, 0.0  ;;  %v75_v7 = vld [vmem:[%s4158_s0 + $0x18] sm:$0xff]  ;;  %v77_v8 = vld [vmem:[%s4158_s0 + $0x28] sm:$0xff]  ;;  %v85_v9 = vsel %vm81_vm0, %v73_v6, 0.0 }
   0x3   :  { %v94_v5 = vsel %vm81_vm0, %v76_v2, 0.0  ;;  %89 = vadd.xlane.f32.xlu1 %v88_v3  ;;  %83 = vadd.xlane.f32.xlu0 %v82_v4  ;;  %v91_v10 = vsel %vm81_vm0, %v75_v7, 0.0  ;;  %v97_v11 = vsel %vm81_vm0, %v77_v8, 0.0  ;;  %v78_v12 = vld [vmem:[%s4158_s0 + $0x30] sm:$0xff]  ;;  %v79_v39 = vld [vmem:[%s4158_s0 + $0x38] sm:$0xff]  ;;  %v2813_v62 = vld [vmem:[%s4161_s3 + $0x8] sm:$0xff] }
   0x4   :  { %95 = vadd.xlane.f32.xlu2 %v94_v5  ;;  %v100_v13 = vsel %vm81_vm0, %v78_v12, 0.0  ;;  %v103_v43 = vsel %vm81_vm0, %v79_v39, 0.0  ;;  %v80_v51 = vld [vmem:[%s4158_s0 + $0x40] sm:$0x1]  ;;  %v2801_v60 = vld [vmem:[%s4161_s3 + $0x18] sm:$0xff]  ;;  %v2807_v61 = vld [vmem:[%s4161_s3 + $0x10] sm:$0xff] }
   0x5   :  { %v107_v55 = vsel %vm106_vm2, %v80_v51, 0.0  ;;  %354 = vmatpush.msra.mxu0 %v2801_v60  ;;  %v2819_v63 = vld [vmem:[%s4161_s3] sm:$0xff] }
   0x7   :  { %v2472_v15 = vpop.eup %2471  ;;  %355 = vmatpush.msra.mxu0 %v2807_v61 }
   0x8   :  { %v111_v16 = vmul.f32 32.0, %v2472_v15  ;;  %vm115_vm1 = vweird.f32 %v2472_v15 }
   0x9   :  { %356 = vmatpush.msra.mxu0 %v2813_v62 }
   0xa   :  { %v112_v17 = vsub.f32 1.0, %v111_v16 }
   0xb   :  { %86 = vadd.xlane.f32.xlu0 %v85_v9  ;;  %92 = vadd.xlane.f32.xlu1 %v91_v10 }
   0xc   :  { %98 = vadd.xlane.f32.xlu2 %v97_v11  ;;  %v113_v18 = vmul.f32 %v2472_v15, %v112_v17  ;;  %357 = vmatpush.msra.mxu0 %v2819_v63 }
   0xe   :  { %v114_v19 = vadd.f32 %v2472_v15, %v113_v18 }
  0x10   :  { %v2746_v20 = vsel %vm115_vm1, %v2472_v15, %v114_v19 }
  0x13   :  { %101 = vadd.xlane.f32.xlu1 %v100_v13 }
  0x76   :  { %v90_v21 = vpop.xlane.xlu1 %89  ;;  %v84_v22 = vpop.xlane.xlu0 %83 }
  0x77   :  { %v119_v23 = vmul.f32 %v2746_v20, %v90_v21  ;;  %v117_v24 = vmul.f32 %v2746_v20, %v84_v22  ;;  %v96_v25 = vpop.xlane.xlu2 %95 }
  0x78   :  { %v121_v26 = vmul.f32 %v2746_v20, %v96_v25 }
  0x79   :  { %v2751_v27 = vsub.f32 %v74_v0, %v119_v23  ;;  %v2753_v28 = vsub.f32 %v72_v1, %v117_v24 }
  0x7a   :  { %v2755_v29 = vsub.f32 %v76_v2, %v121_v26 }
  0x7b   :  { %v137_v30 = vmul.f32 %v2751_v27, %v2751_v27  ;;  %v135_v31 = vmul.f32 %v2753_v28, %v2753_v28 }
  0x7c   :  { %v139_v37 = vmul.f32 %v2755_v29, %v2755_v29 }
  0x7d   :  { %v150_v32 = vsel %vm81_vm0, %v137_v30, 0.0  ;;  %v144_v33 = vsel %vm81_vm0, %v135_v31, 0.0 }
  0x7e   :  { %151 = vadd.xlane.f32.xlu1 %v150_v32  ;;  %145 = vadd.xlane.f32.xlu0 %v144_v33  ;;  %v87_v34 = vpop.xlane.xlu0 %86  ;;  %v93_v35 = vpop.xlane.xlu1 %92  ;;  %v156_v41 = vsel %vm81_vm0, %v139_v37, 0.0 }
  0x7f   :  { %v118_v36 = vmul.f32 %v2746_v20, %v87_v34  ;;  %v120_v38 = vmul.f32 %v2746_v20, %v93_v35  ;;  %v99_v46 = vpop.xlane.xlu2 %98 }
  0x80   :  { %v122_v50 = vmul.f32 %v2746_v20, %v99_v46 }
  0x81   :  { %v2770_v40 = vsub.f32 %v73_v6, %v118_v36  ;;  %v2773_v42 = vsub.f32 %v75_v7, %v120_v38 }
  0x82   :  { %v2789_v54 = vsub.f32 %v77_v8, %v122_v50 }
  0x83   :  { %v136_v44 = vmul.f32 %v2770_v40, %v2770_v40  ;;  %v138_v49 = vmul.f32 %v2773_v42, %v2773_v42 }
  0x84   :  { %v140_v57 = vmul.f32 %v2789_v54, %v2789_v54 }
  0x85   :  { %v147_v45 = vsel %vm81_vm0, %v136_v44, 0.0  ;;  %v153_v53 = vsel %vm81_vm0, %v138_v49, 0.0  ;;  %v2859_v49 = vld [vmem:[%s4160_s2] ss:$0 sm:$0xff] }
  0x86   :  { %157 = vadd.xlane.f32.xlu1 %v156_v41  ;;  %104 = vadd.xlane.f32.xlu0 %v103_v43  ;;  %v102_v47 = vpop.xlane.xlu1 %101  ;;  %v159_v59 = vsel %vm81_vm0, %v140_v57, 0.0  ;;  %v2852_v41 = vld [vmem:[%s4159_s1] ss:$0 sm:$0xff] }
  0x87   :  { %148 = vadd.xlane.f32.xlu2 %v147_v45  ;;  %v123_v48 = vmul.f32 %v2746_v20, %v102_v47 }
  0x89   :  { %v2786_v52 = vsub.f32 %v78_v12, %v123_v48 }
  0x8b   :  { %v141_v56 = vmul.f32 %v2786_v52, %v2786_v52 }
  0x8d   :  { %v162_v58 = vsel %vm81_vm0, %v141_v56, 0.0 }
  0x8e   :  { %154 = vadd.xlane.f32.xlu0 %v153_v53 }
  0x8f   :  { %108 = vadd.xlane.f32.xlu2 %v107_v55 }
  0x96   :  { %163 = vadd.xlane.f32.xlu0 %v162_v58 }
  0x97   :  { %160 = vadd.xlane.f32.xlu2 %v159_v59 }
  0xf1   :  { %v152_v0 = vpop.xlane.xlu1 %151  ;;  %v146_v1 = vpop.xlane.xlu0 %145 }
  0xf2   :  { %v173_v2 = vmul.f32 %v152_v0, %v2746_v20  ;;  %v171_v3 = vmul.f32 %v146_v1, %v2746_v20 }
  0xf4   :  { %v2824_v4 = vadd.f32 1e-05, %v173_v2  ;;  %v180_v5 = vadd.f32 1e-05, %v171_v3 }
  0xf6   :  { %2473 = vrsqrt.f32 %v2824_v4  ;;  %vm195_vm4 = vweird.f32 %v180_v5  ;;  %vm215_vm7 = vweird.f32 %v2824_v4 }
  0xf7   :  { %2475 = vrsqrt.f32 %v180_v5 }
  0xf9   :  { %v105_v6 = vpop.xlane.xlu0 %104  ;;  %v158_v7 = vpop.xlane.xlu1 %157 }
  0xfa   :  { %v149_v8 = vpop.xlane.xlu2 %148  ;;  %v124_v9 = vmul.f32 %v2746_v20, %v105_v6  ;;  %v175_v14 = vmul.f32 %v158_v7, %v2746_v20 }
  0xfb   :  { %v172_v10 = vmul.f32 %v149_v8, %v2746_v20 }
  0xfc   :  { %v2829_v11 = vpop.eup %2473  ;;  %v2831_v12 = vsub.f32 %v79_v39, %v124_v9  ;;  %v2838_v21 = vadd.f32 1e-05, %v175_v14 }
  0xfd   :  { %v2476_v13 = vpop.eup %2475  ;;  %v181_v15 = vadd.f32 1e-05, %v172_v10  ;;  %v210_v17 = vmul.f32 %v2829_v11, %v2824_v4  ;;  %vm216_vm8 = vweird.f32 %v2829_v11 }
  0xfe   :  { %v190_v16 = vmul.f32 %v2476_v13, %v180_v5  ;;  %v142_v18 = vmul.f32 %v2831_v12, %v2831_v12  ;;  %vm196_vm3 = vweird.f32 %v2476_v13  ;;  %vm217_vm11 = vmor %vm215_vm7, %vm216_vm8  ;;  %vm235_vm15 = vweird.f32 %v2838_v21 }
  0xff   :  { %2477 = vrsqrt.f32 %v181_v15  ;;  %v211_v30 = vmul.f32 %v2829_v11, %v210_v17  ;;  %vm197_vm5 = vmor %vm195_vm4, %vm196_vm3  ;;  %vm205_vm9 = vweird.f32 %v181_v15 }
 0x100   :  { %v191_v19 = vmul.f32 %v2476_v13, %v190_v16  ;;  %v165_v22 = vsel %vm81_vm0, %v142_v18, 0.0  ;;  %2479 = vrsqrt.f32 %v2838_v21 }
 0x101   :  { %v155_v23 = vpop.xlane.xlu0 %154  ;;  %166 = vadd.xlane.f32.xlu1 %v165_v22  ;;  %v212_v38 = vmul.f32 0.5, %v211_v30 }
 0x102   :  { %v192_v24 = vmul.f32 0.5, %v191_v19  ;;  %v109_v25 = vpop.xlane.xlu2 %108  ;;  %v174_v26 = vmul.f32 %v155_v23, %v2746_v20 }
 0x103   :  { %v125_v31 = vmul.f32 %v2746_v20, %v109_v25 }
 0x104   :  { %v193_v32 = vsub.f32 1.5, %v192_v24  ;;  %v183_v33 = vadd.f32 1e-05, %v174_v26 }
 0x105   :  { %v2478_v34 = vpop.eup %2477  ;;  %v2845_v35 = vsub.f32 %v80_v51, %v125_v31  ;;  %v213_v51 = vsub.f32 1.5, %v212_v38 }
 0x106   :  { %v194_v36 = vmul.f32 %v2476_v13, %v193_v32  ;;  %v200_v37 = vmul.f32 %v2478_v34, %v181_v15  ;;  %2481 = vrsqrt.f32 %v183_v33  ;;  %v2861_v50 = vpop.eup %2479  ;;  %vm206_vm6 = vweird.f32 %v2478_v34 }
 0x107   :  { %v143_v39 = vmul.f32 %v2845_v35, %v2845_v35  ;;  %v214_v3 = vmul.f32 %v2829_v11, %v213_v51  ;;  %v230_v5 = vmul.f32 %v2861_v50, %v2838_v21  ;;  %vm207_vm10 = vmor %vm205_vm9, %vm206_vm6  ;;  %vm225_vm12 = vweird.f32 %v183_v33 }
 0x108   :  { %v198_v43 = vsel %vm197_vm5, %v2476_v13, %v194_v36  ;;  %v201_v44 = vmul.f32 %v2478_v34, %v200_v37  ;;  %vm236_vm1 = vweird.f32 %v2861_v50 }
 0x109   :  { %v168_v45 = vsel %vm106_vm2, %v143_v39, 0.0  ;;  %v279_v46 = vmul.f32 %v198_v43, %v2753_v28  ;;  %v164_v55 = vpop.xlane.xlu0 %163  ;;  %v218_v10 = vsel %vm217_vm11, %v2829_v11, %v214_v3  ;;  %v231_v13 = vmul.f32 %v2861_v50, %v230_v5  ;;  %vm237_vm3 = vmor %vm235_vm15, %vm236_vm1 }
 0x10a   :  { %v202_v47 = vmul.f32 0.5, %v201_v44  ;;  %169 = vadd.xlane.f32.xlu2 %v168_v45  ;;  %v161_v48 = vpop.xlane.xlu2 %160  ;;  %v177_v1 = vmul.f32 %v164_v55, %v2746_v20  ;;  %v281_v18 = vmul.f32 %v218_v10, %v2751_v27  ;;  %vm656_vm1 = vcmask 1040384  }
 0x10b   :  { %v176_v53 = vmul.f32 %v161_v48, %v2746_v20  ;;  %v291_v56 = vmul.f32 %v2852_v41, %v279_v46  ;;  %v232_v19 = vmul.f32 0.5, %v231_v13 }
 0x10c   :  { %v2482_v57 = vpop.eup %2481  ;;  %v203_v58 = vsub.f32 1.5, %v202_v47  ;;  %v186_v9 = vadd.f32 1e-05, %v177_v1 }
 0x10d   :  { %v220_v28 = vmul.f32 %v2482_v57, %v183_v33  ;;  %v185_v59 = vadd.f32 1e-05, %v176_v53  ;;  %v303_v2 = vadd.f32 %v2859_v49, %v291_v56  ;;  %vm226_vm13 = vweird.f32 %v2482_v57 }
 0x10e   :  { %v204_v0 = vmul.f32 %v2478_v34, %v203_v58  ;;  %vm227_vm14 = vmor %vm225_vm12, %vm226_vm13  ;;  %v233_v11 = vsub.f32 1.5, %v232_v19  ;;  %vm255_vm7 = vweird.f32 %v186_v9 }
 0x10f   :  { %v221_v6 = vmul.f32 %v2482_v57, %v220_v28  ;;  %2483 = vrsqrt.f32 %v185_v59  ;;  %2265 = vmatmul.msk.f32.vlgmr.msra.gmra.mxu0 %vm81_vm0, %v303_v2  ;;  %vm245_vm4 = vweird.f32 %v185_v59 }
 0x110   :  { %v208_v4 = vsel %vm207_vm10, %v2478_v34, %v204_v0  ;;  %2485 = vrsqrt.f32 %v186_v9  ;;  %v234_v31 = vmul.f32 %v2861_v50, %v233_v11 }
 0x111   :  { %v222_v7 = vmul.f32 0.5, %v221_v6  ;;  %v280_v8 = vmul.f32 %v208_v4, %v2770_v40  ;;  %v293_v40 = vmul.f32 %v2852_v41, %v281_v18 }
 0x112   :  { %v238_v36 = vsel %vm237_vm3, %v2861_v50, %v234_v31  ;;  %vm502_vm3 = vcmask 531456  }
 0x113   :  { %v223_v14 = vsub.f32 1.5, %v222_v7  ;;  %v292_v15 = vmul.f32 %v2852_v41, %v280_v8  ;;  %v305_v30 = vadd.f32 %v2859_v49, %v293_v40  ;;  %v283_v39 = vmul.f32 %v238_v36, %v2755_v29 }
 0x115   :  { %v2484_v16 = vpop.eup %2483  ;;  %v304_v17 = vadd.f32 %v2859_v49, %v292_v15  ;;  %v224_v22 = vmul.f32 %v2482_v57, %v223_v14  ;;  %v295_v44 = vmul.f32 %v2852_v41, %v283_v39 }
 0x116   :  { %v240_v23 = vmul.f32 %v2484_v16, %v185_v59  ;;  %v2486_v26 = vpop.eup %2485  ;;  %vm246_vm5 = vweird.f32 %v2484_v16 }
 0x117   :  { %2266 = vmatmul.msk.f32.gmra.mxu0 %vm81_vm0, %v304_v17  ;;  %v228_v24 = vsel %vm227_vm14, %v2482_v57, %v224_v22  ;;  %v250_v33 = vmul.f32 %v2486_v26, %v186_v9  ;;  %vm247_vm6 = vmor %vm245_vm4, %vm246_vm5  ;;  %vm256_vm8 = vweird.f32 %v2486_v26  ;;  %v307_v47 = vadd.f32 %v2859_v49, %v295_v44 }
 0x118   :  { %v241_v25 = vmul.f32 %v2484_v16, %v240_v23  ;;  %v282_v27 = vmul.f32 %v228_v24, %v2773_v42  ;;  %vm257_vm9 = vmor %vm255_vm7, %vm256_vm8  ;;  %vm527_vm4 = vcmask 524288  }
 0x119   :  { %v251_v38 = vmul.f32 %v2486_v26, %v250_v33 }
 0x11a   :  { %v242_v32 = vmul.f32 0.5, %v241_v25  ;;  %v294_v34 = vmul.f32 %v2852_v41, %v282_v27  ;;  %v2465_v27 = vld [vmem:[%s4162_s4] ss:$0 sm:$0xff] }
 0x11b   :  { %v252_v43 = vmul.f32 0.5, %v251_v38 }
 0x11c   :  { %v243_v37 = vsub.f32 1.5, %v242_v32  ;;  %v306_v21 = vadd.f32 %v2859_v49, %v294_v34 }
 0x11d   :  { %v253_v46 = vsub.f32 1.5, %v252_v43 }
 0x11e   :  { %v244_v42 = vmul.f32 %v2484_v16, %v243_v37 }
 0x11f   :  { %2267 = vmatmul.msk.f32.gmra.mxu0 %vm81_vm0, %v305_v30  ;;  %v254_v50 = vmul.f32 %v2486_v26, %v253_v46 }
 0x120   :  { %v248_v45 = vsel %vm247_vm6, %v2484_v16, %v244_v42 }
 0x121   :  { %v284_v48 = vmul.f32 %v248_v45, %v2789_v54  ;;  %v258_v51 = vsel %vm257_vm9, %v2486_v26, %v254_v50 }
 0x122   :  { %v285_v55 = vmul.f32 %v258_v51, %v2786_v52 }
 0x123   :  { %v296_v29 = vmul.f32 %v2852_v41, %v284_v48 }
 0x124   :  { %v297_v56 = vmul.f32 %v2852_v41, %v285_v55 }
 0x125   :  { %v308_v53 = vadd.f32 %v2859_v49, %v296_v29 }
 0x126   :  { %v309_v57 = vadd.f32 %v2859_v49, %v297_v56 }
 0x127   :  { %2268 = vmatmul.msk.f32.gmra.mxu0 %vm81_vm0, %v306_v21 }
 0x12f   :  { %2269 = vmatmul.msk.f32.gmra.mxu0 %vm81_vm0, %v307_v47 }
 0x137   :  { %2270 = vmatmul.msk.f32.gmra.mxu0 %vm81_vm0, %v308_v53 }
 0x13f   :  { %2271 = vmatmul.msk.f32.gmra.mxu0 %vm81_vm0, %v309_v57 }
 0x174   :  { %v167_v54 = vpop.xlane.xlu1 %166 }
 0x175   :  { %v178_v58 = vmul.f32 %v167_v54, %v2746_v20 }
 0x177   :  { %v187_v28 = vadd.f32 1e-05, %v178_v58 }
 0x179   :  { %2487 = vrsqrt.f32 %v187_v28  ;;  %vm265_vm11 = vweird.f32 %v187_v28 }
 0x17d   :  { %v170_v59 = vpop.xlane.xlu2 %169 }
 0x17e   :  { %v179_v0 = vmul.f32 %v170_v59, %v2746_v20 }
 0x17f   :  { %v2488_v1 = vpop.eup %2487 }
 0x180   :  { %v188_v2 = vadd.f32 1e-05, %v179_v0  ;;  %v260_v3 = vmul.f32 %v2488_v1, %v187_v28  ;;  %vm266_vm10 = vweird.f32 %v2488_v1 }
 0x181   :  { %vm267_vm12 = vmor %vm265_vm11, %vm266_vm10 }
 0x182   :  { %2489 = vrsqrt.f32 %v188_v2  ;;  %v261_v52 = vmul.f32 %v2488_v1, %v260_v3  ;;  %vm275_vm14 = vweird.f32 %v188_v2 }
 0x184   :  { %v262_v5 = vmul.f32 0.5, %v261_v52 }
 0x186   :  { %v263_v6 = vsub.f32 1.5, %v262_v5 }
 0x188   :  { %v2490_v4 = vpop.eup %2489  ;;  %v264_v7 = vmul.f32 %v2488_v1, %v263_v6 }
 0x189   :  { %v270_v8 = vmul.f32 %v2490_v4, %v188_v2  ;;  %vm276_vm13 = vweird.f32 %v2490_v4 }
 0x18a   :  { %v268_v9 = vsel %vm267_vm12, %v2488_v1, %v264_v7  ;;  %vm277_vm15 = vmor %vm275_vm14, %vm276_vm13 }
 0x18b   :  { %v271_v10 = vmul.f32 %v2490_v4, %v270_v8  ;;  %v286_v13 = vmul.f32 %v268_v9, %v2831_v12 }
 0x18c   :  { %v359_v15 = vpop.f32.mrf.mxu0 }
 0x18d   :  { %v272_v14 = vmul.f32 0.5, %v271_v10  ;;  %v298_v16 = vmul.f32 %v2852_v41, %v286_v13  ;;  %v2936_v42 = vadd.f32 %v2465_v27, %v359_v15 }
 0x18f   :  { %v273_v17 = vsub.f32 1.5, %v272_v14  ;;  %v310_v18 = vadd.f32 %v2859_v49, %v298_v16 }
 0x191   :  { %v274_v19 = vmul.f32 %v2490_v4, %v273_v17  ;;  %2272 = vmatmul.msk.f32.gmra.mxu0 %vm81_vm0, %v310_v18 }
 0x193   :  { %v278_v22 = vsel %vm277_vm15, %v2490_v4, %v274_v19 }
 0x194   :  { %v287_v23 = vmul.f32 %v278_v22, %v2845_v35  ;;  %v362_v40 = vpop.f32.mrf.mxu0 }
 0x195   :  { %v2924_v33 = vadd.f32 %v2465_v27, %v362_v40 }
 0x196   :  { %v299_v11 = vmul.f32 %v2852_v41, %v287_v23 }
 0x198   :  { %v311_v12 = vadd.f32 %v2859_v49, %v299_v11 }
 0x19a   :  { %2273 = vmatmul.msk.f32.gmra.mxu0 %vm81_vm0, %v311_v12  ;;  %v3017_v12 = vld [vmem:[%s4158_s0 + $0x48] sm:$0xff] }
 0x19c   :  { %v365_v24 = vpop.f32.mrf.mxu0 }
 0x19d   :  { %v2944_v44 = vadd.f32 %v2465_v27, %v365_v24 }
 0x1a4   :  { %v368_v25 = vpop.f32.mrf.mxu0 }
 0x1a5   :  { %v2931_v21 = vadd.f32 %v2465_v27, %v368_v25  ;;  %v1194_v25 = vsel %vm81_vm0, %v3017_v12, 0.0 }
 0x1a7   :  { %v2433_v15 = vpack.i.bf16 %v2944_v44, %v2931_v21 }
 0x1ac   :  { %v371_v26 = vpop.f32.mrf.mxu0 }
 0x1ad   :  { %v2920_v35 = vadd.f32 %v2465_v27, %v371_v26 }
 0x1b4   :  { %v374_v30 = vpop.f32.mrf.mxu0 }
 0x1b5   :  { %v2938_v43 = vadd.f32 %v2465_v27, %v374_v30 }
 0x1b7   :  { %v2428_v14 = vpack.i.bf16 %v2920_v35, %v2938_v43 }
 0x1bc   :  { %v377_v31 = vpop.f32.mrf.mxu0 }
 0x1bd   :  { %v2916_v32 = vadd.f32 %v2465_v27, %v377_v31  ;;  %v3030_v31 = vld [vmem:[%s4158_s0 + $0x58] sm:$0xff] }
 0x1bf   :  { %407 = vrot.lane.b32.xlu2 %v2916_v32, %s2646_s22 }
 0x1c7   :  { %403 = vrot.lane.b32.xlu2 %v2920_v35, %s2646_s22 }
 0x1cf   :  { %397 = vrot.lane.b32.xlu2 %v2924_v33, %s2646_s22 }
 0x20e   :  { %v380_v34 = vpop.f32.mrf.mxu0 }
 0x20f   :  { %v381_v36 = vadd.f32 %v2465_v27, %v380_v34 }
 0x211   :  { %409 = vrot.lane.b32.xlu1 %v381_v36, %s2646_s22  ;;  %v2423_v37 = vpack.i.bf16 %v2916_v32, %v381_v36 }
 0x213   :  { %2424 = vrot.lane.b32.xlu2 %v2423_v37, %s2647_s23 }
 0x217   :  { %v383_v38 = vpop.f32.mrf.mxu0 }
 0x218   :  { %v384_v39 = vadd.f32 %v2465_v27, %v383_v38 }
 0x219   :  { %401 = vrot.lane.b32.xlu1 %v2931_v21, %s2646_s22  ;;  %v408_v45 = vpop.permute.xlu2 %407 }
 0x21a   :  { %411 = vrot.lane.b32.xlu0 %v384_v39, %s2646_s22 }
 0x221   :  { %395 = vrot.lane.b32.xlu1 %v2936_v42, %s2646_s22  ;;  %v404_v48 = vpop.permute.xlu2 %403 }
 0x222   :  { %405 = vrot.lane.b32.xlu0 %v2938_v43, %s2646_s22 }
 0x229   :  { %v398_v29 = vpop.permute.xlu2 %397 }
 0x22a   :  { %399 = vrot.lane.b32.xlu0 %v2944_v44, %s2646_s22 }
 0x232   :  { %619 = vrot.lane.b32.xlu0 %v384_v39, %s2647_s23 }
 0x26d   :  { %v2425_v55 = vpop.permute.xlu2 %2424 }
 0x26e   :  { %v2426_v57 = vunpack.i.l.bf16 %v2425_v55  ;;  %v2427_v54 = vunpack.i.h.bf16 %v2425_v55 }
 0x283   :  { %v410_v47 = vpop.permute.xlu1 %409 }
 0x28b   :  { %v402_v53 = vpop.permute.xlu1 %401 }
 0x28c   :  { %v412_v46 = vpop.permute.xlu0 %411 }
 0x28d   :  { %2274 = vmatpush.xpose.msk.msrb.mxu0 %vm81_vm0, %v412_v46  ;;  %2411 = vmatpush.xpose.msk.msra.mxu1 %vm81_vm0, %v412_v46 }
 0x291   :  { %2275 = vmatpush.xpose.msk.msrb.mxu0 %vm81_vm0, %v410_v47  ;;  %2412 = vmatpush.xpose.msk.msra.mxu1 %vm81_vm0, %v410_v47 }
 0x293   :  { %v396_v58 = vpop.permute.xlu1 %395 }
 0x294   :  { %v406_v50 = vpop.permute.xlu0 %405 }
 0x295   :  { %2276 = vmatpush.xpose.msk.msrb.mxu0 %vm81_vm0, %v408_v45  ;;  %2413 = vmatpush.xpose.msk.msra.mxu1 %vm81_vm0, %v408_v45 }
 0x299   :  { %2277 = vmatpush.xpose.msk.msrb.mxu0 %vm81_vm0, %v406_v50  ;;  %2414 = vmatpush.xpose.msk.msra.mxu1 %vm81_vm0, %v406_v50 }
 0x29c   :  { %v400_v51 = vpop.permute.xlu0 %399 }
 0x29d   :  { %2278 = vmatpush.xpose.msk.msrb.mxu0 %vm81_vm0, %v404_v48  ;;  %2415 = vmatpush.xpose.msk.msra.mxu1 %vm81_vm0, %v404_v48 }
 0x2a1   :  { %2279 = vmatpush.xpose.msk.msrb.mxu0 %vm81_vm0, %v402_v53  ;;  %2416 = vmatpush.xpose.msk.msra.mxu1 %vm81_vm0, %v402_v53 }
 0x2a4   :  { %v620_v56 = vpop.permute.xlu0 %619 }
 0x2a5   :  { %2280 = vmatpush.xpose.msk.msrb.mxu0 %vm81_vm0, %v400_v51  ;;  %2417 = vmatpush.xpose.msk.msra.mxu1 %vm81_vm0, %v400_v51 }
 0x2a6   :  { %2292 = vmatpush.msk.msra.mxu2 %vm656_vm1, %v620_v56 }
 0x2a8   :  { %667 = vmatpush.msra.mxu2 %v2426_v57 }
 0x2a9   :  { %2281 = vmatpush.xpose.msk.msrb.mxu0 %vm81_vm0, %v398_v29  ;;  %2418 = vmatpush.xpose.msk.msra.mxu1 %vm81_vm0, %v398_v29 }
 0x2aa   :  { %668 = vmatpush.msra.mxu2 %v2427_v54 }
 0x2ad   :  { %2282 = vmatpush.xpose.msk.msrb.mxu0 %vm81_vm0, %v396_v58  ;;  %2419 = vmatpush.xpose.msk.msra.mxu1 %vm81_vm0, %v396_v58 }
 0x2b0   :  { %2283 = vmatmul.msk.f32.vlgmr.msrb.gmra.mxu0 %vm81_vm0, %v2936_v42  ;;  %2285 = vmatmul.msk.f32.vlgmr.msra.gmra.mxu1 %vm81_vm0, %v2944_v44 }
 0x2b8   :  { %2284 = vmatmul.msk.f32.gmra.mxu0 %vm81_vm0, %v2924_v33  ;;  %2286 = vmatmul.msk.f32.gmra.mxu1 %vm81_vm0, %v2931_v21 }
 0x2c0   :  { %2287 = vmatmul.msk.f32.gmra.mxu1 %vm81_vm0, %v2920_v35  ;;  %v3037_v35 = vld [vmem:[%s4158_s0 + $0x60] sm:$0xff] }
 0x2c1   :  { %v1203_v34 = vsel %vm81_vm0, %v3037_v35, 0.0 }
 0x2c8   :  { %2288 = vmatmul.msk.f32.gmra.mxu1 %vm81_vm0, %v2938_v43 }
 0x2d0   :  { %2289 = vmatmul.msk.f32.gmra.mxu1 %vm81_vm0, %v2916_v32  ;;  %v1200_v32 = vsel %vm81_vm0, %v3030_v31, 0.0 }
 0x2d8   :  { %2290 = vmatmul.msk.f32.gmra.mxu1 %vm81_vm0, %v381_v36  ;;  %v3044_v36 = vld [vmem:[%s4158_s0 + $0x68] sm:$0xff] }
 0x2d9   :  { %v1206_v37 = vsel %vm81_vm0, %v3044_v36, 0.0 }
 0x2e0   :  { %2291 = vmatmul.msk.f32.gmra.mxu1 %vm81_vm0, %v384_v39  ;;  %v3051_v39 = vld [vmem:[%s4158_s0 + $0x70] sm:$0xff] }
 0x2e1   :  { %v1209_v44 = vsel %vm81_vm0, %v3051_v39, 0.0 }
 0x32d   :  { %v466_v28 = vpop.f32.mrf.mxu0  ;;  %v472_v59 = vpop.f32.mrf.mxu1 }
 0x32e   :  { %v493_v0 = vmul.f32 0.17677669, %v466_v28  ;;  %v2984_v1 = vmul.f32 0.17677669, %v472_v59 }
 0x330   :  { %v509_v2 = vsel %vm502_vm3, %v2984_v1, -inf  ;;  %v503_v3 = vsel %vm502_vm3, %v493_v0, -inf }
 0x331   :  { %510 = vmax.xlane.f32.xlu1 %v509_v2  ;;  %504 = vmax.xlane.f32.xlu0 %v503_v3 }
 0x335   :  { %v469_v52 = vpop.f32.mrf.mxu0  ;;  %v475_v5 = vpop.f32.mrf.mxu1 }
 0x336   :  { %v494_v6 = vmul.f32 0.17677669, %v469_v52  ;;  %v2989_v4 = vmul.f32 0.17677669, %v475_v5 }
 0x338   :  { %v512_v7 = vsel %vm502_vm3, %v2989_v4, -inf  ;;  %v506_v8 = vsel %vm502_vm3, %v494_v6, -inf }
 0x339   :  { %513 = vmax.xlane.f32.xlu0 %v512_v7  ;;  %507 = vmax.xlane.f32.xlu2 %v506_v8  ;;  %v2438_v8 = vpack.i.bf16 %v2936_v42, %v2924_v33  ;;  %v3085_v42 = vld [vmem:[%s4158_s0 + $0x50] sm:$0xff] }
 0x33d   :  { %v478_v9 = vpop.f32.mrf.mxu1 }
 0x33e   :  { %v2994_v10 = vmul.f32 0.17677669, %v478_v9 }
 0x340   :  { %v515_v13 = vsel %vm502_vm3, %v2994_v10, -inf }
 0x341   :  { %516 = vmax.xlane.f32.xlu2 %v515_v13 }
 0x345   :  { %v481_v16 = vpop.f32.mrf.mxu1 }
 0x346   :  { %v3004_v17 = vmul.f32 0.17677669, %v481_v16 }
 0x348   :  { %v518_v19 = vsel %vm502_vm3, %v3004_v17, -inf }
 0x34a   :  { %2429 = vrot.lane.b32.xlu1 %v2428_v14, %s2647_s23 }
 0x34d   :  { %v484_v18 = vpop.f32.mrf.mxu1 }
 0x34e   :  { %v3008_v22 = vmul.f32 0.17677669, %v484_v18  ;;  %v1197_v18 = vsel %vm81_vm0, %v3085_v42, 0.0 }
 0x350   :  { %v521_v40 = vsel %vm502_vm3, %v3008_v22, -inf }
 0x355   :  { %v487_v23 = vpop.f32.mrf.mxu1 }
 0x356   :  { %v3012_v11 = vmul.f32 0.17677669, %v487_v23 }
 0x358   :  { %v524_v24 = vsel %vm502_vm3, %v3012_v11, -inf }
 0x359   :  { %2434 = vrot.lane.b32.xlu2 %v2433_v15, %s2647_s23 }
 0x35d   :  { %v490_v26 = vpop.f32.mrf.mxu1 }
 0x35e   :  { %v3023_v30 = vmul.f32 0.17677669, %v490_v26 }
 0x360   :  { %v528_v27 = vsel %vm527_vm4, %v3023_v30, -inf }
 0x374   :  { %519 = vmax.xlane.f32.xlu1 %v518_v19 }
 0x37c   :  { %522 = vmax.xlane.f32.xlu1 %v521_v40 }
 0x382   :  { %525 = vmax.xlane.f32.xlu2 %v524_v24 }
 0x384   :  { %1195 = vadd.xlane.f32.xlu1 %v1194_v25 }
 0x38c   :  { %529 = vmax.xlane.f32.xlu1 %v528_v27 }
 0x394   :  { %1201 = vadd.xlane.f32.xlu1 %v1200_v32 }
 0x39c   :  { %1204 = vadd.xlane.f32.xlu1 %v1203_v34 }
 0x3a4   :  { %1207 = vadd.xlane.f32.xlu1 %v1206_v37  ;;  %v505_v38 = vpop.xlane.xlu0 %504  ;;  %v511_v46 = vpop.xlane.xlu1 %510 }
 0x3a5   :  { %v531_v21 = vsub.f32 %v493_v0, %v505_v38  ;;  %v533_v29 = vsub.f32 %v2984_v1, %v511_v46 }
 0x3a7   :  { %v540_v43 = vmul.f32 1.442695, %v531_v21  ;;  %v544_v53 = vmul.f32 1.442695, %v533_v29 }
 0x3a9   :  { %2491 = vpow2.f32 %v540_v43  ;;  %v3111_v43 = vld [vmem:[%s4158_s0 + $0x80] sm:$0xff] }
 0x3ac   :  { %1210 = vadd.xlane.f32.xlu1 %v1209_v44  ;;  %v508_v45 = vpop.xlane.xlu2 %507  ;;  %v514_v56 = vpop.xlane.xlu0 %513 }
 0x3ad   :  { %v532_v47 = vsub.f32 %v494_v6, %v508_v45  ;;  %v534_v54 = vsub.f32 %v2989_v4, %v514_v56  ;;  %v1215_v45 = vsel %vm81_vm0, %v3111_v43, 0.0 }
 0x3af   :  { %v542_v48 = vmul.f32 1.442695, %v532_v47  ;;  %v3055_v50 = vpop.eup %2491  ;;  %v546_v28 = vmul.f32 1.442695, %v534_v54 }
 0x3b0   :  { %v558_v51 = vsel %vm502_vm3, %v3055_v50, 0.0 }
 0x3b1   :  { %2493 = vpow2.f32 %v542_v48  ;;  %559 = vadd.xlane.f32.xlu0 %v558_v51  ;;  %v3126_v51 = vld [vmem:[%s4158_s0 + $0x88] sm:$0x1] }
 0x3b2   :  { %2495 = vpow2.f32 %v544_v53 }
 0x3b3   :  { %2497 = vpow2.f32 %v546_v28 }
 0x3b4   :  { %v517_v55 = vpop.xlane.xlu2 %516 }
 0x3b5   :  { %v535_v52 = vsub.f32 %v2994_v10, %v517_v55  ;;  %v1218_v55 = vsel %vm106_vm2, %v3126_v51, 0.0 }
 0x3b7   :  { %v3060_v57 = vpop.eup %2493  ;;  %v548_v7 = vmul.f32 1.442695, %v535_v52 }
 0x3b8   :  { %v561_v58 = vsel %vm502_vm3, %v3060_v57, 0.0  ;;  %v3065_v1 = vpop.eup %2495 }
 0x3b9   :  { %562 = vadd.xlane.f32.xlu2 %v561_v58  ;;  %v564_v5 = vsel %vm502_vm3, %v3065_v1, 0.0  ;;  %v3072_v9 = vpop.eup %2497  ;;  %2499 = vpow2.f32 %v548_v7 }
 0x3ba   :  { %v567_v10 = vsel %vm502_vm3, %v3072_v9, 0.0 }
 0x3bc   :  { %v2430_v59 = vpop.permute.xlu1 %2429  ;;  %v2435_v2 = vpop.permute.xlu2 %2434 }
 0x3bd   :  { %v2431_v0 = vunpack.i.l.bf16 %v2430_v59  ;;  %v2432_v3 = vunpack.i.h.bf16 %v2430_v59  ;;  %v2436_v6 = vunpack.i.l.bf16 %v2435_v2  ;;  %v2437_v4 = vunpack.i.h.bf16 %v2435_v2 }
 0x3bf   :  { %669 = vmatpush.msra.mxu2 %v2431_v0  ;;  %v3077_v13 = vpop.eup %2499 }
 0x3c0   :  { %v570_v14 = vsel %vm502_vm3, %v3077_v13, 0.0 }
 0x3c1   :  { %670 = vmatpush.msra.mxu2 %v2432_v3  ;;  %565 = vadd.xlane.f32.xlu2 %v564_v5 }
 0x3c3   :  { %671 = vmatpush.msra.mxu2 %v2436_v6 }
 0x3c5   :  { %672 = vmatpush.msra.mxu2 %v2437_v4  ;;  %2439 = vrot.lane.b32.xlu0 %v2438_v8, %s2647_s23 }
 0x3c9   :  { %568 = vadd.xlane.f32.xlu2 %v567_v10 }
 0x3d1   :  { %571 = vadd.xlane.f32.xlu2 %v570_v14 }
 0x3e7   :  { %v520_v15 = vpop.xlane.xlu1 %519 }
 0x3e8   :  { %v536_v16 = vsub.f32 %v3004_v17, %v520_v15  ;;  %v3095_v17 = vld [vmem:[%s4158_s0 + $0x78] sm:$0xff] }
 0x3e9   :  { %v1212_v27 = vsel %vm81_vm0, %v3095_v17, 0.0 }
 0x3ea   :  { %v550_v33 = vmul.f32 1.442695, %v536_v16 }
 0x3ec   :  { %2501 = vpow2.f32 %v550_v33 }
 0x3ef   :  { %v523_v19 = vpop.xlane.xlu1 %522  ;;  %1198 = vadd.xlane.f32.xlu0 %v1197_v18 }
 0x3f0   :  { %v537_v23 = vsub.f32 %v3008_v22, %v523_v19 }
 0x3f2   :  { %v3090_v40 = vpop.eup %2501  ;;  %v552_v24 = vmul.f32 1.442695, %v537_v23 }
 0x3f3   :  { %v573_v25 = vsel %vm502_vm3, %v3090_v40, 0.0 }
 0x3f4   :  { %2503 = vpow2.f32 %v552_v24  ;;  %574 = vadd.xlane.f32.xlu2 %v573_v25 }
 0x3f5   :  { %v526_v26 = vpop.xlane.xlu2 %525 }
 0x3f6   :  { %v538_v22 = vsub.f32 %v3012_v11, %v526_v26 }
 0x3f7   :  { %v1196_v32 = vpop.xlane.xlu1 %1195  ;;  %1213 = vadd.xlane.f32.xlu0 %v1212_v27 }
 0x3f8   :  { %v554_v34 = vmul.f32 1.442695, %v538_v22  ;;  %v1221_v37 = vmul.f32 %v1196_v32, %v2746_v20 }
 0x3fa   :  { %v3103_v38 = vpop.eup %2503  ;;  %2505 = vpow2.f32 %v554_v34  ;;  %v3106_v21 = vsub.f32 %v3017_v12, %v1221_v37 }
 0x3fb   :  { %v576_v44 = vsel %vm502_vm3, %v3103_v38, 0.0 }
 0x3fc   :  { %577 = vadd.xlane.f32.xlu2 %v576_v44  ;;  %v1239_v11 = vmul.f32 %v3106_v21, %v3106_v21 }
 0x3fe   :  { %v1248_v46 = vsel %vm81_vm0, %v1239_v11, 0.0 }
 0x3ff   :  { %1249 = vadd.xlane.f32.xlu1 %v1248_v46  ;;  %v530_v12 = vpop.xlane.xlu1 %529  ;;  %1216 = vadd.xlane.f32.xlu0 %v1215_v45 }
 0x400   :  { %v3120_v47 = vpop.eup %2505  ;;  %v539_v48 = vsub.f32 %v3023_v30, %v530_v12 }
 0x401   :  { %v579_v53 = vsel %vm502_vm3, %v3120_v47, 0.0 }
 0x402   :  { %v556_v29 = vmul.f32 1.442695, %v539_v48 }
 0x404   :  { %2507 = vpow2.f32 %v556_v29  ;;  %580 = vadd.xlane.f32.xlu2 %v579_v53 }
 0x407   :  { %v1202_v56 = vpop.xlane.xlu1 %1201  ;;  %1219 = vadd.xlane.f32.xlu0 %v1218_v55 }
 0x408   :  { %v1223_v26 = vmul.f32 %v1202_v56, %v2746_v20 }
 0x40a   :  { %v3132_v54 = vpop.eup %2507  ;;  %v3170_v32 = vsub.f32 %v3030_v31, %v1223_v26 }
 0x40b   :  { %v582_v30 = vsel %vm527_vm4, %v3132_v54, 0.0 }
 0x40c   :  { %583 = vadd.xlane.f32.xlu2 %v582_v30 }
 0x40f   :  { %v1205_v58 = vpop.xlane.xlu1 %1204 }
 0x410   :  { %v1224_v28 = vmul.f32 %v1205_v58, %v2746_v20 }
 0x412   :  { %v3138_v59 = vsub.f32 %v3037_v35, %v1224_v28 }
 0x414   :  { %v1242_v0 = vmul.f32 %v3138_v59, %v3138_v59 }
 0x416   :  { %v1257_v2 = vsel %vm81_vm0, %v1242_v0, 0.0 }
 0x417   :  { %v1208_v3 = vpop.xlane.xlu1 %1207  ;;  %1258 = vadd.xlane.f32.xlu2 %v1257_v2 }
 0x418   :  { %v1225_v37 = vmul.f32 %v1208_v3, %v2746_v20 }
 0x41a   :  { %v3184_v12 = vsub.f32 %v3044_v36, %v1225_v37 }
 0x41c   :  { %v1243_v36 = vmul.f32 %v3184_v12, %v3184_v12 }
 0x41e   :  { %v1260_v3 = vsel %vm81_vm0, %v1243_v36, 0.0 }
 0x41f   :  { %v1211_v52 = vpop.xlane.xlu1 %1210 }
 0x420   :  { %v1226_v5 = vmul.f32 %v1211_v52, %v2746_v20 }
 0x422   :  { %v3145_v6 = vsub.f32 %v3051_v39, %v1226_v5 }
 0x424   :  { %v1244_v4 = vmul.f32 %v3145_v6, %v3145_v6  ;;  %v560_v35 = vpop.xlane.xlu0 %559 }
 0x425   :  { %2509 = vrcp.f32 %v560_v35 }
 0x426   :  { %v1263_v7 = vsel %vm81_vm0, %v1244_v4, 0.0 }
 0x427   :  { %1264 = vadd.xlane.f32.xlu0 %v1263_v7 }
 0x42b   :  { %v2510_v14 = vpop.eup %2509 }
 0x42c   :  { %v563_v8 = vpop.xlane.xlu2 %562  ;;  %v594_v18 = vmul.f32 %v2510_v14, %v3055_v50 }
 0x42d   :  { %2511 = vrcp.f32 %v563_v8 }
 0x433   :  { %v2512_v39 = vpop.eup %2511 }
 0x434   :  { %v566_v33 = vpop.xlane.xlu2 %565  ;;  %v595_v19 = vmul.f32 %v2512_v39, %v3060_v57 }
 0x435   :  { %2513 = vrcp.f32 %v566_v33 }
 0x437   :  { %v2440_v10 = vpop.permute.xlu0 %2439 }
 0x438   :  { %v2441_v15 = vunpack.i.l.bf16 %v2440_v10  ;;  %v2442_v16 = vunpack.i.h.bf16 %v2440_v10 }
 0x43a   :  { %673 = vmatpush.msra.mxu2 %v2441_v15 }
 0x43b   :  { %v2514_v24 = vpop.eup %2513 }
 0x43c   :  { %674 = vmatpush.msra.mxu2 %v2442_v16  ;;  %v569_v23 = vpop.xlane.xlu2 %568  ;;  %v596_v50 = vmul.f32 %v2514_v24, %v3065_v1 }
 0x43d   :  { %2293 = vmatmul.msk.f32.vlgmr.msra.gmra.mxu2 %vm502_vm3, %v594_v18  ;;  %2515 = vrcp.f32 %v569_v23 }
 0x43e   :  { %1449 = vmatpush.msrb.mxu2 %v2801_v60 }
 0x440   :  { %1450 = vmatpush.msrb.mxu2 %v2807_v61 }
 0x442   :  { %1451 = vmatpush.msrb.mxu2 %v2813_v62 }
 0x443   :  { %v2516_v25 = vpop.eup %2515 }
 0x444   :  { %1452 = vmatpush.msrb.mxu2 %v2819_v63  ;;  %v572_v60 = vpop.xlane.xlu2 %571  ;;  %v597_v61 = vmul.f32 %v2516_v25, %v3072_v9  ;;  %v56_v25 = vld [vmem:[%s4163_s5 + $0x18] sm:$0xff] }
 0x445   :  { %2294 = vmatmul.msk.f32.gmra.mxu2 %vm502_vm3, %v595_v19  ;;  %2517 = vrcp.f32 %v572_v60  ;;  %745 = vmatpush.msra.mxu3 %v56_v25 }
 0x44b   :  { %v2518_v62 = vpop.eup %2517 }
 0x44c   :  { %v598_v57 = vmul.f32 %v2518_v62, %v3077_v13 }
 0x44d   :  { %2295 = vmatmul.msk.f32.gmra.mxu2 %vm502_vm3, %v596_v50 }
 0x455   :  { %2296 = vmatmul.msk.f32.gmra.mxu2 %vm502_vm3, %v597_v61  ;;  %v55_v61 = vld [vmem:[%s4163_s5 + $0x10] sm:$0xff] }
 0x456   :  { %746 = vmatpush.msra.mxu3 %v55_v61 }
 0x45d   :  { %2297 = vmatmul.msk.f32.gmra.mxu2 %vm502_vm3, %v598_v57 }
 0x462   :  { %v1199_v63 = vpop.xlane.xlu0 %1198 }
 0x463   :  { %v1222_v27 = vmul.f32 %v1199_v63, %v2746_v20 }
 0x465   :  { %v3167_v1 = vsub.f32 %v3085_v42, %v1222_v27  ;;  %v1241_v42 = vmul.f32 %v3170_v32, %v3170_v32 }
 0x467   :  { %v575_v22 = vpop.xlane.xlu2 %574  ;;  %v1240_v9 = vmul.f32 %v3167_v1, %v3167_v1  ;;  %v1254_v48 = vsel %vm81_vm0, %v1241_v42, 0.0 }
 0x468   :  { %2519 = vrcp.f32 %v575_v22 }
 0x469   :  { %v1251_v13 = vsel %vm81_vm0, %v1240_v9, 0.0 }
 0x46a   :  { %1252 = vadd.xlane.f32.xlu1 %v1251_v13  ;;  %v1214_v34 = vpop.xlane.xlu0 %1213 }
 0x46b   :  { %v1227_v44 = vmul.f32 %v1214_v34, %v2746_v20 }
 0x46d   :  { %v3180_v45 = vsub.f32 %v3095_v17, %v1227_v44 }
 0x46e   :  { %v2520_v11 = vpop.eup %2519 }
 0x46f   :  { %v578_v31 = vpop.xlane.xlu2 %577  ;;  %v599_v46 = vmul.f32 %v2520_v11, %v3090_v40  ;;  %v1245_v29 = vmul.f32 %v3180_v45, %v3180_v45 }
 0x470   :  { %2521 = vrcp.f32 %v578_v31 }
 0x471   :  { %2298 = vmatmul.msk.f32.gmra.mxu2 %vm502_vm3, %v599_v46  ;;  %v1266_v55 = vsel %vm81_vm0, %v1245_v29, 0.0 }
 0x472   :  { %v1250_v53 = vpop.xlane.xlu1 %1249  ;;  %1255 = vadd.xlane.f32.xlu1 %v1254_v48  ;;  %v1217_v56 = vpop.xlane.xlu0 %1216  ;;  %1267 = vadd.xlane.f32.xlu2 %v1266_v55 }
 0x473   :  { %v1275_v17 = vmul.f32 %v1250_v53, %v2746_v20  ;;  %v1228_v40 = vmul.f32 %v1217_v56, %v2746_v20 }
 0x475   :  { %v1284_v30 = vadd.f32 1e-05, %v1275_v17  ;;  %v3197_v2 = vsub.f32 %v3111_v43, %v1228_v40 }
 0x476   :  { %v2522_v58 = vpop.eup %2521 }
 0x477   :  { %2523 = vrsqrt.f32 %v1284_v30  ;;  %v581_v28 = vpop.xlane.xlu2 %580  ;;  %v600_v0 = vmul.f32 %v2522_v58, %v3103_v38  ;;  %v1246_v4 = vmul.f32 %v3197_v2, %v3197_v2  ;;  %vm1299_vm5 = vweird.f32 %v1284_v30 }
 0x478   :  { %2525 = vrcp.f32 %v581_v28 }
 0x479   :  { %2299 = vmatmul.msk.f32.gmra.mxu2 %vm502_vm3, %v600_v0  ;;  %v1269_v15 = vsel %vm81_vm0, %v1246_v4, 0.0 }
 0x47a   :  { %1261 = vadd.xlane.f32.xlu1 %v1260_v3  ;;  %v1220_v52 = vpop.xlane.xlu0 %1219 }
 0x47b   :  { %v1229_v5 = vmul.f32 %v1220_v52, %v2746_v20 }
 0x47d   :  { %v2524_v7 = vpop.eup %2523  ;;  %v3205_v38 = vsub.f32 %v3126_v51, %v1229_v5 }
 0x47e   :  { %v2526_v35 = vpop.eup %2525  ;;  %v1294_v8 = vmul.f32 %v2524_v7, %v1284_v30  ;;  %vm1300_vm6 = vweird.f32 %v2524_v7 }
 0x47f   :  { %v584_v43 = vpop.xlane.xlu2 %583  ;;  %v601_v10 = vmul.f32 %v2526_v35, %v3120_v47  ;;  %v1247_v16 = vmul.f32 %v3205_v38, %v3205_v38  ;;  %vm1301_vm7 = vmor %vm1299_vm5, %vm1300_vm6 }
 0x480   :  { %v1295_v14 = vmul.f32 %v2524_v7, %v1294_v8  ;;  %2527 = vrcp.f32 %v584_v43 }
 0x481   :  { %2300 = vmatmul.msk.f32.gmra.mxu2 %vm502_vm3, %v601_v10  ;;  %v1272_v18 = vsel %vm106_vm2, %v1247_v16, 0.0 }
 0x482   :  { %v1296_v33 = vmul.f32 0.5, %v1295_v14  ;;  %1270 = vadd.xlane.f32.xlu1 %v1269_v15  ;;  %1273 = vadd.xlane.f32.xlu0 %v1272_v18 }
 0x484   :  { %v1297_v51 = vsub.f32 1.5, %v1296_v33 }
 0x486   :  { %v2528_v39 = vpop.eup %2527  ;;  %v1298_v47 = vmul.f32 %v2524_v7, %v1297_v51  ;;  %v3259_v51 = vld [vmem:[%s4159_s1] ss:$0 sm:$0xff] }
 0x487   :  { %v602_v19 = vmul.f32 %v2528_v39, %v3132_v54 }
 0x488   :  { %v1302_v23 = vsel %vm1301_vm7, %v2524_v7, %v1298_v47 }
 0x489   :  { %v1383_v24 = vmul.f32 %v1302_v23, %v3106_v21  ;;  %2301 = vmatmul.msk.f32.gmra.mxu2 %vm502_vm3, %v602_v19  ;;  %v54_v21 = vld [vmem:[%s4163_s5 + $0x8] sm:$0xff] }
 0x48a   :  { %747 = vmatpush.msra.mxu3 %v54_v21  ;;  %v1259_v57 = vpop.xlane.xlu2 %1258 }
 0x48b   :  { %v1392_v50 = vmul.f32 %v2852_v41, %v1383_v24  ;;  %v53_v41 = vld [vmem:[%s4163_s5] sm:$0xff]  ;;  %v1278_v63 = vmul.f32 %v1259_v57, %v2746_v20 }
 0x48c   :  { %748 = vmatpush.msra.mxu3 %v53_v41 }
 0x48d   :  { %v1401_v60 = vadd.f32 %v2859_v49, %v1392_v50  ;;  %v1287_v27 = vadd.f32 1e-05, %v1278_v63  ;;  %v3270_v50 = vld [vmem:[%s4160_s2] ss:$0 sm:$0xff] }
 0x48f   :  { %2529 = vrsqrt.f32 %v1287_v27  ;;  %vm1329_vm11 = vweird.f32 %v1287_v27 }
 0x491   :  { %2338 = vmatmul.msk.f32.vlgmr.msrb.gmra.mxu2 %vm81_vm0, %v1401_v60 }
 0x495   :  { %v3238_v37 = vpop.eup %2529 }
 0x496   :  { %v1324_v31 = vmul.f32 %v3238_v37, %v1287_v27  ;;  %vm1330_vm12 = vweird.f32 %v3238_v37 }
 0x497   :  { %vm3273_vm14 = vmor %vm1329_vm11, %vm1330_vm12 }
 0x498   :  { %v1325_v55 = vmul.f32 %v3238_v37, %v1324_v31 }
 0x49a   :  { %v1265_v44 = vpop.xlane.xlu0 %1264  ;;  %v1326_v28 = vmul.f32 0.5, %v1325_v55 }
 0x49b   :  { %v1280_v46 = vmul.f32 %v1265_v44, %v2746_v20 }
 0x49c   :  { %v1327_v35 = vsub.f32 1.5, %v1326_v28 }
 0x49d   :  { %v3244_v17 = vadd.f32 1e-05, %v1280_v46 }
 0x49e   :  { %v1328_v47 = vmul.f32 %v3238_v37, %v1327_v35 }
 0x4c0   :  { %v676_v49 = vpop.f32.mrf.mxu2 }
 0x4c1   :  { %2302 = vmatmul.msk.f32.vlgmr.msra.gmra.mxu3 %vm81_vm0, %v676_v49 }
 0x4c8   :  { %v679_v54 = vpop.f32.mrf.mxu2 }
 0x4c9   :  { %2303 = vmatmul.msk.f32.gmra.mxu3 %vm81_vm0, %v679_v54 }
 0x4d0   :  { %v682_v62 = vpop.f32.mrf.mxu2 }
 0x4d1   :  { %2304 = vmatmul.msk.f32.gmra.mxu3 %vm81_vm0, %v682_v62  ;;  %v1332_v62 = vsel %vm3273_vm14, %v3238_v37, %v1328_v47 }
 0x4d2   :  { %v1386_v44 = vmul.f32 %v1332_v62, %v3138_v59 }
 0x4d4   :  { %v1395_v59 = vmul.f32 %v3259_v51, %v1386_v44 }
 0x4d8   :  { %v685_v26 = vpop.f32.mrf.mxu2 }
 0x4d9   :  { %2305 = vmatmul.msk.f32.gmra.mxu3 %vm81_vm0, %v685_v26 }
 0x4dd   :  { %v1253_v22 = vpop.xlane.xlu1 %1252 }
 0x4de   :  { %v1276_v9 = vmul.f32 %v1253_v22, %v2746_v20 }
 0x4e0   :  { %v1285_v13 = vadd.f32 1e-05, %v1276_v9  ;;  %v688_v34 = vpop.f32.mrf.mxu2 }
 0x4e1   :  { %2306 = vmatmul.msk.f32.gmra.mxu3 %vm81_vm0, %v688_v34 }
 0x4e2   :  { %2531 = vrsqrt.f32 %v1285_v13  ;;  %vm1309_vm9 = vweird.f32 %v1285_v13 }
 0x4e5   :  { %v1256_v42 = vpop.xlane.xlu1 %1255  ;;  %v1268_v36 = vpop.xlane.xlu2 %1267 }
 0x4e6   :  { %v1277_v11 = vmul.f32 %v1256_v42, %v2746_v20  ;;  %v1281_v52 = vmul.f32 %v1268_v36, %v2746_v20 }
 0x4e8   :  { %v2532_v48 = vpop.eup %2531  ;;  %v1286_v29 = vadd.f32 1e-05, %v1277_v11  ;;  %v3249_v14 = vadd.f32 1e-05, %v1281_v52 }
 0x4e9   :  { %v1304_v53 = vmul.f32 %v2532_v48, %v1285_v13  ;;  %vm1310_vm8 = vweird.f32 %v2532_v48 }
 0x4ea   :  { %2533 = vrsqrt.f32 %v1286_v29  ;;  %vm1311_vm10 = vmor %vm1309_vm9, %vm1310_vm8  ;;  %vm1319_vm15 = vweird.f32 %v1286_v29  ;;  %vm1349_vm9 = vweird.f32 %v3244_v17  ;;  %vm1359_vm12 = vweird.f32 %v3249_v14 }
 0x4eb   :  { %v1305_v56 = vmul.f32 %v2532_v48, %v1304_v53  ;;  %2535 = vrsqrt.f32 %v3244_v17 }
 0x4ed   :  { %v1306_v40 = vmul.f32 0.5, %v1305_v56  ;;  %v1262_v30 = vpop.xlane.xlu1 %1261 }
 0x4ee   :  { %v1279_v58 = vmul.f32 %v1262_v30, %v2746_v20 }
 0x4ef   :  { %v1307_v0 = vsub.f32 1.5, %v1306_v40  ;;  %v1404_v40 = vadd.f32 %v3270_v50, %v1395_v59 }
 0x4f0   :  { %v2534_v3 = vpop.eup %2533  ;;  %v1288_v5 = vadd.f32 1e-05, %v1279_v58 }
 0x4f1   :  { %v1308_v4 = vmul.f32 %v2532_v48, %v1307_v0  ;;  %v1314_v7 = vmul.f32 %v2534_v3, %v1286_v29  ;;  %v3253_v16 = vpop.eup %2535  ;;  %vm1320_vm13 = vweird.f32 %v2534_v3 }
 0x4f2   :  { %2537 = vrsqrt.f32 %v1288_v5  ;;  %vm1321_vm5 = vmor %vm1319_vm15, %vm1320_vm13  ;;  %vm1339_vm6 = vweird.f32 %v1288_v5 }
 0x4f3   :  { %v1312_v8 = vsel %vm1311_vm10, %v2532_v48, %v1308_v4  ;;  %v1315_v43 = vmul.f32 %v2534_v3, %v1314_v7  ;;  %2539 = vrsqrt.f32 %v3249_v14  ;;  %vm1350_vm10 = vweird.f32 %v3253_v16 }
 0x4f4   :  { %v691_v10 = vpop.f32.mrf.mxu2  ;;  %v1384_v15 = vmul.f32 %v1312_v8, %v3167_v1  ;;  %v1344_v1 = vmul.f32 %v3253_v16, %v3244_v17  ;;  %vm1351_vm11 = vmor %vm1349_vm9, %vm1350_vm10 }
 0x4f5   :  { %2307 = vmatmul.msk.f32.gmra.mxu3 %vm81_vm0, %v691_v10  ;;  %v1316_v33 = vmul.f32 0.5, %v1315_v43  ;;  %v1271_v18 = vpop.xlane.xlu1 %1270  ;;  %v1274_v22 = vpop.xlane.xlu0 %1273 }
 0x4f6   :  { %v1393_v39 = vmul.f32 %v3259_v51, %v1384_v15  ;;  %v1282_v24 = vmul.f32 %v1271_v18, %v2746_v20  ;;  %v1345_v57 = vmul.f32 %v3253_v16, %v1344_v1  ;;  %v1283_v37 = vmul.f32 %v1274_v22, %v2746_v20 }
 0x4f7   :  { %v1317_v19 = vsub.f32 1.5, %v1316_v33 }
 0x4f8   :  { %v2538_v23 = vpop.eup %2537  ;;  %v1402_v60 = vadd.f32 %v3270_v50, %v1393_v39  ;;  %v3282_v63 = vadd.f32 1e-05, %v1282_v24  ;;  %v1346_v42 = vmul.f32 0.5, %v1345_v57  ;;  %v1292_v48 = vadd.f32 1e-05, %v1283_v37 }
 0x4f9   :  { %v1318_v61 = vmul.f32 %v2534_v3, %v1317_v19  ;;  %v1334_v21 = vmul.f32 %v2538_v23, %v1288_v5  ;;  %v2540_v9 = vpop.eup %2539  ;;  %vm1340_vm7 = vweird.f32 %v2538_v23 }
 0x4fa   :  { %2339 = vmatmul.msk.f32.gmra.mxu2 %vm81_vm0, %v1402_v60  ;;  %2541 = vrsqrt.f32 %v3282_v63  ;;  %v1354_v31 = vmul.f32 %v2540_v9, %v3249_v14  ;;  %vm1341_vm8 = vmor %vm1339_vm6, %vm1340_vm7  ;;  %v1347_v29 = vsub.f32 1.5, %v1346_v42  ;;  %vm1360_vm13 = vweird.f32 %v2540_v9 }
 0x4fb   :  { %v1322_v41 = vsel %vm1321_vm5, %v2534_v3, %v1318_v61  ;;  %v1335_v49 = vmul.f32 %v2538_v23, %v1334_v21  ;;  %2543 = vrsqrt.f32 %v1292_v48  ;;  %vm1361_vm14 = vmor %vm1359_vm12, %vm1360_vm13  ;;  %vm1369_vm15 = vweird.f32 %v3282_v63 }
 0x4fc   :  { %v694_v54 = vpop.f32.mrf.mxu2  ;;  %v1385_v26 = vmul.f32 %v1322_v41, %v3170_v32  ;;  %v1355_v53 = vmul.f32 %v2540_v9, %v1354_v31  ;;  %v1348_v30 = vmul.f32 %v3253_v16, %v1347_v29  ;;  %vm1379_vm7 = vweird.f32 %v1292_v48 }
 0x4fd   :  { %2308 = vmatmul.msk.f32.gmra.mxu3 %vm81_vm0, %v694_v54  ;;  %v1336_v27 = vmul.f32 0.5, %v1335_v49 }
 0x4fe   :  { %v1394_v13 = vmul.f32 %v3259_v51, %v1385_v26  ;;  %v1356_v58 = vmul.f32 0.5, %v1355_v53  ;;  %v1352_v3 = vsel %vm1351_vm11, %v3253_v16, %v1348_v30 }
 0x4ff   :  { %v1337_v34 = vsub.f32 1.5, %v1336_v27  ;;  %v1388_v7 = vmul.f32 %v1352_v3, %v3145_v6  ;;  %v2621_v3 = vld [vmem:[%s4158_s0 + $0x10] sm:$0xff] }
 0x500   :  { %v1403_v11 = vadd.f32 %v3270_v50, %v1394_v13  ;;  %v2542_v56 = vpop.eup %2541  ;;  %v1357_v52 = vsub.f32 1.5, %v1356_v58 }
 0x501   :  { %v1338_v46 = vmul.f32 %v2538_v23, %v1337_v34  ;;  %v1364_v28 = vmul.f32 %v2542_v56, %v3282_v63  ;;  %v2544_v4 = vpop.eup %2543  ;;  %v1397_v10 = vmul.f32 %v3259_v51, %v1388_v7  ;;  %vm1370_vm5 = vweird.f32 %v2542_v56 }
 0x502   :  { %2340 = vmatmul.msk.f32.gmra.mxu2 %vm81_vm0, %v1403_v11  ;;  %v1358_v35 = vmul.f32 %v2540_v9, %v1357_v52  ;;  %v1374_v43 = vmul.f32 %v2544_v4, %v1292_v48  ;;  %vm1371_vm6 = vmor %vm1369_vm15, %vm1370_vm5 }
 0x503   :  { %v1342_v55 = vsel %vm1341_vm8, %v2538_v23, %v1338_v46  ;;  %v1365_v5 = vmul.f32 %v2542_v56, %v1364_v28  ;;  %v1406_v14 = vadd.f32 %v3270_v50, %v1397_v10  ;;  %vm1380_vm8 = vweird.f32 %v2544_v4  ;;  %v2623_v10 = vld [vmem:[%s4158_s0] sm:$0xff] }
 0x504   :  { %v697_v32 = vpop.f32.mrf.mxu2  ;;  %v1387_v36 = vmul.f32 %v1342_v55, %v3184_v12  ;;  %v1362_v15 = vsel %vm1361_vm14, %v2540_v9, %v1358_v35  ;;  %v1375_v33 = vmul.f32 %v2544_v4, %v1374_v43  ;;  %vm1381_vm9 = vmor %vm1379_vm7, %vm1380_vm8  ;;  %v2466_v55 = vld [vmem:[%s4164_s6] ss:$0 sm:$0xff] }
 0x505   :  { %2309 = vmatmul.msk.f32.gmra.mxu3 %vm81_vm0, %v697_v32  ;;  %v1366_v8 = vmul.f32 0.5, %v1365_v5  ;;  %v1389_v18 = vmul.f32 %v1362_v15, %v3180_v45  ;;  %v2622_v5 = vld [vmem:[%s4158_s0 + $0x20] sm:$0xff] }
 0x506   :  { %v1396_v17 = vmul.f32 %v3259_v51, %v1387_v36  ;;  %v1376_v6 = vmul.f32 0.5, %v1375_v33  ;;  %v2620_v36 = vld [vmem:[%s4158_s0 + $0x8] sm:$0xff] }
 0x507   :  { %v1367_v16 = vsub.f32 1.5, %v1366_v8  ;;  %v1398_v47 = vmul.f32 %v3259_v51, %v1389_v18 }
 0x508   :  { %v1405_v12 = vadd.f32 %v3270_v50, %v1396_v17  ;;  %v1377_v23 = vsub.f32 1.5, %v1376_v6 }
 0x509   :  { %v1368_v39 = vmul.f32 %v2542_v56, %v1367_v16  ;;  %v1407_v1 = vadd.f32 %v3270_v50, %v1398_v47  ;;  %v2624_v16 = vld [vmem:[%s4158_s0 + $0x28] sm:$0xff] }
 0x50a   :  { %2341 = vmatmul.msk.f32.gmra.mxu2 %vm81_vm0, %v1404_v40  ;;  %v1378_v60 = vmul.f32 %v2544_v4, %v1377_v23 }
 0x50b   :  { %v1372_v19 = vsel %vm1371_vm6, %v2542_v56, %v1368_v39 }
 0x50c   :  { %v700_v0 = vpop.f32.mrf.mxu2  ;;  %v1390_v24 = vmul.f32 %v1372_v19, %v3197_v2  ;;  %v1382_v25 = vsel %vm1381_vm9, %v2544_v4, %v1378_v60 }
 0x50d   :  { %2310 = vmatmul.msk.f32.gmra.mxu3 %vm81_vm0, %v700_v0  ;;  %v1391_v21 = vmul.f32 %v1382_v25, %v3205_v38  ;;  %v2619_v38 = vld [vmem:[%s4162_s4] ss:$0 sm:$0xff] }
 0x50e   :  { %v1399_v45 = vmul.f32 %v3259_v51, %v1390_v24  ;;  %v2626_v24 = vld [vmem:[%s4158_s0 + $0x18] sm:$0xff] }
 0x50f   :  { %v1400_v41 = vmul.f32 %v3259_v51, %v1391_v21 }
 0x510   :  { %v1408_v61 = vadd.f32 %v3270_v50, %v1399_v45  ;;  %v2627_v45 = vld [vmem:[%s4158_s0 + $0x40] sm:$0x1] }
 0x511   :  { %v1409_v49 = vadd.f32 %v3270_v50, %v1400_v41 }
 0x512   :  { %2342 = vmatmul.msk.f32.gmra.mxu2 %vm81_vm0, %v1405_v12 }
 0x514   :  { %v1454_v2 = vpop.f32.mrf.mxu2 }
 0x515   :  { %v3352_v46 = vadd.f32 %v2619_v38, %v1454_v2 }
 0x51a   :  { %2343 = vmatmul.msk.f32.gmra.mxu2 %vm81_vm0, %v1406_v14  ;;  %v2625_v14 = vld [vmem:[%s4158_s0 + $0x30] sm:$0xff] }
 0x522   :  { %2344 = vmatmul.msk.f32.gmra.mxu2 %vm81_vm0, %v1407_v1 }
 0x52a   :  { %2345 = vmatmul.msk.f32.gmra.mxu2 %vm81_vm0, %v1408_v61 }
 0x532   :  { %2346 = vmatmul.msk.f32.gmra.mxu2 %vm81_vm0, %v1409_v49  ;;  %v2628_v49 = vld [vmem:[%s4158_s0 + $0x38] sm:$0xff] }
 0x544   :  { %v750_v27 = vpop.f32.mrf.mxu3 }
 0x545   :  { %v751_v12 = vadd.f32 %v2466_v55, %v750_v27 }
 0x547   :  { %v3391_v15 = vadd.f32 %v2623_v10, %v751_v12 }
 0x549   :  { %v786_v47 = vsel %vm81_vm0, %v3391_v15, 0.0 }
 0x54c   :  { %v753_v51 = vpop.f32.mrf.mxu3 }
 0x54d   :  { %v754_v56 = vadd.f32 %v2466_v55, %v753_v51 }
 0x54f   :  { %v3370_v30 = vadd.f32 %v2620_v36, %v754_v56 }
 0x551   :  { %v789_v0 = vsel %vm81_vm0, %v3370_v30, 0.0 }
 0x554   :  { %v756_v44 = vpop.f32.mrf.mxu3 }
 0x555   :  { %v757_v58 = vadd.f32 %v2466_v55, %v756_v44 }
 0x557   :  { %v3377_v52 = vadd.f32 %v2621_v3, %v757_v58 }
 0x559   :  { %v792_v35 = vsel %vm81_vm0, %v3377_v52, 0.0 }
 0x55c   :  { %v759_v32 = vpop.f32.mrf.mxu3 }
 0x55d   :  { %v760_v6 = vadd.f32 %v2466_v55, %v759_v32 }
 0x55f   :  { %v3412_v60 = vadd.f32 %v2626_v24, %v760_v6 }
 0x561   :  { %v795_v21 = vsel %vm81_vm0, %v3412_v60, 0.0 }
 0x564   :  { %v762_v29 = vpop.f32.mrf.mxu3 }
 0x565   :  { %v763_v28 = vadd.f32 %v2466_v55, %v762_v29 }
 0x567   :  { %v3382_v4 = vadd.f32 %v2622_v5, %v763_v28 }
 0x569   :  { %v798_v43 = vsel %vm81_vm0, %v3382_v4, 0.0 }
 0x578   :  { %v765_v53 = vpop.f32.mrf.mxu3 }
 0x579   :  { %v766_v7 = vadd.f32 %v2466_v55, %v765_v53 }
 0x57b   :  { %v3396_v33 = vadd.f32 %v2624_v16, %v766_v7 }
 0x57d   :  { %v1457_v54 = vpop.f32.mrf.mxu2  ;;  %v801_v23 = vsel %vm81_vm0, %v3396_v33, 0.0 }
 0x57e   :  { %v3344_v31 = vadd.f32 %v2619_v38, %v1457_v54 }
 0x580   :  { %v768_v40 = vpop.f32.mrf.mxu3 }
 0x581   :  { %v769_v8 = vadd.f32 %v2466_v55, %v768_v40 }
 0x583   :  { %v3401_v18 = vadd.f32 %v2625_v14, %v769_v8 }
 0x585   :  { %v1460_v62 = vpop.f32.mrf.mxu2  ;;  %v804_v1 = vsel %vm81_vm0, %v3401_v18, 0.0 }
 0x586   :  { %v3360_v59 = vadd.f32 %v2619_v38, %v1460_v62 }
 0x588   :  { %v771_v17 = vpop.f32.mrf.mxu3 }
 0x589   :  { %v772_v61 = vadd.f32 %v2466_v55, %v771_v17 }
 0x58b   :  { %v3426_v2 = vadd.f32 %v2628_v49, %v772_v61 }
 0x58d   :  { %v1463_v57 = vpop.f32.mrf.mxu2  ;;  %v807_v54 = vsel %vm81_vm0, %v3426_v2, 0.0 }
 0x58e   :  { %v3340_v37 = vadd.f32 %v2619_v38, %v1463_v57 }
 0x590   :  { %v774_v39 = vpop.f32.mrf.mxu3 }
 0x591   :  { %v775_v19 = vadd.f32 %v2466_v55, %v774_v39 }
 0x593   :  { %v3417_v25 = vadd.f32 %v2627_v45, %v775_v19 }
 0x595   :  { %v1466_v63 = vpop.f32.mrf.mxu2  ;;  %v810_v41 = vsel %vm106_vm2, %v3417_v25, 0.0 }
 0x596   :  { %v3332_v13 = vadd.f32 %v2619_v38, %v1466_v63 }
 0x59d   :  { %v1469_v26 = vpop.f32.mrf.mxu2 }
 0x59e   :  { %v3354_v48 = vadd.f32 %v2619_v38, %v1469_v26 }
 0x5a5   :  { %v1472_v22 = vpop.f32.mrf.mxu2 }
 0x5a6   :  { %v3328_v9 = vadd.f32 %v2619_v38, %v1472_v22 }
 0x5a8   :  { %1502 = vrot.lane.b32.xlu0 %v3328_v9, %s2646_s22 }
 0x5ad   :  { %v1475_v50 = vpop.f32.mrf.mxu2 }
 0x5ae   :  { %v3334_v34 = vadd.f32 %v2619_v38, %v1475_v50 }
 0x5b0   :  { %1504 = vrot.lane.b32.xlu1 %v3334_v34, %s2646_s22  ;;  %1498 = vrot.lane.b32.xlu0 %v3332_v13, %s2646_s22 }
 0x5b5   :  { %v1478_v42 = vpop.f32.mrf.mxu2 }
 0x5b6   :  { %v3342_v11 = vadd.f32 %v2619_v38, %v1478_v42 }
 0x5b8   :  { %1506 = vrot.lane.b32.xlu2 %v3342_v11, %s2646_s22  ;;  %1496 = vrot.lane.b32.xlu1 %v3340_v37, %s2646_s22 }
 0x5b9   :  { %1492 = vrot.lane.b32.xlu0 %v3344_v31, %s2646_s22 }
 0x5c0   :  { %1500 = vrot.lane.b32.xlu2 %v3354_v48, %s2646_s22  ;;  %1490 = vrot.lane.b32.xlu1 %v3352_v46, %s2646_s22 }
 0x5c8   :  { %1494 = vrot.lane.b32.xlu2 %v3360_v59, %s2646_s22 }
 0x5e3   :  { %790 = vadd.xlane.f32.xlu0 %v789_v0 }
 0x5ea   :  { %793 = vadd.xlane.f32.xlu1 %v792_v35 }
 0x5eb   :  { %799 = vadd.xlane.f32.xlu0 %v798_v43 }
 0x5f1   :  { %787 = vadd.xlane.f32.xlu2 %v786_v47 }
 0x5f2   :  { %802 = vadd.xlane.f32.xlu1 %v801_v23 }
 0x5f3   :  { %805 = vadd.xlane.f32.xlu0 %v804_v1 }
 0x5f9   :  { %796 = vadd.xlane.f32.xlu2 %v795_v21 }
 0x5fa   :  { %811 = vadd.xlane.f32.xlu1 %v810_v41 }
 0x601   :  { %808 = vadd.xlane.f32.xlu2 %v807_v54 }
 0x612   :  { %v1507_v62 = vpop.permute.xlu2 %1506 }
 0x613   :  { %2347 = vmatpush.xpose.msk.msrb.mxu1 %vm81_vm0, %v1507_v62 }
 0x61a   :  { %v1503_v63 = vpop.permute.xlu0 %1502  ;;  %v1501_v26 = vpop.permute.xlu2 %1500 }
 0x622   :  { %v1505_v57 = vpop.permute.xlu1 %1504  ;;  %v1499_v27 = vpop.permute.xlu0 %1498 }
 0x623   :  { %2348 = vmatpush.xpose.msk.msrb.mxu1 %vm81_vm0, %v1505_v57  ;;  %v1495_v38 = vpop.permute.xlu2 %1494 }
 0x627   :  { %2349 = vmatpush.xpose.msk.msrb.mxu1 %vm81_vm0, %v1503_v63 }
 0x62a   :  { %v1497_v22 = vpop.permute.xlu1 %1496 }
 0x62b   :  { %2350 = vmatpush.xpose.msk.msrb.mxu1 %vm81_vm0, %v1501_v26  ;;  %v1493_v51 = vpop.permute.xlu0 %1492 }
 0x62f   :  { %2351 = vmatpush.xpose.msk.msrb.mxu1 %vm81_vm0, %v1499_v27 }
 0x632   :  { %v1491_v50 = vpop.permute.xlu1 %1490 }
 0x633   :  { %2352 = vmatpush.xpose.msk.msrb.mxu1 %vm81_vm0, %v1497_v22 }
 0x637   :  { %2353 = vmatpush.xpose.msk.msrb.mxu1 %vm81_vm0, %v1495_v38 }
 0x63b   :  { %2354 = vmatpush.xpose.msk.msrb.mxu1 %vm81_vm0, %v1493_v51 }
 0x63f   :  { %2355 = vmatpush.xpose.msk.msrb.mxu1 %vm81_vm0, %v1491_v50 }
 0x642   :  { %2356 = vmatmul.msk.f32.vlgmr.msrb.gmra.mxu1 %vm81_vm0, %v3352_v46 }
 0x64a   :  { %2357 = vmatmul.msk.f32.gmra.mxu1 %vm81_vm0, %v3344_v31 }
 0x652   :  { %2358 = vmatmul.msk.f32.gmra.mxu1 %vm81_vm0, %v3360_v59 }
 0x656   :  { %v791_v44 = vpop.xlane.xlu0 %790 }
 0x657   :  { %v814_v42 = vmul.f32 %v791_v44, %v2746_v20 }
 0x659   :  { %v3447_v32 = vsub.f32 %v3370_v30, %v814_v42 }
 0x65a   :  { %2359 = vmatmul.msk.f32.gmra.mxu1 %vm81_vm0, %v3340_v37 }
 0x65b   :  { %v832_v29 = vmul.f32 %v3447_v32, %v3447_v32 }
 0x65d   :  { %v794_v53 = vpop.xlane.xlu1 %793  ;;  %v843_v55 = vsel %vm81_vm0, %v832_v29, 0.0 }
 0x65e   :  { %v800_v56 = vpop.xlane.xlu0 %799  ;;  %v815_v40 = vmul.f32 %v794_v53, %v2746_v20  ;;  %844 = vadd.xlane.f32.xlu1 %v843_v55 }
 0x65f   :  { %v817_v36 = vmul.f32 %v800_v56, %v2746_v20 }
 0x660   :  { %v3457_v58 = vsub.f32 %v3377_v52, %v815_v40 }
 0x661   :  { %v3464_v0 = vsub.f32 %v3382_v4, %v817_v36 }
 0x662   :  { %2360 = vmatmul.msk.f32.gmra.mxu1 %vm81_vm0, %v3332_v13  ;;  %v833_v28 = vmul.f32 %v3457_v58, %v3457_v58 }
 0x663   :  { %v835_v16 = vmul.f32 %v3464_v0, %v3464_v0 }
 0x664   :  { %v788_v17 = vpop.xlane.xlu2 %787  ;;  %v846_v3 = vsel %vm81_vm0, %v833_v28, 0.0 }
 0x665   :  { %v813_v5 = vmul.f32 %v788_v17, %v2746_v20  ;;  %847 = vadd.xlane.f32.xlu0 %v846_v3  ;;  %v803_v12 = vpop.xlane.xlu1 %802  ;;  %v852_v23 = vsel %vm81_vm0, %v835_v16, 0.0  ;;  %v60_v16 = vld [vmem:[%s4167_s9 + $0x10] sm:$0xff] }
 0x666   :  { %v806_v7 = vpop.xlane.xlu0 %805  ;;  %v818_v35 = vmul.f32 %v803_v12, %v2746_v20 }
 0x667   :  { %v3470_v8 = vsub.f32 %v3391_v15, %v813_v5  ;;  %v819_v43 = vmul.f32 %v806_v7, %v2746_v20  ;;  %v61_v7 = vld [vmem:[%s4167_s9 + $0x18] sm:$0xff] }
 0x668   :  { %v3474_v10 = vsub.f32 %v3396_v33, %v818_v35  ;;  %1050 = vmatpush.msra.mxu0 %v61_v7  ;;  %2130 = vmatpush.msra.mxu2 %v61_v7 }
 0x669   :  { %v831_v14 = vmul.f32 %v3470_v8, %v3470_v8  ;;  %v3486_v47 = vsub.f32 %v3401_v18, %v819_v43 }
 0x66a   :  { %2361 = vmatmul.msk.f32.gmra.mxu1 %vm81_vm0, %v3354_v48  ;;  %v836_v39 = vmul.f32 %v3474_v10, %v3474_v10  ;;  %1051 = vmatpush.msra.mxu0 %v60_v16 }
 0x66b   :  { %v840_v6 = vsel %vm81_vm0, %v831_v14, 0.0  ;;  %v837_v49 = vmul.f32 %v3486_v47, %v3486_v47  ;;  %2131 = vmatpush.msra.mxu2 %v60_v16 }
 0x66c   :  { %841 = vadd.xlane.f32.xlu2 %v840_v6  ;;  %v797_v19 = vpop.xlane.xlu2 %796  ;;  %v855_v1 = vsel %vm81_vm0, %v836_v39, 0.0  ;;  %v59_v6 = vld [vmem:[%s4167_s9 + $0x8] sm:$0xff] }
 0x66d   :  { %v816_v24 = vmul.f32 %v797_v19, %v2746_v20  ;;  %853 = vadd.xlane.f32.xlu0 %v852_v23  ;;  %856 = vadd.xlane.f32.xlu1 %v855_v1  ;;  %v812_v45 = vpop.xlane.xlu1 %811  ;;  %v858_v26 = vsel %vm81_vm0, %v837_v49, 0.0  ;;  %v58_v19 = vld [vmem:[%s4167_s9] sm:$0xff]  ;;  %v2448_v49 = vpack.i.bf16 %v3332_v13, %v3354_v48 }
 0x66e   :  { %v821_v61 = vmul.f32 %v812_v45, %v2746_v20  ;;  %1052 = vmatpush.msra.mxu0 %v59_v6  ;;  %2132 = vmatpush.msra.mxu2 %v59_v6  ;;  %v3588_v6 = vld [vmem:[%s4165_s7] ss:$0 sm:$0xff] }
 0x66f   :  { %v3493_v21 = vsub.f32 %v3412_v60, %v816_v24 }
 0x670   :  { %v3496_v41 = vsub.f32 %v3417_v25, %v821_v61  ;;  %1053 = vmatpush.msra.mxu0 %v58_v19  ;;  %2133 = vmatpush.msra.mxu2 %v58_v19 }
 0x671   :  { %v834_v54 = vmul.f32 %v3493_v21, %v3493_v21 }
 0x672   :  { %2362 = vmatmul.msk.f32.gmra.mxu1 %vm81_vm0, %v3328_v9  ;;  %v839_v62 = vmul.f32 %v3496_v41, %v3496_v41 }
 0x673   :  { %v849_v57 = vsel %vm81_vm0, %v834_v54, 0.0 }
 0x674   :  { %850 = vadd.xlane.f32.xlu2 %v849_v57  ;;  %v809_v63 = vpop.xlane.xlu2 %808  ;;  %v864_v27 = vsel %vm106_vm2, %v839_v62, 0.0  ;;  %v2443_v62 = vpack.i.bf16 %v3328_v9, %v3334_v34 }
 0x675   :  { %v820_v22 = vmul.f32 %v809_v63, %v2746_v20  ;;  %859 = vadd.xlane.f32.xlu0 %v858_v26  ;;  %865 = vadd.xlane.f32.xlu1 %v864_v27 }
 0x677   :  { %v3511_v38 = vsub.f32 %v3426_v2, %v820_v22 }
 0x679   :  { %v838_v51 = vmul.f32 %v3511_v38, %v3511_v38 }
 0x67a   :  { %2363 = vmatmul.msk.f32.gmra.mxu1 %vm81_vm0, %v3334_v34 }
 0x67b   :  { %v861_v50 = vsel %vm81_vm0, %v838_v51, 0.0 }
 0x67c   :  { %862 = vadd.xlane.f32.xlu2 %v861_v50 }
 0x682   :  { %2364 = vmatmul.msk.f32.gmra.mxu1 %vm81_vm0, %v3342_v11 }
 0x6bf   :  { %v1561_v44 = vpop.f32.mrf.mxu1 }
 0x6c0   :  { %v3520_v42 = vmul.f32 0.17677669, %v1561_v44 }
 0x6c2   :  { %v1597_v29 = vsel %vm502_vm3, %v3520_v42, -inf }
 0x6c3   :  { %1598 = vmax.xlane.f32.xlu2 %v1597_v29 }
 0x6c7   :  { %v1564_v53 = vpop.f32.mrf.mxu1 }
 0x6c8   :  { %v3524_v55 = vmul.f32 0.17677669, %v1564_v53 }
 0x6ca   :  { %v1600_v56 = vsel %vm502_vm3, %v3524_v55, -inf }
 0x6cb   :  { %1601 = vmax.xlane.f32.xlu1 %v1600_v56 }
 0x6cf   :  { %v1567_v40 = vpop.f32.mrf.mxu1 }
 0x6d0   :  { %v3528_v36 = vmul.f32 0.17677669, %v1567_v40 }
 0x6d1   :  { %v845_v28 = vpop.xlane.xlu1 %844 }
 0x6d2   :  { %v868_v17 = vmul.f32 %v845_v28, %v2746_v20  ;;  %v1603_v3 = vsel %vm502_vm3, %v3528_v36, -inf }
 0x6d3   :  { %1604 = vmax.xlane.f32.xlu0 %v1603_v3 }
 0x6d4   :  { %v3533_v5 = vadd.f32 1e-05, %v868_v17 }
 0x6d6   :  { %2545 = vrsqrt.f32 %v3533_v5  ;;  %vm901_vm14 = vweird.f32 %v3533_v5 }
 0x6d7   :  { %v1570_v12 = vpop.f32.mrf.mxu1 }
 0x6d8   :  { %v3538_v35 = vmul.f32 0.17677669, %v1570_v12  ;;  %v848_v43 = vpop.xlane.xlu0 %847 }
 0x6d9   :  { %v869_v14 = vmul.f32 %v848_v43, %v2746_v20 }
 0x6da   :  { %v1606_v39 = vsel %vm502_vm3, %v3538_v35, -inf }
 0x6db   :  { %1607 = vmax.xlane.f32.xlu2 %v1606_v39  ;;  %v3553_v23 = vadd.f32 1e-05, %v869_v14 }
 0x6dc   :  { %v2546_v24 = vpop.eup %2545 }
 0x6dd   :  { %2547 = vrsqrt.f32 %v3553_v23  ;;  %v896_v54 = vmul.f32 %v2546_v24, %v3533_v5  ;;  %vm902_vm11 = vweird.f32 %v2546_v24  ;;  %vm911_vm6 = vweird.f32 %v3553_v23 }
 0x6de   :  { %vm903_vm15 = vmor %vm901_vm14, %vm902_vm11 }
 0x6df   :  { %v842_v1 = vpop.xlane.xlu2 %841  ;;  %v897_v57 = vmul.f32 %v2546_v24, %v896_v54 }
 0x6e0   :  { %v867_v45 = vmul.f32 %v842_v1, %v2746_v20  ;;  %v854_v63 = vpop.xlane.xlu0 %853  ;;  %v857_v28 = vpop.xlane.xlu1 %856 }
 0x6e1   :  { %v871_v13 = vmul.f32 %v854_v63, %v2746_v20  ;;  %v898_v50 = vmul.f32 0.5, %v897_v57  ;;  %v872_v12 = vmul.f32 %v857_v28, %v2746_v20  ;;  %v1573_v57 = vpop.f32.mrf.mxu1 }
 0x6e2   :  { %v876_v61 = vadd.f32 1e-05, %v867_v45 }
 0x6e3   :  { %v3564_v27 = vpop.eup %2547  ;;  %v3573_v34 = vadd.f32 1e-05, %v871_v13  ;;  %v899_v53 = vsub.f32 1.5, %v898_v50  ;;  %v3591_v1 = vadd.f32 1e-05, %v872_v12 }
 0x6e4   :  { %2549 = vrsqrt.f32 %v876_v61  ;;  %2449 = vrot.lane.b32.xlu1 %v2448_v49, %s2647_s23  ;;  %v906_v44 = vmul.f32 %v3564_v27, %v3553_v23  ;;  %vm891_vm12 = vweird.f32 %v876_v61  ;;  %vm912_vm5 = vweird.f32 %v3564_v27 }
 0x6e5   :  { %v900_v7 = vmul.f32 %v2546_v24, %v899_v53  ;;  %vm913_vm7 = vmor %vm911_vm6, %vm912_vm5 }
 0x6e6   :  { %v907_v56 = vmul.f32 %v3564_v27, %v906_v44 }
 0x6e7   :  { %v851_v26 = vpop.xlane.xlu2 %850  ;;  %2444 = vrot.lane.b32.xlu0 %v2443_v62, %s2647_s23  ;;  %v904_v45 = vsel %vm903_vm15, %v2546_v24, %v900_v7  ;;  %v3600_v62 = vld [vmem:[%s4166_s8] ss:$0 sm:$0xff]  ;;  %vm941_vm15 = vweird.f32 %v3591_v1 }
 0x6e8   :  { %v870_v22 = vmul.f32 %v851_v26, %v2746_v20  ;;  %v908_v43 = vmul.f32 0.5, %v907_v56  ;;  %v860_v54 = vpop.xlane.xlu0 %859  ;;  %v976_v63 = vmul.f32 %v904_v45, %v3447_v32 }
 0x6e9   :  { %v1576_v12 = vpop.f32.mrf.mxu1 }
 0x6ea   :  { %v2550_v51 = vpop.eup %2549  ;;  %v3568_v48 = vadd.f32 1e-05, %v870_v22  ;;  %v988_v50 = vmul.f32 %v3588_v6, %v976_v63  ;;  %v3634_v45 = vmul.f32 0.17677669, %v1576_v12 }
 0x6eb   :  { %v886_v29 = vmul.f32 %v2550_v51, %v876_v61  ;;  %vm892_vm10 = vweird.f32 %v2550_v51  ;;  %v909_v61 = vsub.f32 1.5, %v908_v43 }
 0x6ec   :  { %2551 = vrsqrt.f32 %v3568_v48  ;;  %vm893_vm13 = vmor %vm891_vm12, %vm892_vm10  ;;  %vm921_vm9 = vweird.f32 %v3568_v48  ;;  %vm931_vm12 = vweird.f32 %v3573_v34 }
 0x6ed   :  { %v887_v9 = vmul.f32 %v2550_v51, %v886_v29  ;;  %2553 = vrsqrt.f32 %v3573_v34  ;;  %v910_v26 = vmul.f32 %v3564_v27, %v909_v61 }
 0x6ee   :  { %2555 = vrsqrt.f32 %v3591_v1 }
 0x6ef   :  { %v888_v40 = vmul.f32 0.5, %v887_v9  ;;  %v914_v44 = vsel %vm913_vm7, %v3564_v27, %v910_v26  ;;  %v863_v9 = vpop.xlane.xlu2 %862 }
 0x6f0   :  { %v874_v56 = vmul.f32 %v863_v9, %v2746_v20  ;;  %v977_v23 = vmul.f32 %v914_v44, %v3457_v58 }
 0x6f1   :  { %v889_v17 = vsub.f32 1.5, %v888_v40  ;;  %v1000_v40 = vadd.f32 %v3600_v62, %v988_v50  ;;  %v1579_v26 = vpop.f32.mrf.mxu1 }
 0x6f2   :  { %v3576_v3 = vpop.eup %2551  ;;  %v3629_v7 = vadd.f32 1e-05, %v874_v56  ;;  %v989_v43 = vmul.f32 %v3588_v6, %v977_v23 }
 0x6f3   :  { %v890_v16 = vmul.f32 %v2550_v51, %v889_v17  ;;  %v916_v14 = vmul.f32 %v3576_v3, %v3568_v48  ;;  %1712 = vrot.lane.b32.xlu2 %v3342_v11, %s2647_s23  ;;  %v3594_v11 = vpop.eup %2553  ;;  %vm922_vm8 = vweird.f32 %v3576_v3 }
 0x6f4   :  { %v926_v22 = vmul.f32 %v3594_v11, %v3573_v34  ;;  %v3617_v53 = vpop.eup %2555  ;;  %vm923_vm10 = vmor %vm921_vm9, %vm922_vm8  ;;  %v1001_v48 = vadd.f32 %v3600_v62, %v989_v43  ;;  %vm932_vm11 = vweird.f32 %v3594_v11 }
 0x6f5   :  { %v894_v39 = vsel %vm893_vm13, %v2550_v51, %v890_v16  ;;  %v917_v49 = vmul.f32 %v3576_v3, %v916_v14  ;;  %v936_v17 = vmul.f32 %v3617_v53, %v3591_v1  ;;  %vm933_vm13 = vmor %vm931_vm12, %vm932_vm11  ;;  %vm942_vm14 = vweird.f32 %v3617_v53 }
 0x6f6   :  { %v975_v19 = vmul.f32 %v894_v39, %v3470_v8  ;;  %v873_v8 = vmul.f32 %v860_v54, %v2746_v20  ;;  %v927_v32 = vmul.f32 %v3594_v11, %v926_v22  ;;  %v866_v39 = vpop.xlane.xlu1 %865  ;;  %vm943_vm5 = vmor %vm941_vm15, %vm942_vm14 }
 0x6f7   :  { %v918_v51 = vmul.f32 0.5, %v917_v49  ;;  %v937_v58 = vmul.f32 %v3617_v53, %v936_v17  ;;  %v875_v61 = vmul.f32 %v866_v39, %v2746_v20 }
 0x6f8   :  { %v987_v5 = vmul.f32 %v3588_v6, %v975_v19  ;;  %v3612_v13 = vadd.f32 1e-05, %v873_v8  ;;  %v928_v28 = vmul.f32 0.5, %v927_v32  ;;  %v3653_v32 = vmul.f32 0.17677669, %v1579_v26 }
 0x6f9   :  { %v919_v29 = vsub.f32 1.5, %v918_v51  ;;  %v884_v63 = vadd.f32 1e-05, %v875_v61 }
 0x6fa   :  { %v999_v24 = vadd.f32 %v3600_v62, %v987_v5  ;;  %2557 = vrsqrt.f32 %v3612_v13  ;;  %v929_v16 = vsub.f32 1.5, %v928_v28  ;;  %v938_v5 = vmul.f32 0.5, %v937_v58 }
 0x6fb   :  { %v920_v27 = vmul.f32 %v3576_v3, %v919_v29  ;;  %2559 = vrsqrt.f32 %v3629_v7  ;;  %vm951_vm7 = vweird.f32 %v3612_v13 }
 0x6fc   :  { %2311 = vmatmul.msk.f32.vlgmr.msra.gmra.mxu0 %vm81_vm0, %v999_v24  ;;  %v930_v54 = vmul.f32 %v3594_v11, %v929_v16  ;;  %v1612_v24 = vsel %vm502_vm3, %v3634_v45, -inf  ;;  %v939_v51 = vsub.f32 1.5, %v938_v5  ;;  %2561 = vrsqrt.f32 %v884_v63 }
 0x6fd   :  { %v924_v14 = vsel %vm923_vm10, %v3576_v3, %v920_v27  ;;  %v3643_v3 = vmul.f32 0.17677669, %v1573_v57  ;;  %v2453_v5 = vpack.i.bf16 %v3360_v59, %v3340_v37  ;;  %vm961_vm10 = vweird.f32 %v3629_v7 }
 0x6fe   :  { %v978_v49 = vmul.f32 %v924_v14, %v3493_v21  ;;  %v934_v22 = vsel %vm933_vm13, %v3594_v11, %v930_v54  ;;  %v940_v9 = vmul.f32 %v3617_v53, %v939_v51  ;;  %vm971_vm13 = vweird.f32 %v884_v63 }
 0x6ff   :  { %v1609_v57 = vsel %vm502_vm3, %v3643_v3, -inf  ;;  %v979_v29 = vmul.f32 %v934_v22, %v3464_v0  ;;  %v2458_v37 = vpack.i.bf16 %v3352_v46, %v3344_v31 }
 0x700   :  { %v2558_v19 = vpop.eup %2557  ;;  %v990_v21 = vmul.f32 %v3588_v6, %v978_v49  ;;  %v944_v0 = vsel %vm943_vm5, %v3617_v53, %v940_v9  ;;  %v68_v9 = vld [vmem:[%s4169_s11 + $0x28] sm:$0xff] }
 0x701   :  { %v946_v8 = vmul.f32 %v2558_v19, %v3612_v13  ;;  %v2560_v44 = vpop.eup %2559  ;;  %v991_v23 = vmul.f32 %v3588_v6, %v979_v29  ;;  %v980_v43 = vmul.f32 %v944_v0, %v3474_v10  ;;  %vm952_vm6 = vweird.f32 %v2558_v19 }
 0x702   :  { %v1002_v34 = vadd.f32 %v3600_v62, %v990_v21  ;;  %v956_v11 = vmul.f32 %v2560_v44, %v3629_v7  ;;  %v2562_v27 = vpop.eup %2561  ;;  %vm953_vm8 = vmor %vm951_vm7, %vm952_vm6  ;;  %vm962_vm9 = vweird.f32 %v2560_v44 }
 0x703   :  { %v947_v50 = vmul.f32 %v2558_v19, %v946_v8  ;;  %v1003_v12 = vadd.f32 %v3600_v62, %v991_v23  ;;  %v966_v58 = vmul.f32 %v2562_v27, %v884_v63  ;;  %v992_v14 = vmul.f32 %v3588_v6, %v980_v43  ;;  %vm963_vm11 = vmor %vm961_vm10, %vm962_vm9 }
 0x704   :  { %2312 = vmatmul.msk.f32.gmra.mxu0 %vm81_vm0, %v1000_v40  ;;  %v1615_v40 = vsel %vm502_vm3, %v3653_v32, -inf  ;;  %v957_v17 = vmul.f32 %v2560_v44, %v956_v11  ;;  %vm972_vm12 = vweird.f32 %v2562_v27 }
 0x705   :  { %v948_v56 = vmul.f32 0.5, %v947_v50  ;;  %v967_v53 = vmul.f32 %v2562_v27, %v966_v58  ;;  %vm973_vm14 = vmor %vm971_vm13, %vm972_vm12  ;;  %v1582_v50 = vpop.f32.mrf.mxu1 }
 0x706   :  { %v958_v1 = vmul.f32 0.5, %v957_v17 }
 0x707   :  { %v949_v28 = vsub.f32 1.5, %v948_v56  ;;  %v968_v54 = vmul.f32 0.5, %v967_v53 }
 0x708   :  { %v959_v61 = vsub.f32 1.5, %v958_v1 }
 0x709   :  { %v950_v16 = vmul.f32 %v2558_v19, %v949_v28  ;;  %v66_v28 = vld [vmem:[%s4169_s11 + $0x18] sm:$0xff] }
 0x70a   :  { %v960_v10 = vmul.f32 %v2560_v44, %v959_v61 }
 0x70b   :  { %v954_v39 = vsel %vm953_vm8, %v2558_v19, %v950_v16  ;;  %v969_v19 = vsub.f32 1.5, %v968_v54 }
 0x70c   :  { %2313 = vmatmul.msk.f32.gmra.mxu0 %vm81_vm0, %v1001_v48  ;;  %v1004_v48 = vadd.f32 %v3600_v62, %v992_v14  ;;  %v981_v49 = vmul.f32 %v954_v39, %v3486_v47  ;;  %v964_v8 = vsel %vm963_vm11, %v2560_v44, %v960_v10 }
 0x70d   :  { %v982_v47 = vmul.f32 %v964_v8, %v3511_v38  ;;  %v970_v26 = vmul.f32 %v2562_v27, %v969_v19  ;;  %v64_v19 = vld [vmem:[%s4169_s11 + $0x8] sm:$0xff] }
 0x70e   :  { %1613 = vmax.xlane.f32.xlu1 %v1612_v24  ;;  %v993_v13 = vmul.f32 %v3588_v6, %v981_v49 }
 0x70f   :  { %v994_v59 = vmul.f32 %v3588_v6, %v982_v47  ;;  %v974_v7 = vsel %vm973_vm14, %v2562_v27, %v970_v26  ;;  %v3716_v27 = vmul.f32 0.17677669, %v1582_v50  ;;  %v2629_v26 = vld [vmem:[%s4163_s5 + $0x18] sm:$0xff] }
 0x710   :  { %v1005_v24 = vadd.f32 %v3600_v62, %v993_v13  ;;  %v983_v22 = vmul.f32 %v974_v7, %v3496_v41  ;;  %v70_v41 = vld [vmem:[%s4169_s11 + $0x38] sm:$0xff]  ;;  %v65_v13 = vld [vmem:[%s4169_s11 + $0x10] sm:$0xff]  ;;  %v2632_v7 = vld [vmem:[%s4163_s5] sm:$0xff] }
 0x711   :  { %1610 = vmax.xlane.f32.xlu0 %v1609_v57  ;;  %v1006_v21 = vadd.f32 %v3600_v62, %v994_v59  ;;  %1130 = vmatpush.msrb.mxu3 %v70_v41  ;;  %v2631_v59 = vld [vmem:[%s4163_s5 + $0x8] sm:$0xff] }
 0x712   :  { %v995_v51 = vmul.f32 %v3588_v6, %v983_v22  ;;  %2206 = vmatpush.msra.mxu1 %v70_v41 }
 0x714   :  { %2314 = vmatmul.msk.f32.gmra.mxu0 %vm81_vm0, %v1002_v34  ;;  %v1007_v31 = vadd.f32 %v3600_v62, %v995_v51  ;;  %v1585_v34 = vpop.f32.mrf.mxu1 }
 0x715   :  { %v3706_v56 = vmul.f32 0.17677669, %v1585_v34 }
 0x716   :  { %1616 = vmax.xlane.f32.xlu1 %v1615_v40  ;;  %v67_v40 = vld [vmem:[%s4169_s11 + $0x20] sm:$0xff] }
 0x71c   :  { %2315 = vmatmul.msk.f32.gmra.mxu0 %vm81_vm0, %v1003_v12  ;;  %v1621_v12 = vsel %vm527_vm4, %v3706_v56, -inf }
 0x724   :  { %2316 = vmatmul.msk.f32.gmra.mxu0 %vm81_vm0, %v1004_v48 }
 0x725   :  { %2454 = vrot.lane.b32.xlu0 %v2453_v5, %s2647_s23 }
 0x72c   :  { %2317 = vmatmul.msk.f32.gmra.mxu0 %vm81_vm0, %v1005_v24  ;;  %v63_v24 = vld [vmem:[%s4169_s11] sm:$0xff] }
 0x72f   :  { %2459 = vrot.lane.b32.xlu1 %v2458_v37, %s2647_s23  ;;  %v2630_v37 = vld [vmem:[%s4163_s5 + $0x10] sm:$0xff] }
 0x734   :  { %2318 = vmatmul.msk.f32.gmra.mxu0 %vm81_vm0, %v1006_v21  ;;  %v3760_v21 = vld [vmem:[%s4168_s10] ss:$0 sm:$0xff] }
 0x736   :  { %v1599_v38 = vpop.xlane.xlu2 %1598 }
 0x737   :  { %v1624_v63 = vsub.f32 %v3520_v42, %v1599_v38  ;;  %v69_v42 = vld [vmem:[%s4169_s11 + $0x30] sm:$0xff] }
 0x738   :  { %1131 = vmatpush.msrb.mxu3 %v69_v42  ;;  %2207 = vmatpush.msra.mxu1 %v69_v42 }
 0x739   :  { %v1633_v44 = vmul.f32 1.442695, %v1624_v63 }
 0x73a   :  { %1132 = vmatpush.msrb.mxu3 %v68_v9  ;;  %2208 = vmatpush.msra.mxu1 %v68_v9 }
 0x73b   :  { %2563 = vpow2.f32 %v1633_v44 }
 0x73c   :  { %2319 = vmatmul.msk.f32.gmra.mxu0 %vm81_vm0, %v1007_v31  ;;  %1133 = vmatpush.msrb.mxu3 %v67_v40 }
 0x73d   :  { %2209 = vmatpush.msra.mxu1 %v67_v40 }
 0x73e   :  { %v1602_v29 = vpop.xlane.xlu1 %1601  ;;  %1134 = vmatpush.msrb.mxu3 %v66_v28 }
 0x73f   :  { %v1625_v23 = vsub.f32 %v3524_v55, %v1602_v29  ;;  %2210 = vmatpush.msra.mxu1 %v66_v28 }
 0x740   :  { %1135 = vmatpush.msrb.mxu3 %v65_v13 }
 0x741   :  { %v3693_v46 = vpop.eup %2563  ;;  %v1635_v43 = vmul.f32 1.442695, %v1625_v23  ;;  %2211 = vmatpush.msra.mxu1 %v65_v13 }
 0x742   :  { %v1651_v57 = vsel %vm502_vm3, %v3693_v46, 0.0  ;;  %1136 = vmatpush.msrb.mxu3 %v64_v19 }
 0x743   :  { %1652 = vadd.xlane.f32.xlu2 %v1651_v57  ;;  %2212 = vmatpush.msra.mxu1 %v64_v19 }
 0x744   :  { %1137 = vmatpush.msrb.mxu3 %v63_v24 }
 0x745   :  { %2213 = vmatpush.msra.mxu1 %v63_v24 }
 0x746   :  { %v1605_v11 = vpop.xlane.xlu0 %1604  ;;  %1834 = vmatpush.msra.mxu3 %v2629_v26 }
 0x747   :  { %v1626_v0 = vsub.f32 %v3528_v36, %v1605_v11  ;;  %v1618_v36 = vsel %vm502_vm3, %v3716_v27, -inf }
 0x748   :  { %1835 = vmatpush.msra.mxu3 %v2630_v37 }
 0x749   :  { %v1637_v17 = vmul.f32 1.442695, %v1626_v0 }
 0x74a   :  { %1836 = vmatpush.msra.mxu3 %v2631_v59 }
 0x74b   :  { %2565 = vpow2.f32 %v1637_v17  ;;  %1622 = vmax.xlane.f32.xlu2 %v1621_v12 }
 0x74c   :  { %2567 = vpow2.f32 %v1635_v43  ;;  %1837 = vmatpush.msra.mxu3 %v2632_v7 }
 0x74e   :  { %v1608_v55 = vpop.xlane.xlu2 %1607 }
 0x74f   :  { %v1627_v16 = vsub.f32 %v3538_v35, %v1608_v55  ;;  %1619 = vmax.xlane.f32.xlu0 %v1618_v36 }
 0x751   :  { %v3723_v58 = vpop.eup %2565  ;;  %v1639_v1 = vmul.f32 1.442695, %v1627_v16 }
 0x752   :  { %v1657_v14 = vsel %vm502_vm3, %v3723_v58, 0.0  ;;  %v3727_v39 = vpop.eup %2567 }
 0x753   :  { %2569 = vpow2.f32 %v1639_v1  ;;  %1658 = vadd.xlane.f32.xlu2 %v1657_v14  ;;  %v1654_v61 = vsel %vm502_vm3, %v3727_v39, 0.0 }
 0x756   :  { %v1713_v53 = vpop.permute.xlu2 %1712  ;;  %v2450_v10 = vpop.permute.xlu1 %2449 }
 0x757   :  { %2365 = vmatpush.msk.msrb.mxu0 %vm656_vm1, %v1713_v53  ;;  %v2451_v8 = vunpack.i.l.bf16 %v2450_v10  ;;  %v2452_v47 = vunpack.i.h.bf16 %v2450_v10  ;;  %vm1094_vm1 = vcmask 523264  }
 0x759   :  { %v3732_v48 = vpop.eup %2569  ;;  %v2445_v35 = vpop.permute.xlu0 %2444  ;;  %1655 = vadd.xlane.f32.xlu1 %v1654_v61 }
 0x75a   :  { %v2446_v49 = vunpack.i.l.bf16 %v2445_v35  ;;  %v1660_v54 = vsel %vm502_vm3, %v3732_v48, 0.0  ;;  %v2447_v5 = vunpack.i.h.bf16 %v2445_v35 }
 0x75b   :  { %1661 = vadd.xlane.f32.xlu0 %v1660_v54 }
 0x75c   :  { %1759 = vmatpush.msrb.mxu0 %v2446_v49 }
 0x75e   :  { %1760 = vmatpush.msrb.mxu0 %v2447_v5 }
 0x760   :  { %1761 = vmatpush.msrb.mxu0 %v2451_v8 }
 0x762   :  { %1762 = vmatpush.msrb.mxu0 %v2452_v47 }
 0x779   :  { %v1055_v22 = vpop.f32.mrf.mxu0 }
 0x77a   :  { %v1056_v38 = vadd.f32 %v3760_v21, %v1055_v22 }
 0x77c   :  { %v1082_v51 = vmax.f32 %v1056_v38, 0.0 }
 0x77e   :  { %2320 = vmatmul.msk.f32.vlgmr.msrb.gmra.mxu3 %vm1094_vm1, %v1082_v51 }
 0x781   :  { %v1058_v63 = vpop.f32.mrf.mxu0  ;;  %v1614_v50 = vpop.xlane.xlu1 %1613 }
 0x782   :  { %v1059_v44 = vadd.f32 %v3760_v21, %v1058_v63  ;;  %v1629_v31 = vsub.f32 %v3634_v45, %v1614_v50 }
 0x784   :  { %v1083_v57 = vmax.f32 %v1059_v44, 0.0  ;;  %v1643_v41 = vmul.f32 1.442695, %v1629_v31  ;;  %v1611_v42 = vpop.xlane.xlu0 %1610 }
 0x785   :  { %v1628_v34 = vsub.f32 %v3643_v3, %v1611_v42 }
 0x786   :  { %2571 = vpow2.f32 %v1643_v41  ;;  %2321 = vmatmul.msk.f32.gmra.mxu3 %vm1094_vm1, %v1083_v57 }
 0x787   :  { %v1641_v29 = vmul.f32 1.442695, %v1628_v34 }
 0x789   :  { %2573 = vpow2.f32 %v1641_v29  ;;  %v1061_v9 = vpop.f32.mrf.mxu0  ;;  %v1617_v11 = vpop.xlane.xlu1 %1616 }
 0x78a   :  { %v1062_v40 = vadd.f32 %v3760_v21, %v1061_v9  ;;  %v1630_v23 = vsub.f32 %v3653_v32, %v1617_v11 }
 0x78c   :  { %v3770_v0 = vpop.eup %2571  ;;  %v1084_v28 = vmax.f32 %v1062_v40, 0.0  ;;  %v1645_v45 = vmul.f32 1.442695, %v1630_v23 }
 0x78d   :  { %v1666_v17 = vsel %vm502_vm3, %v3770_v0, 0.0 }
 0x78e   :  { %2575 = vpow2.f32 %v1645_v45  ;;  %2322 = vmatmul.msk.f32.gmra.mxu3 %vm1094_vm1, %v1084_v28  ;;  %1667 = vadd.xlane.f32.xlu0 %v1666_v17 }
 0x78f   :  { %v3775_v3 = vpop.eup %2573 }
 0x790   :  { %v1663_v12 = vsel %vm502_vm3, %v3775_v3, 0.0 }
 0x791   :  { %1664 = vadd.xlane.f32.xlu2 %v1663_v12  ;;  %v1064_v43 = vpop.f32.mrf.mxu0 }
 0x792   :  { %v1065_v32 = vadd.f32 %v3760_v21, %v1064_v43 }
 0x794   :  { %v3780_v55 = vpop.eup %2575  ;;  %v1085_v36 = vmax.f32 %v1065_v32, 0.0 }
 0x795   :  { %v1669_v16 = vsel %vm502_vm3, %v3780_v55, 0.0 }
 0x796   :  { %2323 = vmatmul.msk.f32.gmra.mxu3 %vm1094_vm1, %v1085_v36  ;;  %1670 = vadd.xlane.f32.xlu1 %v1669_v16  ;;  %v3816_v36 = vld [vmem:[%s4170_s12] ss:$0 sm:$0xff] }
 0x797   :  { %v2455_v1 = vpop.permute.xlu0 %2454 }
 0x798   :  { %v2456_v14 = vunpack.i.l.bf16 %v2455_v1  ;;  %v2457_v61 = vunpack.i.h.bf16 %v2455_v1 }
 0x799   :  { %v1067_v53 = vpop.f32.mrf.mxu0 }
 0x79a   :  { %v1068_v35 = vadd.f32 %v3760_v21, %v1067_v53  ;;  %1763 = vmatpush.msrb.mxu0 %v2456_v14 }
 0x79c   :  { %v1086_v49 = vmax.f32 %v1068_v35, 0.0  ;;  %1764 = vmatpush.msrb.mxu0 %v2457_v61 }
 0x79e   :  { %2324 = vmatmul.msk.f32.gmra.mxu3 %vm1094_vm1, %v1086_v49 }
 0x7a1   :  { %v1070_v54 = vpop.f32.mrf.mxu0  ;;  %v2460_v10 = vpop.permute.xlu1 %2459 }
 0x7a2   :  { %v1071_v5 = vadd.f32 %v3760_v21, %v1070_v54  ;;  %v2461_v13 = vunpack.i.l.bf16 %v2460_v10  ;;  %v2462_v8 = vunpack.i.h.bf16 %v2460_v10 }
 0x7a4   :  { %v1087_v19 = vmax.f32 %v1071_v5, 0.0  ;;  %1765 = vmatpush.msrb.mxu0 %v2461_v13 }
 0x7a6   :  { %2325 = vmatmul.msk.f32.gmra.mxu3 %vm1094_vm1, %v1087_v19  ;;  %1766 = vmatpush.msrb.mxu0 %v2462_v8 }
 0x7a9   :  { %v1073_v24 = vpop.f32.mrf.mxu0 }
 0x7aa   :  { %v1074_v47 = vadd.f32 %v3760_v21, %v1073_v24 }
 0x7ac   :  { %v1088_v26 = vmax.f32 %v1074_v47, 0.0 }
 0x7ae   :  { %2326 = vmatmul.msk.f32.gmra.mxu3 %vm1094_vm1, %v1088_v26 }
 0x7b1   :  { %v1076_v37 = vpop.f32.mrf.mxu0 }
 0x7b2   :  { %v1077_v59 = vadd.f32 %v3760_v21, %v1076_v37 }
 0x7b4   :  { %v1089_v7 = vmax.f32 %v1077_v59, 0.0 }
 0x7b6   :  { %v1653_v22 = vpop.xlane.xlu2 %1652  ;;  %2327 = vmatmul.msk.f32.gmra.mxu3 %vm1094_vm1, %v1089_v7 }
 0x7b7   :  { %2577 = vrcp.f32 %v1653_v22 }
 0x7b9   :  { %v1079_v38 = vpop.f32.mrf.mxu0 }
 0x7ba   :  { %v1080_v51 = vadd.f32 %v3760_v21, %v1079_v38 }
 0x7bc   :  { %v1090_v63 = vmax.f32 %v1080_v51, 0.0 }
 0x7bd   :  { %v2578_v50 = vpop.eup %2577 }
 0x7be   :  { %v1687_v44 = vmul.f32 %v2578_v50, %v3693_v46  ;;  %v1623_v31 = vpop.xlane.xlu2 %1622  ;;  %2328 = vmatmul.msk.f32.gmra.mxu3 %vm1094_vm1, %v1090_v63 }
 0x7bf   :  { %v1632_v57 = vsub.f32 %v3706_v56, %v1623_v31 }
 0x7c0   :  { %2366 = vmatmul.msk.f32.vlgmr.msrb.gmra.mxu0 %vm502_vm3, %v1687_v44 }
 0x7c1   :  { %v1649_v41 = vmul.f32 1.442695, %v1632_v57 }
 0x7c2   :  { %v1620_v42 = vpop.xlane.xlu0 %1619 }
 0x7c3   :  { %2579 = vpow2.f32 %v1649_v41  ;;  %v1631_v34 = vsub.f32 %v3716_v27, %v1620_v42 }
 0x7c5   :  { %v1647_v29 = vmul.f32 1.442695, %v1631_v34 }
 0x7c6   :  { %v1659_v23 = vpop.xlane.xlu2 %1658 }
 0x7c7   :  { %2581 = vpow2.f32 %v1647_v29 }
 0x7c9   :  { %v3799_v9 = vpop.eup %2579 }
 0x7ca   :  { %v1675_v11 = vsel %vm527_vm4, %v3799_v9, 0.0 }
 0x7cb   :  { %1676 = vadd.xlane.f32.xlu0 %v1675_v11 }
 0x7cc   :  { %v1656_v46 = vpop.xlane.xlu1 %1655 }
 0x7cd   :  { %v3803_v40 = vpop.eup %2581  ;;  %2583 = vrcp.f32 %v1656_v46 }
 0x7ce   :  { %v1672_v56 = vsel %vm502_vm3, %v3803_v40, 0.0  ;;  %2585 = vrcp.f32 %v1659_v23  ;;  %v1662_v45 = vpop.xlane.xlu0 %1661 }
 0x7cf   :  { %1673 = vadd.xlane.f32.xlu2 %v1672_v56  ;;  %2587 = vrcp.f32 %v1662_v45  ;;  %v3892_v56 = vld [vmem:[%s4164_s6] ss:$0 sm:$0xff] }
 0x7d3   :  { %v2584_v28 = vpop.eup %2583 }
 0x7d4   :  { %v1688_v27 = vmul.f32 %v2584_v28, %v3727_v39  ;;  %v2586_v17 = vpop.eup %2585  ;;  %v2634_v28 = vld [vmem:[%s4158_s0 + $0x48] sm:$0xff] }
 0x7d5   :  { %v1689_v12 = vmul.f32 %v2586_v17, %v3723_v58  ;;  %v2588_v43 = vpop.eup %2587 }
 0x7d6   :  { %2367 = vmatmul.msk.f32.gmra.mxu0 %vm502_vm3, %v1688_v27  ;;  %v1690_v32 = vmul.f32 %v2588_v43, %v3732_v48 }
 0x7de   :  { %2368 = vmatmul.msk.f32.gmra.mxu0 %vm502_vm3, %v1689_v12 }
 0x7e6   :  { %2369 = vmatmul.msk.f32.gmra.mxu0 %vm502_vm3, %v1690_v32 }
 0x801   :  { %v1139_v39 = vpop.f32.mrf.mxu3  ;;  %v1668_v58 = vpop.xlane.xlu0 %1667 }
 0x802   :  { %v1140_v16 = vadd.f32 %v3816_v36, %v1139_v39  ;;  %v2635_v39 = vld [vmem:[%s4158_s0 + $0x50] sm:$0xff] }
 0x804   :  { %v1166_v1 = vadd.f32 %v1140_v16, %v3391_v15  ;;  %v1665_v14 = vpop.xlane.xlu2 %1664 }
 0x805   :  { %2589 = vrcp.f32 %v1665_v14 }
 0x806   :  { %1175 = vst.msk [vmem:[%s4171_s13] sm:$0xff] %vm81_vm0, %v1166_v1  ;;  %2591 = vrcp.f32 %v1668_v58 }
 0x809   :  { %v1142_v48 = vpop.f32.mrf.mxu3  ;;  %v1671_v15 = vpop.xlane.xlu1 %1670 }
 0x80a   :  { %v1143_v53 = vadd.f32 %v3816_v36, %v1142_v48  ;;  %2593 = vrcp.f32 %v1671_v15  ;;  %v2636_v48 = vld [vmem:[%s4158_s0 + $0x58] sm:$0xff]  ;;  %v2637_v15 = vld [vmem:[%s4158_s0 + $0x60] sm:$0xff] }
 0x80b   :  { %v2590_v61 = vpop.eup %2589 }
 0x80c   :  { %v1167_v35 = vadd.f32 %v1143_v53, %v3370_v30  ;;  %v1691_v49 = vmul.f32 %v2590_v61, %v3775_v3  ;;  %v2592_v54 = vpop.eup %2591 }
 0x80d   :  { %v1692_v19 = vmul.f32 %v2592_v54, %v3770_v0 }
 0x80e   :  { %1176 = vst.msk [vmem:[%s4171_s13 + $0x8] sm:$0xff] %vm81_vm0, %v1167_v35  ;;  %2370 = vmatmul.msk.f32.gmra.mxu0 %vm502_vm3, %v1691_v49 }
 0x810   :  { %v2594_v30 = vpop.eup %2593 }
 0x811   :  { %v1145_v10 = vpop.f32.mrf.mxu3  ;;  %v1693_v47 = vmul.f32 %v2594_v30, %v3780_v55 }
 0x812   :  { %v1146_v5 = vadd.f32 %v3816_v36, %v1145_v10 }
 0x814   :  { %v1168_v13 = vadd.f32 %v1146_v5, %v3377_v52 }
 0x816   :  { %1177 = vst.msk [vmem:[%s4171_s13 + $0x10] sm:$0xff] %vm81_vm0, %v1168_v13  ;;  %2371 = vmatmul.msk.f32.gmra.mxu0 %vm502_vm3, %v1692_v19  ;;  %v2638_v19 = vld [vmem:[%s4158_s0 + $0x68] sm:$0xff] }
 0x819   :  { %v1148_v3 = vpop.f32.mrf.mxu3 }
 0x81a   :  { %v1149_v8 = vadd.f32 %v3816_v36, %v1148_v3 }
 0x81c   :  { %v1169_v24 = vadd.f32 %v1149_v8, %v3412_v60 }
 0x81e   :  { %1178 = vst.msk [vmem:[%s4171_s13 + $0x18] sm:$0xff] %vm81_vm0, %v1169_v24  ;;  %2372 = vmatmul.msk.f32.gmra.mxu0 %vm502_vm3, %v1693_v47  ;;  %v2639_v47 = vld [vmem:[%s4158_s0 + $0x70] sm:$0xff] }
 0x821   :  { %v1151_v52 = vpop.f32.mrf.mxu3 }
 0x822   :  { %v1152_v0 = vadd.f32 %v3816_v36, %v1151_v52 }
 0x824   :  { %v1170_v26 = vadd.f32 %v1152_v0, %v3382_v4 }
 0x826   :  { %1179 = vst.msk [vmem:[%s4171_s13 + $0x20] sm:$0xff] %vm81_vm0, %v1170_v26 }
 0x829   :  { %v1154_v60 = vpop.f32.mrf.mxu3 }
 0x82a   :  { %v1155_v55 = vadd.f32 %v3816_v36, %v1154_v60 }
 0x82c   :  { %v1171_v37 = vadd.f32 %v1155_v55, %v3396_v33  ;;  %v2640_v55 = vld [vmem:[%s4158_s0 + $0x78] sm:$0xff] }
 0x82e   :  { %1180 = vst.msk [vmem:[%s4171_s13 + $0x28] sm:$0xff] %vm81_vm0, %v1171_v37 }
 0x831   :  { %v1157_v59 = vpop.f32.mrf.mxu3 }
 0x832   :  { %v1158_v7 = vadd.f32 %v3816_v36, %v1157_v59 }
 0x834   :  { %v1172_v4 = vadd.f32 %v1158_v7, %v3401_v18 }
 0x836   :  { %1181 = vst.msk [vmem:[%s4171_s13 + $0x30] sm:$0xff] %vm81_vm0, %v1172_v4 }
 0x839   :  { %v1160_v22 = vpop.f32.mrf.mxu3 }
 0x83a   :  { %v1161_v38 = vadd.f32 %v3816_v36, %v1160_v22 }
 0x83c   :  { %v1173_v33 = vadd.f32 %v1161_v38, %v3426_v2 }
 0x83d   :  { %v1768_v51 = vpop.f32.mrf.mxu0 }
 0x83e   :  { %1182 = vst.msk [vmem:[%s4171_s13 + $0x38] sm:$0xff] %vm81_vm0, %v1173_v33  ;;  %2375 = vmatmul.msk.f32.vlgmr.msra.gmra.mxu3 %vm81_vm0, %v1768_v51  ;;  %v1677_v31 = vpop.xlane.xlu0 %1676 }
 0x841   :  { %v1163_v63 = vpop.f32.mrf.mxu3 }
 0x842   :  { %v1164_v18 = vadd.f32 %v3816_v36, %v1163_v63  ;;  %v1674_v50 = vpop.xlane.xlu2 %1673 }
 0x843   :  { %2595 = vrcp.f32 %v1674_v50 }
 0x844   :  { %v1174_v44 = vadd.f32 %v1164_v18, %v3417_v25  ;;  %2597 = vrcp.f32 %v1677_v31  ;;  %v2641_v18 = vld [vmem:[%s4158_s0 + $0x80] sm:$0xff] }
 0x846   :  { %1183 = vst.msk [vmem:[%s4171_s13 + $0x40] sm:$0x1] %vm106_vm2, %v1174_v44 }
 0x849   :  { %v2596_v2 = vpop.eup %2595 }
 0x84a   :  { %v1694_v57 = vmul.f32 %v2596_v2, %v3803_v40  ;;  %v2598_v41 = vpop.eup %2597 }
 0x84b   :  { %v1695_v42 = vmul.f32 %v2598_v41, %v3799_v9 }
 0x84c   :  { %2373 = vmatmul.msk.f32.gmra.mxu0 %vm502_vm3, %v1694_v57 }
 0x853   :  { %v1771_v34 = vpop.f32.mrf.mxu0 }
 0x854   :  { %2374 = vmatmul.msk.f32.gmra.mxu0 %vm502_vm3, %v1695_v42  ;;  %2376 = vmatmul.msk.f32.gmra.mxu3 %vm81_vm0, %v1771_v34 }
 0x85b   :  { %v1774_v25 = vpop.f32.mrf.mxu0 }
 0x85c   :  { %2377 = vmatmul.msk.f32.gmra.mxu3 %vm81_vm0, %v1774_v25 }
 0x863   :  { %v1777_v29 = vpop.f32.mrf.mxu0 }
 0x864   :  { %2378 = vmatmul.msk.f32.gmra.mxu3 %vm81_vm0, %v1777_v29 }
 0x88b   :  { %v1780_v11 = vpop.f32.mrf.mxu0 }
 0x88c   :  { %2379 = vmatmul.msk.f32.gmra.mxu3 %vm81_vm0, %v1780_v11 }
 0x893   :  { %v1783_v46 = vpop.f32.mrf.mxu0 }
 0x894   :  { %2380 = vmatmul.msk.f32.gmra.mxu3 %vm81_vm0, %v1783_v46  ;;  %v2642_v46 = vld [vmem:[%s4158_s0 + $0x88] sm:$0x1] }
 0x89b   :  { %v1786_v40 = vpop.f32.mrf.mxu0 }
 0x89c   :  { %2381 = vmatmul.msk.f32.gmra.mxu3 %vm81_vm0, %v1786_v40 }
 0x8c1   :  { %v1839_v9 = vpop.f32.mrf.mxu3 }
 0x8c2   :  { %v1840_v23 = vadd.f32 %v3892_v56, %v1839_v9 }
 0x8c4   :  { %v3898_v27 = vadd.f32 %v2634_v28, %v1840_v23 }
 0x8c6   :  { %v1875_v45 = vsel %vm81_vm0, %v3898_v27, 0.0 }
 0x8c7   :  { %1876 = vadd.xlane.f32.xlu1 %v1875_v45 }
 0x8c9   :  { %v1789_v17 = vpop.f32.mrf.mxu0 }
 0x8ca   :  { %2382 = vmatmul.msk.f32.gmra.mxu3 %vm81_vm0, %v1789_v17 }
 0x8d1   :  { %v1792_v12 = vpop.f32.mrf.mxu0 }
 0x8d2   :  { %2383 = vmatmul.msk.f32.gmra.mxu3 %vm81_vm0, %v1792_v12 }
 0x8d7   :  { %v1842_v43 = vpop.f32.mrf.mxu3 }
 0x8d8   :  { %v1843_v32 = vadd.f32 %v3892_v56, %v1842_v43 }
 0x8da   :  { %v3908_v16 = vadd.f32 %v2635_v39, %v1843_v32 }
 0x8dc   :  { %v1878_v1 = vsel %vm81_vm0, %v3908_v16, 0.0 }
 0x8dd   :  { %1879 = vadd.xlane.f32.xlu2 %v1878_v1 }
 0x8df   :  { %v1845_v14 = vpop.f32.mrf.mxu3 }
 0x8e0   :  { %v1846_v58 = vadd.f32 %v3892_v56, %v1845_v14 }
 0x8e2   :  { %v3916_v53 = vadd.f32 %v2636_v48, %v1846_v58 }
 0x8e4   :  { %v1881_v61 = vsel %vm81_vm0, %v3916_v53, 0.0 }
 0x8e5   :  { %1882 = vadd.xlane.f32.xlu0 %v1881_v61 }
 0x8e7   :  { %v1848_v35 = vpop.f32.mrf.mxu3 }
 0x8e8   :  { %v1849_v49 = vadd.f32 %v3892_v56, %v1848_v35 }
 0x8ea   :  { %v3924_v54 = vadd.f32 %v2637_v15, %v1849_v49 }
 0x8ec   :  { %v1884_v10 = vsel %vm81_vm0, %v3924_v54, 0.0 }
 0x8ed   :  { %1885 = vadd.xlane.f32.xlu1 %v1884_v10 }
 0x90f   :  { %v1851_v5 = vpop.f32.mrf.mxu3 }
 0x910   :  { %v1852_v13 = vadd.f32 %v3892_v56, %v1851_v5 }
 0x912   :  { %v3932_v30 = vadd.f32 %v2638_v19, %v1852_v13 }
 0x914   :  { %v1887_v3 = vsel %vm81_vm0, %v3932_v30, 0.0 }
 0x915   :  { %1888 = vadd.xlane.f32.xlu2 %v1887_v3 }
 0x917   :  { %v1854_v8 = vpop.f32.mrf.mxu3 }
 0x918   :  { %v1855_v24 = vadd.f32 %v3892_v56, %v1854_v8 }
 0x91a   :  { %v3940_v52 = vadd.f32 %v2639_v47, %v1855_v24 }
 0x91c   :  { %v1890_v0 = vsel %vm81_vm0, %v3940_v52, 0.0 }
 0x91d   :  { %1891 = vadd.xlane.f32.xlu0 %v1890_v0 }
 0x91f   :  { %v1857_v26 = vpop.f32.mrf.mxu3 }
 0x920   :  { %v1858_v60 = vadd.f32 %v3892_v56, %v1857_v26 }
 0x922   :  { %v3948_v37 = vadd.f32 %v2640_v55, %v1858_v60 }
 0x924   :  { %v1893_v59 = vsel %vm81_vm0, %v3948_v37, 0.0 }
 0x925   :  { %1894 = vadd.xlane.f32.xlu2 %v1893_v59 }
 0x93a   :  { %v1877_v7 = vpop.xlane.xlu1 %1876 }
 0x93b   :  { %v1902_v4 = vmul.f32 %v1877_v7, %v2746_v20 }
 0x93d   :  { %v3954_v22 = vsub.f32 %v3898_v27, %v1902_v4 }
 0x93f   :  { %v1920_v38 = vmul.f32 %v3954_v22, %v3954_v22 }
 0x941   :  { %v1929_v33 = vsel %vm81_vm0, %v1920_v38, 0.0 }
 0x942   :  { %1930 = vadd.xlane.f32.xlu1 %v1929_v33 }
 0x94d   :  { %v1860_v51 = vpop.f32.mrf.mxu3 }
 0x94e   :  { %v1861_v63 = vadd.f32 %v3892_v56, %v1860_v51 }
 0x950   :  { %v3963_v50 = vadd.f32 %v2641_v18, %v1861_v63  ;;  %v1880_v44 = vpop.xlane.xlu2 %1879 }
 0x951   :  { %v1903_v31 = vmul.f32 %v1880_v44, %v2746_v20 }
 0x952   :  { %v1896_v2 = vsel %vm81_vm0, %v3963_v50, 0.0 }
 0x953   :  { %v3969_v57 = vsub.f32 %v3908_v16, %v1903_v31  ;;  %1897 = vadd.xlane.f32.xlu1 %v1896_v2 }
 0x955   :  { %v1863_v41 = vpop.f32.mrf.mxu3  ;;  %v1921_v42 = vmul.f32 %v3969_v57, %v3969_v57 }
 0x956   :  { %v1864_v34 = vadd.f32 %v3892_v56, %v1863_v41 }
 0x957   :  { %v1932_v25 = vsel %vm81_vm0, %v1921_v42, 0.0 }
 0x958   :  { %v1883_v29 = vpop.xlane.xlu0 %1882  ;;  %1933 = vadd.xlane.f32.xlu0 %v1932_v25  ;;  %v3979_v40 = vadd.f32 %v2642_v46, %v1864_v34 }
 0x959   :  { %v1904_v11 = vmul.f32 %v1883_v29, %v2746_v20 }
 0x95a   :  { %v1899_v28 = vsel %vm106_vm2, %v3979_v40, 0.0 }
 0x95b   :  { %v3982_v9 = vsub.f32 %v3916_v53, %v1904_v11 }
 0x95d   :  { %v1922_v23 = vmul.f32 %v3982_v9, %v3982_v9 }
 0x95f   :  { %v1935_v56 = vsel %vm81_vm0, %v1922_v23, 0.0 }
 0x960   :  { %v1886_v45 = vpop.xlane.xlu1 %1885  ;;  %1936 = vadd.xlane.f32.xlu2 %v1935_v56  ;;  %1900 = vadd.xlane.f32.xlu0 %v1899_v28 }
 0x961   :  { %v1905_v17 = vmul.f32 %v1886_v45, %v2746_v20 }
 0x963   :  { %v3991_v12 = vsub.f32 %v3924_v54, %v1905_v17 }
 0x965   :  { %v1923_v43 = vmul.f32 %v3991_v12, %v3991_v12 }
 0x967   :  { %v1938_v32 = vsel %vm81_vm0, %v1923_v43, 0.0 }
 0x968   :  { %1939 = vadd.xlane.f32.xlu1 %v1938_v32 }
 0x988   :  { %v1889_v39 = vpop.xlane.xlu2 %1888 }
 0x989   :  { %v1906_v1 = vmul.f32 %v1889_v39, %v2746_v20 }
 0x98b   :  { %v3998_v14 = vsub.f32 %v3932_v30, %v1906_v1 }
 0x98d   :  { %v1924_v58 = vmul.f32 %v3998_v14, %v3998_v14 }
 0x98f   :  { %v1941_v48 = vsel %vm81_vm0, %v1924_v58, 0.0 }
 0x990   :  { %v1892_v61 = vpop.xlane.xlu0 %1891  ;;  %1942 = vadd.xlane.f32.xlu2 %v1941_v48 }
 0x991   :  { %v1907_v35 = vmul.f32 %v1892_v61, %v2746_v20 }
 0x993   :  { %v4005_v49 = vsub.f32 %v3940_v52, %v1907_v35 }
 0x995   :  { %v1925_v15 = vmul.f32 %v4005_v49, %v4005_v49 }
 0x997   :  { %v1944_v10 = vsel %vm81_vm0, %v1925_v15, 0.0 }
 0x998   :  { %v1895_v5 = vpop.xlane.xlu2 %1894  ;;  %1945 = vadd.xlane.f32.xlu0 %v1944_v10 }
 0x999   :  { %v1908_v13 = vmul.f32 %v1895_v5, %v2746_v20 }
 0x99b   :  { %v4012_v19 = vsub.f32 %v3948_v37, %v1908_v13 }
 0x99d   :  { %v1926_v3 = vmul.f32 %v4012_v19, %v4012_v19 }
 0x99f   :  { %v1947_v8 = vsel %vm81_vm0, %v1926_v3, 0.0  ;;  %v4043_v3 = vld [vmem:[%s4165_s7] ss:$0 sm:$0xff] }
 0x9a0   :  { %1948 = vadd.xlane.f32.xlu1 %v1947_v8 }
 0x9b5   :  { %v1931_v24 = vpop.xlane.xlu1 %1930 }
 0x9b6   :  { %v1956_v47 = vmul.f32 %v1931_v24, %v2746_v20 }
 0x9b8   :  { %v1965_v0 = vadd.f32 1e-05, %v1956_v47 }
 0x9ba   :  { %2599 = vrsqrt.f32 %v1965_v0  ;;  %vm1980_vm4 = vweird.f32 %v1965_v0 }
 0x9c0   :  { %v2600_v26 = vpop.eup %2599 }
 0x9c1   :  { %v1975_v60 = vmul.f32 %v2600_v26, %v1965_v0  ;;  %vm1981_vm3 = vweird.f32 %v2600_v26  ;;  %v4049_v0 = vld [vmem:[%s4166_s8] ss:$0 sm:$0xff] }
 0x9c2   :  { %vm1982_vm15 = vmor %vm1980_vm4, %vm1981_vm3 }
 0x9c3   :  { %v1976_v55 = vmul.f32 %v2600_v26, %v1975_v60 }
 0x9c5   :  { %v1977_v59 = vmul.f32 0.5, %v1976_v55 }
 0x9c6   :  { %v1898_v7 = vpop.xlane.xlu1 %1897 }
 0x9c7   :  { %v1978_v4 = vsub.f32 1.5, %v1977_v59  ;;  %v1909_v38 = vmul.f32 %v1898_v7, %v2746_v20 }
 0x9c9   :  { %v1979_v33 = vmul.f32 %v2600_v26, %v1978_v4  ;;  %v4020_v51 = vsub.f32 %v3963_v50, %v1909_v38 }
 0x9cb   :  { %v1983_v63 = vsel %vm1982_vm15, %v2600_v26, %v1979_v33  ;;  %v1934_v18 = vpop.xlane.xlu0 %1933  ;;  %v1927_v44 = vmul.f32 %v4020_v51, %v4020_v51 }
 0x9cc   :  { %v2064_v31 = vmul.f32 %v1983_v63, %v3954_v22  ;;  %v1957_v2 = vmul.f32 %v1934_v18, %v2746_v20 }
 0x9cd   :  { %v1950_v41 = vsel %vm81_vm0, %v1927_v44, 0.0 }
 0x9ce   :  { %v2073_v42 = vmul.f32 %v3588_v6, %v2064_v31  ;;  %v1966_v34 = vadd.f32 1e-05, %v1957_v2  ;;  %1951 = vadd.xlane.f32.xlu2 %v1950_v41 }
 0x9d0   :  { %2601 = vrsqrt.f32 %v1966_v34  ;;  %v2082_v25 = vadd.f32 %v3600_v62, %v2073_v42  ;;  %vm1990_vm6 = vweird.f32 %v1966_v34 }
 0x9d2   :  { %2384 = vmatmul.msk.f32.vlgmr.msra.gmra.mxu2 %vm81_vm0, %v2082_v25 }
 0x9d3   :  { %v1937_v29 = vpop.xlane.xlu2 %1936  ;;  %v1901_v11 = vpop.xlane.xlu0 %1900 }
 0x9d4   :  { %v1958_v46 = vmul.f32 %v1937_v29, %v2746_v20  ;;  %v1910_v23 = vmul.f32 %v1901_v11, %v2746_v20 }
 0x9d6   :  { %v2602_v22 = vpop.eup %2601  ;;  %v1967_v56 = vadd.f32 1e-05, %v1958_v46  ;;  %v4033_v28 = vsub.f32 %v3979_v40, %v1910_v23 }
 0x9d7   :  { %v1985_v45 = vmul.f32 %v2602_v22, %v1966_v34  ;;  %vm1991_vm5 = vweird.f32 %v2602_v22 }
 0x9d8   :  { %2603 = vrsqrt.f32 %v1967_v56  ;;  %v1928_v6 = vmul.f32 %v4033_v28, %v4033_v28  ;;  %vm1992_vm7 = vmor %vm1990_vm6, %vm1991_vm5  ;;  %vm2000_vm9 = vweird.f32 %v1967_v56 }
 0x9d9   :  { %v1986_v17 = vmul.f32 %v2602_v22, %v1985_v45 }
 0x9da   :  { %v1953_v62 = vsel %vm106_vm2, %v1928_v6, 0.0 }
 0x9db   :  { %v1987_v43 = vmul.f32 0.5, %v1986_v17  ;;  %v1940_v32 = vpop.xlane.xlu1 %1939  ;;  %1954 = vadd.xlane.f32.xlu0 %v1953_v62 }
 0x9dc   :  { %v1959_v39 = vmul.f32 %v1940_v32, %v2746_v20 }
 0x9dd   :  { %v1988_v1 = vsub.f32 1.5, %v1987_v43 }
 0x9de   :  { %v2604_v58 = vpop.eup %2603  ;;  %v1968_v48 = vadd.f32 1e-05, %v1959_v39 }
 0x9df   :  { %v1989_v61 = vmul.f32 %v2602_v22, %v1988_v1  ;;  %v1995_v35 = vmul.f32 %v2604_v58, %v1967_v56  ;;  %vm2001_vm8 = vweird.f32 %v2604_v58 }
 0x9e0   :  { %2605 = vrsqrt.f32 %v1968_v48  ;;  %vm2002_vm10 = vmor %vm2000_vm9, %vm2001_vm8  ;;  %vm2010_vm12 = vweird.f32 %v1968_v48 }
 0x9e1   :  { %v1993_v15 = vsel %vm1992_vm7, %v2602_v22, %v1989_v61  ;;  %v1996_v10 = vmul.f32 %v2604_v58, %v1995_v35 }
 0x9e2   :  { %v2065_v5 = vmul.f32 %v1993_v15, %v3969_v57 }
 0x9e3   :  { %v1997_v13 = vmul.f32 0.5, %v1996_v10 }
 0x9e4   :  { %v2074_v8 = vmul.f32 %v4043_v3, %v2065_v5 }
 0x9e5   :  { %v1998_v24 = vsub.f32 1.5, %v1997_v13 }
 0x9e6   :  { %v2606_v47 = vpop.eup %2605  ;;  %v2083_v26 = vadd.f32 %v4049_v0, %v2074_v8 }
 0x9e7   :  { %v1999_v60 = vmul.f32 %v2604_v58, %v1998_v24  ;;  %v2005_v57 = vmul.f32 %v2606_v47, %v1968_v48  ;;  %vm2011_vm11 = vweird.f32 %v2606_v47 }
 0x9e8   :  { %2385 = vmatmul.msk.f32.gmra.mxu2 %vm81_vm0, %v2083_v26  ;;  %vm2012_vm13 = vmor %vm2010_vm12, %vm2011_vm11 }
 0x9e9   :  { %v2003_v55 = vsel %vm2002_vm10, %v2604_v58, %v1999_v60  ;;  %v2006_v59 = vmul.f32 %v2606_v47, %v2005_v57 }
 0x9ea   :  { %v2066_v7 = vmul.f32 %v2003_v55, %v3982_v9 }
 0x9eb   :  { %v2007_v4 = vmul.f32 0.5, %v2006_v59 }
 0x9ec   :  { %v2075_v38 = vmul.f32 %v4043_v3, %v2066_v7 }
 0x9ed   :  { %v2008_v33 = vsub.f32 1.5, %v2007_v4 }
 0x9ee   :  { %v2084_v63 = vadd.f32 %v4049_v0, %v2075_v38 }
 0x9ef   :  { %v2009_v18 = vmul.f32 %v2606_v47, %v2008_v33 }
 0x9f0   :  { %2386 = vmatmul.msk.f32.gmra.mxu2 %vm81_vm0, %v2084_v63 }
 0x9f1   :  { %v2013_v44 = vsel %vm2012_vm13, %v2606_v47, %v2009_v18 }
 0x9f2   :  { %v2067_v31 = vmul.f32 %v2013_v44, %v3991_v12 }
 0x9f4   :  { %v2076_v2 = vmul.f32 %v4043_v3, %v2067_v31 }
 0x9f6   :  { %v2085_v41 = vadd.f32 %v4049_v0, %v2076_v2 }
 0x9f8   :  { %2387 = vmatmul.msk.f32.gmra.mxu2 %vm81_vm0, %v2085_v41 }
 0xa03   :  { %v1943_v9 = vpop.xlane.xlu2 %1942 }
 0xa04   :  { %v1960_v42 = vmul.f32 %v1943_v9, %v2746_v20 }
 0xa06   :  { %v1969_v34 = vadd.f32 1e-05, %v1960_v42 }
 0xa08   :  { %2607 = vrsqrt.f32 %v1969_v34  ;;  %vm2020_vm3 = vweird.f32 %v1969_v34 }
 0xa0b   :  { %v1946_v25 = vpop.xlane.xlu0 %1945 }
 0xa0c   :  { %v1961_v29 = vmul.f32 %v1946_v25, %v2746_v20 }
 0xa0e   :  { %v2608_v11 = vpop.eup %2607  ;;  %v1970_v46 = vadd.f32 1e-05, %v1961_v29 }
 0xa0f   :  { %v2015_v23 = vmul.f32 %v2608_v11, %v1969_v34  ;;  %vm2021_vm14 = vweird.f32 %v2608_v11 }
 0xa10   :  { %2609 = vrsqrt.f32 %v1970_v46  ;;  %vm2022_vm4 = vmor %vm2020_vm3, %vm2021_vm14  ;;  %vm2030_vm5 = vweird.f32 %v1970_v46 }
 0xa11   :  { %v2016_v22 = vmul.f32 %v2608_v11, %v2015_v23 }
 0xa13   :  { %v2017_v12 = vmul.f32 0.5, %v2016_v22  ;;  %v1949_v56 = vpop.xlane.xlu1 %1948 }
 0xa14   :  { %v1962_v45 = vmul.f32 %v1949_v56, %v2746_v20 }
 0xa15   :  { %v2018_v6 = vsub.f32 1.5, %v2017_v12 }
 0xa16   :  { %v2610_v17 = vpop.eup %2609  ;;  %v1971_v62 = vadd.f32 1e-05, %v1962_v45 }
 0xa17   :  { %v2019_v43 = vmul.f32 %v2608_v11, %v2018_v6  ;;  %v2025_v32 = vmul.f32 %v2610_v17, %v1970_v46  ;;  %vm2031_vm15 = vweird.f32 %v2610_v17 }
 0xa18   :  { %2611 = vrsqrt.f32 %v1971_v62  ;;  %vm2032_vm6 = vmor %vm2030_vm5, %vm2031_vm15  ;;  %vm2040_vm8 = vweird.f32 %v1971_v62 }
 0xa19   :  { %v2023_v39 = vsel %vm2022_vm4, %v2608_v11, %v2019_v43  ;;  %v2026_v1 = vmul.f32 %v2610_v17, %v2025_v32 }
 0xa1a   :  { %v2068_v58 = vmul.f32 %v2023_v39, %v3998_v14 }
 0xa1b   :  { %v2027_v48 = vmul.f32 0.5, %v2026_v1 }
 0xa1c   :  { %v2077_v61 = vmul.f32 %v4043_v3, %v2068_v58 }
 0xa1d   :  { %v2028_v35 = vsub.f32 1.5, %v2027_v48 }
 0xa1e   :  { %v2612_v15 = vpop.eup %2611  ;;  %v2086_v10 = vadd.f32 %v4049_v0, %v2077_v61 }
 0xa1f   :  { %v2029_v5 = vmul.f32 %v2610_v17, %v2028_v35  ;;  %v2035_v13 = vmul.f32 %v2612_v15, %v1971_v62  ;;  %vm2041_vm7 = vweird.f32 %v2612_v15 }
 0xa20   :  { %2388 = vmatmul.msk.f32.gmra.mxu2 %vm81_vm0, %v2086_v10  ;;  %vm2042_vm9 = vmor %vm2040_vm8, %vm2041_vm7 }
 0xa21   :  { %v2033_v8 = vsel %vm2032_vm6, %v2610_v17, %v2029_v5  ;;  %v2036_v24 = vmul.f32 %v2612_v15, %v2035_v13 }
 0xa22   :  { %v2069_v47 = vmul.f32 %v2033_v8, %v4005_v49 }
 0xa23   :  { %v2037_v26 = vmul.f32 0.5, %v2036_v24 }
 0xa24   :  { %v2078_v14 = vmul.f32 %v4043_v3, %v2069_v47 }
 0xa25   :  { %v2038_v60 = vsub.f32 1.5, %v2037_v26 }
 0xa26   :  { %v2087_v57 = vadd.f32 %v4049_v0, %v2078_v14 }
 0xa27   :  { %v2039_v55 = vmul.f32 %v2612_v15, %v2038_v60 }
 0xa28   :  { %2389 = vmatmul.msk.f32.gmra.mxu2 %vm81_vm0, %v2087_v57 }
 0xa29   :  { %v2043_v59 = vsel %vm2042_vm9, %v2612_v15, %v2039_v55 }
 0xa2a   :  { %v2070_v7 = vmul.f32 %v2043_v59, %v4012_v19 }
 0xa2c   :  { %v2079_v4 = vmul.f32 %v4043_v3, %v2070_v7 }
 0xa2e   :  { %v2088_v38 = vadd.f32 %v4049_v0, %v2079_v4 }
 0xa30   :  { %2390 = vmatmul.msk.f32.gmra.mxu2 %vm81_vm0, %v2088_v38 }
 0xa41   :  { %v1952_v49 = vpop.xlane.xlu2 %1951 }
 0xa42   :  { %v1963_v33 = vmul.f32 %v1952_v49, %v2746_v20 }
 0xa44   :  { %v1972_v63 = vadd.f32 1e-05, %v1963_v33 }
 0xa46   :  { %2613 = vrsqrt.f32 %v1972_v63  ;;  %vm2050_vm11 = vweird.f32 %v1972_v63 }
 0xa4c   :  { %v2614_v18 = vpop.eup %2613 }
 0xa4d   :  { %v2045_v44 = vmul.f32 %v2614_v18, %v1972_v63  ;;  %vm2051_vm10 = vweird.f32 %v2614_v18 }
 0xa4e   :  { %v1955_v31 = vpop.xlane.xlu0 %1954  ;;  %vm2052_vm12 = vmor %vm2050_vm11, %vm2051_vm10 }
 0xa4f   :  { %v2046_v2 = vmul.f32 %v2614_v18, %v2045_v44  ;;  %v1964_v41 = vmul.f32 %v1955_v31, %v2746_v20 }
 0xa51   :  { %v2047_v9 = vmul.f32 0.5, %v2046_v2  ;;  %v1973_v42 = vadd.f32 1e-05, %v1964_v41 }
 0xa53   :  { %v2048_v19 = vsub.f32 1.5, %v2047_v9  ;;  %2615 = vrsqrt.f32 %v1973_v42  ;;  %vm2060_vm14 = vweird.f32 %v1973_v42 }
 0xa55   :  { %v2049_v34 = vmul.f32 %v2614_v18, %v2048_v19  ;;  %v2135_v25 = vpop.f32.mrf.mxu2 }
 0xa56   :  { %v2136_v29 = vadd.f32 %v3760_v21, %v2135_v25 }
 0xa57   :  { %v2053_v11 = vsel %vm2052_vm12, %v2614_v18, %v2049_v34 }
 0xa58   :  { %v2071_v46 = vmul.f32 %v2053_v11, %v4020_v51  ;;  %v2162_v23 = vmax.f32 %v2136_v29, 0.0 }
 0xa59   :  { %v2616_v22 = vpop.eup %2615 }
 0xa5a   :  { %v2055_v12 = vmul.f32 %v2616_v22, %v1973_v42  ;;  %2393 = vmatmul.msk.f32.vlgmr.msra.gmra.mxu1 %vm1094_vm1, %v2162_v23  ;;  %v2080_v20 = vmul.f32 %v4043_v3, %v2071_v46  ;;  %vm2061_vm13 = vweird.f32 %v2616_v22 }
 0xa5b   :  { %vm2062_vm3 = vmor %vm2060_vm14, %vm2061_vm13 }
 0xa5c   :  { %v2056_v56 = vmul.f32 %v2616_v22, %v2055_v12  ;;  %v2089_v45 = vadd.f32 %v4049_v0, %v2080_v20 }
 0xa5e   :  { %v2057_v6 = vmul.f32 0.5, %v2056_v56  ;;  %2391 = vmatmul.msk.f32.gmra.mxu2 %vm81_vm0, %v2089_v45 }
 0xa60   :  { %v2058_v17 = vsub.f32 1.5, %v2057_v6 }
 0xa62   :  { %v2059_v62 = vmul.f32 %v2616_v22, %v2058_v17 }
 0xa64   :  { %v2063_v43 = vsel %vm2062_vm3, %v2616_v22, %v2059_v62 }
 0xa65   :  { %v2072_v51 = vmul.f32 %v2063_v43, %v4033_v28 }
 0xa67   :  { %v2081_v32 = vmul.f32 %v4043_v3, %v2072_v51 }
 0xa69   :  { %v2090_v39 = vadd.f32 %v4049_v0, %v2081_v32 }
 0xa6b   :  { %v2138_v1 = vpop.f32.mrf.mxu2  ;;  %2392 = vmatmul.msk.f32.gmra.mxu2 %vm81_vm0, %v2090_v39 }
 0xa6c   :  { %v2139_v58 = vadd.f32 %v3760_v21, %v2138_v1 }
 0xa6e   :  { %v2163_v48 = vmax.f32 %v2139_v58, 0.0 }
 0xa70   :  { %2394 = vmatmul.msk.f32.gmra.mxu1 %vm1094_vm1, %v2163_v48 }
 0xa73   :  { %v2141_v61 = vpop.f32.mrf.mxu2 }
 0xa74   :  { %v2142_v35 = vadd.f32 %v3760_v21, %v2141_v61 }
 0xa76   :  { %v2164_v15 = vmax.f32 %v2142_v35, 0.0 }
 0xa78   :  { %2395 = vmatmul.msk.f32.gmra.mxu1 %vm1094_vm1, %v2164_v15 }
 0xa7b   :  { %v2144_v10 = vpop.f32.mrf.mxu2 }
 0xa7c   :  { %v2145_v28 = vadd.f32 %v3760_v21, %v2144_v10 }
 0xa7e   :  { %v2165_v3 = vmax.f32 %v2145_v28, 0.0 }
 0xa80   :  { %2396 = vmatmul.msk.f32.gmra.mxu1 %vm1094_vm1, %v2165_v3 }
 0xaa3   :  { %v2147_v0 = vpop.f32.mrf.mxu2 }
 0xaa4   :  { %v2148_v5 = vadd.f32 %v3760_v21, %v2147_v0 }
 0xaa6   :  { %v2166_v13 = vmax.f32 %v2148_v5, 0.0 }
 0xaa8   :  { %2397 = vmatmul.msk.f32.gmra.mxu1 %vm1094_vm1, %v2166_v13 }
 0xaab   :  { %v2150_v8 = vpop.f32.mrf.mxu2 }
 0xaac   :  { %v2151_v24 = vadd.f32 %v3760_v21, %v2150_v8 }
 0xaae   :  { %v2167_v47 = vmax.f32 %v2151_v24, 0.0 }
 0xab0   :  { %2398 = vmatmul.msk.f32.gmra.mxu1 %vm1094_vm1, %v2167_v47 }
 0xab3   :  { %v2153_v26 = vpop.f32.mrf.mxu2 }
 0xab4   :  { %v2154_v14 = vadd.f32 %v3760_v21, %v2153_v26 }
 0xab6   :  { %v2168_v60 = vmax.f32 %v2154_v14, 0.0 }
 0xab8   :  { %2399 = vmatmul.msk.f32.gmra.mxu1 %vm1094_vm1, %v2168_v60 }
 0xad7   :  { %v2215_v57 = vpop.f32.mrf.mxu1 }
 0xad8   :  { %v2216_v55 = vadd.f32 %v3816_v36, %v2215_v57 }
 0xada   :  { %v2242_v59 = vadd.f32 %v2216_v55, %v3898_v27 }
 0xadc   :  { %2402 = vst.msk [vmem:[%s4171_s13 + $0x48] sm:$0xff] %vm81_vm0, %v2242_v59 }
 0xae1   :  { %v2156_v7 = vpop.f32.mrf.mxu2 }
 0xae2   :  { %v2157_v4 = vadd.f32 %v3760_v21, %v2156_v7 }
 0xae4   :  { %v2169_v38 = vmax.f32 %v2157_v4, 0.0 }
 0xae6   :  { %2400 = vmatmul.msk.f32.gmra.mxu1 %vm1094_vm1, %v2169_v38 }
 0xaed   :  { %v2218_v49 = vpop.f32.mrf.mxu1 }
 0xaee   :  { %v2219_v33 = vadd.f32 %v3816_v36, %v2218_v49  ;;  %v2159_v63 = vpop.f32.mrf.mxu2 }
 0xaef   :  { %v2160_v18 = vadd.f32 %v3760_v21, %v2159_v63 }
 0xaf0   :  { %v2243_v44 = vadd.f32 %v2219_v33, %v3908_v16 }
 0xaf1   :  { %v2170_v27 = vmax.f32 %v2160_v18, 0.0 }
 0xaf2   :  { %2403 = vst.msk [vmem:[%s4171_s13 + $0x50] sm:$0xff] %vm81_vm0, %v2243_v44 }
 0xaf3   :  { %2401 = vmatmul.msk.f32.gmra.mxu1 %vm1094_vm1, %v2170_v27 }
 0xaf5   :  { %v2221_v31 = vpop.f32.mrf.mxu1 }
 0xaf6   :  { %v2222_v2 = vadd.f32 %v3816_v36, %v2221_v31 }
 0xaf8   :  { %v2244_v41 = vadd.f32 %v2222_v2, %v3916_v53 }
 0xafa   :  { %2404 = vst.msk [vmem:[%s4171_s13 + $0x58] sm:$0xff] %vm81_vm0, %v2244_v41 }
 0xafd   :  { %v2224_v21 = vpop.f32.mrf.mxu1 }
 0xafe   :  { %v2225_v16 = vadd.f32 %v3816_v36, %v2224_v21 }
 0xb00   :  { %v2245_v9 = vadd.f32 %v2225_v16, %v3924_v54 }
 0xb02   :  { %2405 = vst.msk [vmem:[%s4171_s13 + $0x60] sm:$0xff] %vm81_vm0, %v2245_v9 }
 0xb25   :  { %v2227_v42 = vpop.f32.mrf.mxu1 }
 0xb26   :  { %v2228_v19 = vadd.f32 %v3816_v36, %v2227_v42 }
 0xb28   :  { %v2246_v53 = vadd.f32 %v2228_v19, %v3932_v30 }
 0xb2a   :  { %2406 = vst.msk [vmem:[%s4171_s13 + $0x68] sm:$0xff] %vm81_vm0, %v2246_v53 }
 0xb2d   :  { %v2230_v34 = vpop.f32.mrf.mxu1 }
 0xb2e   :  { %v2231_v25 = vadd.f32 %v3816_v36, %v2230_v34 }
 0xb30   :  { %v2247_v54 = vadd.f32 %v2231_v25, %v3940_v52 }
 0xb32   :  { %2407 = vst.msk [vmem:[%s4171_s13 + $0x70] sm:$0xff] %vm81_vm0, %v2247_v54 }
 0xb35   :  { %v2233_v29 = vpop.f32.mrf.mxu1 }
 0xb36   :  { %v2234_v11 = vadd.f32 %v3816_v36, %v2233_v29 }
 0xb38   :  { %v2248_v30 = vadd.f32 %v2234_v11, %v3948_v37 }
 0xb3a   :  { %2408 = vst.msk [vmem:[%s4171_s13 + $0x78] sm:$0xff] %vm81_vm0, %v2248_v30 }
 0xb63   :  { %v2236_v46 = vpop.f32.mrf.mxu1 }
 0xb64   :  { %v2237_v23 = vadd.f32 %v3816_v36, %v2236_v46 }
 0xb66   :  { %v2249_v52 = vadd.f32 %v2237_v23, %v3963_v50 }
 0xb68   :  { %2409 = vst.msk [vmem:[%s4171_s13 + $0x80] sm:$0xff] %vm81_vm0, %v2249_v52 }
 0xb70   :  { %v2239_v22 = vpop.f32.mrf.mxu1 }
 0xb71   :  { %v2240_v12 = vadd.f32 %v3816_v36, %v2239_v22 }
 0xb73   :  { %v2250_v37 = vadd.f32 %v2240_v12, %v3979_v40 }
 0xb75   :  { %2410 = vst.msk [vmem:[%s4171_s13 + $0x88] sm:$0x1] %vm106_vm2, %v2250_v37 }

</bundles_post_ra>
